<compile_context>
chip_gen: v5e
topology: v5e:2x2
jax: 0.10.0
libtpu: 0.0.40
codegen_flags: <defaults>
</compile_context>

<pallas_src>
import functools

import jax
import jax.numpy as jnp
from jax.experimental import pallas as pl
from jax.experimental.pallas import tpu as pltpu


def _round_up(x, m):
    return ((x + m - 1) // m) * m


def _cdiv(a, b):
    return -(-a // b)


def _device_kind():
    try:
        return jax.devices()[0].device_kind.lower()
    except Exception:
        return ""


def _vmem_limit_bytes():
    """Scoped-VMEM limit ~= 3/4 of physical VMEM (64 MiB v7x, 128 MiB v5e/v6e)."""
    cap = 64 * 1024 * 1024
    try:
        cap = int(getattr(pltpu.get_tpu_info(), "vmem_capacity_bytes", cap))
    except Exception:
        pass
    return (cap * 3) // 4


def fused_encode_pool_kernel(emb_ref, w_ref, b_ref, m_ref, d_ref, o_ref, *,
                             tanh_dtype):
    """Per (batch-tile, H-tile, seq-tile) grid step:
         h    = tanh(emb @ W[:, j] + b[j])   (MXU matmul, f32 accumulate,
                                              bias/tanh in `tanh_dtype`)
         out += sum_s mask * h               (accumulated in the resident f32
                                              output block)
       Last seq step: out /= clamp(sum_s mask, 1e-9)  (denominator precomputed
       in the wrapper, streamed as a tiny (bt, 1) f32 input).
    """
    s_idx = pl.program_id(2)

    @pl.when(s_idx == 0)
    def _init():
        o_ref[...] = jnp.zeros_like(o_ref)

    bt, st, H = emb_ref.shape

    # Fused encoder epilogue: bf16 operands on the MXU, f32 accumulation.
    emb2d = emb_ref[...].reshape(bt * st, H)                       # bf16
    h2d = jnp.dot(emb2d, w_ref[...], preferred_element_type=jnp.float32)
    # Bias + tanh in bf16 on v6e/v7x (bf16 VPU/EUP), f32 on v5e.
    h2d = jnp.tanh(h2d.astype(tanh_dtype) + b_ref[...].astype(tanh_dtype))
    h = h2d.astype(jnp.float32).reshape(bt, st, -1)                # (bt, st, hn)

    # Masked accumulate in f32 directly into the resident output block.
    m = m_ref[...]                                                 # (bt, st, 1) f32
    o_ref[...] += jnp.sum(h * m, axis=1)                           # (bt, hn)

    @pl.when(s_idx == pl.num_programs(2) - 1)
    def _finalize():
        o_ref[...] = o_ref[...] / d_ref[...]                       # clamp done in wrapper


def encode_mean_pool(emb, proj_w, proj_b, attention_mask, *,
                     bt=None, st=None, hn=None, tanh_dtype=None):
    """Fused (emb @ W + b) -> tanh -> masked mean pooling over the seq axis."""
    B, S, H = emb.shape
    emb_itemsize = emb.dtype.itemsize
    kind = _device_kind()

    if tanh_dtype is None:
        # v5e has no bf16 VPU/EUP paths; keep its bias/tanh math in f32 there.
        tanh_dtype = jnp.float32 if ("v5 lite" in kind or "v5e" in kind) \
            else jnp.bfloat16

    # ---- batch tile ----------------------------------------------------------
    if bt is None:
        bt = B if B <= 8 else 8
    if bt >= B:
        bt, Bp = B, B
    else:
        bt = max(8, _round_up(bt, 8))
        Bp = _round_up(B, bt)

    # ---- output-H tile (extra parallel grid axis for v7x megacore) -----------
    if hn is None:
        hn = H
        if (Bp // bt) < 2 and H % 128 == 0 and H >= 256 and "v7" in kind:
            # v7x has 2 TensorCores; when the batch axis alone is a single tile,
            # tile the output H dim (128 lanes) so both cores get work.
            hn = 128
    assert hn == H or (H % hn == 0 and hn % 128 == 0), (H, hn)

    # ---- seq tile: sized from the *real* per-step VMEM footprint -------------
    vmem_limit = _vmem_limit_bytes()
    if st is None:
        # Per unit of st: double-buffered bf16 emb tile + f32 mask tile, plus
        # ~3 f32 intermediates of shape (bt*st, hn) (matmul out, tanh, h*m).
        per_st = bt * (2 * H * emb_itemsize + 2 * 4 + 3 * hn * 4)
        fixed = 2 * (H * hn * proj_w.dtype.itemsize + hn * 4
                     + bt * 4 + bt * hn * 4)
        budget = (vmem_limit * 3) // 4          # headroom for compiler scratch
        st_target = max(16, (budget - fixed) // per_st)
    else:
        st_target = max(16, st)
    # Pick the step count first so Sp barely exceeds S (avoids the old
    # round_up(S, st) padding blow-up); st is a multiple of 16 for bf16 packing.
    n_steps = max(1, _cdiv(S, st_target))
    st = _round_up(_cdiv(S, n_steps), 16)
    Sp = n_steps * st

    # ---- pad to tile multiples (padded mask = 0 keeps the sums exact) --------
    emb_p = jnp.pad(emb, ((0, Bp - B), (0, Sp - S), (0, 0)))
    mask_f32 = attention_mask.astype(jnp.float32)
    mask_p = jnp.pad(mask_f32, ((0, Bp - B), (0, Sp - S)))[..., None]
    # torch.clamp(mask.sum(1), min=1e-9) depends only on the mask: compute once
    # here instead of re-reducing it on every grid step.
    denom = jnp.maximum(jnp.sum(mask_p, axis=1), 1e-9)             # (Bp, 1) f32

    grid = (Bp // bt, H // hn, Sp // st)

    kernel = functools.partial(fused_encode_pool_kernel, tanh_dtype=tanh_dtype)

    out = pl.pallas_call(
        kernel,
        out_shape=jax.ShapeDtypeStruct((Bp, H), jnp.float32),
        grid_spec=pltpu.PrefetchScalarGridSpec(
            num_scalar_prefetch=0,
            grid=grid,
            in_specs=[
                pl.BlockSpec((bt, st, H), lambda b, j, s: (b, s, 0)),   # emb (bf16)
                pl.BlockSpec((H, hn), lambda b, j, s: (0, j)),          # proj_w
                pl.BlockSpec((1, hn), lambda b, j, s: (0, j)),          # proj_b
                pl.BlockSpec((bt, st, 1), lambda b, j, s: (b, s, 0)),   # mask (f32)
                pl.BlockSpec((bt, 1), lambda b, j, s: (b, 0)),          # denom
            ],
            out_specs=pl.BlockSpec((bt, hn), lambda b, j, s: (b, j)),   # resident over s
        ),
        compiler_params=pltpu.CompilerParams(
            dimension_semantics=("parallel", "parallel", "arbitrary"),
            vmem_limit_bytes=vmem_limit,
        ),
    )(emb_p, proj_w, proj_b.reshape(1, H), mask_p, denom)

    return out[:B] if Bp != B else out


def init_params(key, vocab_size, hidden):
    """Deterministic synthetic parameters (stand-in for the frozen encoder)."""
    k_emb, k_w, k_b = jax.random.split(key, 3)
    return {
        # bf16 weights/activations (MiniLM-style encoder dtype); the kernel
        # accumulates in f32 on the MXU.
        "embedding": (jax.random.normal(k_emb, (vocab_size, hidden), jnp.float32)
                      * 0.02).astype(jnp.bfloat16),
        "proj_w": (jax.random.normal(k_w, (hidden, hidden), jnp.float32)
                   * 0.02).astype(jnp.bfloat16),
        "proj_b": jax.random.normal(k_b, (hidden,), jnp.float32) * 0.02,
    }


def uns_model2_forward(params, inputs, *, bt=None, st=None, hn=None,
                       tanh_dtype=None):
    """Mirrors uns_model2.forward: feature = MeanPooling(encoder(inputs), mask)."""
    ids = inputs["input_ids"]                       # (B, S) int32
    emb = params["embedding"][ids]                  # (B, S, H) bf16, plain-JAX gather
    return encode_mean_pool(emb, params["proj_w"], params["proj_b"],
                            inputs["attention_mask"],
                            bt=bt, st=st, hn=hn, tanh_dtype=tanh_dtype)


def _reference(params, inputs):
    """Pure-JAX reference of the encoder epilogue + MeanPooling."""
    emb = params["embedding"][inputs["input_ids"]].astype(jnp.float32)
    h = jnp.tanh(jnp.einsum("bsh,hk->bsk", emb,
                            params["proj_w"].astype(jnp.float32))
                 + params["proj_b"])
    m = inputs["attention_mask"].astype(jnp.float32)[:, :, None]
    return (h * m).sum(1) / jnp.maximum(m.sum(1), 1e-9)


if __name__ == "__main__":
    B, S, H, VOCAB = 10, 40, 384, 64

    key = jax.random.PRNGKey(0)
    k_params, k_ids, k_len = jax.random.split(key, 3)

    params = init_params(k_params, VOCAB, H)

    input_ids = jax.random.randint(k_ids, (B, S), 0, VOCAB, dtype=jnp.int32)
    # attention mask with some padded (zero) positions, like real tokenized batches
    lengths = jax.random.randint(k_len, (B,), 1, S + 1, dtype=jnp.int32)
    attention_mask = (jnp.arange(S)[None, :] < lengths[:, None]).astype(jnp.int32)

    inputs = {"input_ids": input_ids, "attention_mask": attention_mask}
    ref = _reference(params, inputs)

    # 1) Production-style config: auto-derived tiles (single seq step here) and
    #    the per-chip default tanh dtype (bf16 on v6e/v7x, f32 on v5e).
    feat = jax.block_until_ready(uns_model2_forward(params, inputs))
    assert feat.shape == (B, H)
    assert jnp.allclose(feat, ref, atol=1e-3, rtol=1e-2), \
        float(jnp.max(jnp.abs(feat - ref)))

    # 2) Small explicit tiles + H tiling + f32 tanh: exercises the multi-step
    #    accumulator, B/S padding and the H-parallel axis (grid = (2, 3, 3))
    #    at tight tolerance.  Production shapes use the auto-derived tiles.
    feat2 = jax.block_until_ready(
        uns_model2_forward(params, inputs, bt=8, st=16, hn=128,
                           tanh_dtype=jnp.float32))
    assert feat2.shape == (B, H)
    assert jnp.allclose(feat2, ref, atol=5e-5, rtol=1e-3), \
        float(jnp.max(jnp.abs(feat2 - ref)))

    print("KERNEL_OK")
</pallas_src>

<mosaic_0001>
module attributes {stable_mosaic.version = 11 : i64} {
  func.func @fused_encode_pool_kernel(%arg0: i32, %arg1: i32, %arg2: i32, %arg3: memref<8x48x384xbf16, #tpu.memory_space<vmem>>, %arg4: memref<384x384xbf16, #tpu.memory_space<vmem>>, %arg5: memref<1x384xf32, #tpu.memory_space<vmem>>, %arg6: memref<8x48x1xf32, #tpu.memory_space<vmem>>, %arg7: memref<8x1xf32, #tpu.memory_space<vmem>>, %arg8: memref<8x384xf32, #tpu.memory_space<vmem>>) attributes {dimension_semantics = [#tpu.dimension_semantics<parallel>, #tpu.dimension_semantics<parallel>, #tpu.dimension_semantics<arbitrary>], iteration_bounds = array<i64: 2, 1, 1>, scalar_prefetch = 0 : i64, scratch_operands = 0 : i64, tpu.core_type = #tpu.core_type<tc>, window_params = [{transform_indices = @transform_0, window_bounds = array<i64: 8, 48, 384>}, {transform_indices = @transform_1, window_bounds = array<i64: 384, 384>}, {transform_indices = @transform_2, window_bounds = array<i64: 1, 384>}, {transform_indices = @transform_3, window_bounds = array<i64: 8, 48, 1>}, {transform_indices = @transform_4, window_bounds = array<i64: 8, 1>}, {transform_indices = @transform_5, window_bounds = array<i64: 8, 384>}]} {
    %c0_i32 = arith.constant 0 : i32
    %0 = arith.cmpi eq, %arg2, %c0_i32 : i32
    %1 = arith.extui %0 : i1 to i32
    %c0_i32_0 = arith.constant 0 : i32
    %2 = arith.cmpi ne, %1, %c0_i32_0 : i32
    scf.if %2 {
      %cst_17 = arith.constant 0.000000e+00 : f32
      %25 = vector.broadcast %cst_17 : f32 to vector<8x384xf32>
      %c0_18 = arith.constant 0 : index
      %c0_19 = arith.constant 0 : index
      %26 = vector.load %arg8[%c0_18, %c0_19] : memref<8x384xf32, #tpu.memory_space<vmem>>, vector<8x384xf32>
      tpu.vector_store %arg8[%c0_18, %c0_19], %25 {strides = array<i32>} : memref<8x384xf32, #tpu.memory_space<vmem>>, vector<8x384xf32>,
    } else {
    }
    %c0 = arith.constant 0 : index
    %c0_1 = arith.constant 0 : index
    %c0_2 = arith.constant 0 : index
    %3 = vector.load %arg3[%c0, %c0_1, %c0_2] : memref<8x48x384xbf16, #tpu.memory_space<vmem>>, vector<8x48x384xbf16>
    %4 = vector.shape_cast %3 : vector<8x48x384xbf16> to vector<384x384xbf16>
    %c0_3 = arith.constant 0 : index
    %c0_4 = arith.constant 0 : index
    %5 = vector.load %arg4[%c0_3, %c0_4] : memref<384x384xbf16, #tpu.memory_space<vmem>>, vector<384x384xbf16>
    %cst = arith.constant dense<0.000000e+00> : vector<384x384xf32>
    %6 = tpu.matmul %4, %5, %cst {dimension_numbers = #tpu.dot_dimension_numbers<[1], [0], [0], [1], [0, 0, 1, 1], [], []>} : vector<384x384xbf16>, vector<384x384xbf16>, vector<384x384xf32> -> vector<384x384xf32>
    %7 = arith.truncf %6 : vector<384x384xf32> to vector<384x384xbf16>
    %c0_5 = arith.constant 0 : index
    %c0_6 = arith.constant 0 : index
    %8 = vector.load %arg5[%c0_5, %c0_6] : memref<1x384xf32, #tpu.memory_space<vmem>>, vector<1x384xf32>
    %9 = arith.truncf %8 : vector<1x384xf32> to vector<1x384xbf16>
    %10 = vector.broadcast %9 : vector<1x384xbf16> to vector<384x384xbf16>
    %11 = arith.addf %7, %10 : vector<384x384xbf16>
    %12 = math.tanh %11 : vector<384x384xbf16>
    %13 = arith.extf %12 : vector<384x384xbf16> to vector<384x384xf32>
    %14 = vector.shape_cast %13 : vector<384x384xf32> to vector<8x48x384xf32>
    %c0_7 = arith.constant 0 : index
    %c0_8 = arith.constant 0 : index
    %c0_9 = arith.constant 0 : index
    %15 = vector.load %arg6[%c0_7, %c0_8, %c0_9] : memref<8x48x1xf32, #tpu.memory_space<vmem>>, vector<8x48x1xf32>
    %c0_10 = arith.constant 0 : index
    %c0_11 = arith.constant 0 : index
    %16 = vector.load %arg8[%c0_10, %c0_11] : memref<8x384xf32, #tpu.memory_space<vmem>>, vector<8x384xf32>
    %17 = vector.broadcast %15 : vector<8x48x1xf32> to vector<8x48x384xf32>
    %18 = arith.mulf %14, %17 : vector<8x48x384xf32>
    %cst_12 = arith.constant dense<0.000000e+00> : vector<8x384xf32>
    %19 = vector.multi_reduction <add>, %18, %cst_12 [1] : vector<8x48x384xf32> to vector<8x384xf32>
    %20 = arith.addf %16, %19 : vector<8x384xf32>
    %c0_13 = arith.constant 0 : index
    %c0_14 = arith.constant 0 : index
    %21 = vector.load %arg8[%c0_13, %c0_14] : memref<8x384xf32, #tpu.memory_space<vmem>>, vector<8x384xf32>
    tpu.vector_store %arg8[%c0_13, %c0_14], %20 {strides = array<i32>} : memref<8x384xf32, #tpu.memory_space<vmem>>, vector<8x384xf32>,
    %c0_i32_15 = arith.constant 0 : i32
    %22 = arith.cmpi eq, %arg2, %c0_i32_15 : i32
    %23 = arith.extui %22 : i1 to i32
    %c0_i32_16 = arith.constant 0 : i32
    %24 = arith.cmpi ne, %23, %c0_i32_16 : i32
    scf.if %24 {
      %c0_17 = arith.constant 0 : index
      %c0_18 = arith.constant 0 : index
      %25 = vector.load %arg8[%c0_17, %c0_18] : memref<8x384xf32, #tpu.memory_space<vmem>>, vector<8x384xf32>
      %c0_19 = arith.constant 0 : index
      %c0_20 = arith.constant 0 : index
      %26 = vector.load %arg7[%c0_19, %c0_20] : memref<8x1xf32, #tpu.memory_space<vmem>>, vector<8x1xf32>
      %27 = vector.broadcast %26 : vector<8x1xf32> to vector<8x384xf32>
      %28 = arith.divf %25, %27 : vector<8x384xf32>
      %c0_21 = arith.constant 0 : index
      %c0_22 = arith.constant 0 : index
      %29 = vector.load %arg8[%c0_21, %c0_22] : memref<8x384xf32, #tpu.memory_space<vmem>>, vector<8x384xf32>
      tpu.vector_store %arg8[%c0_21, %c0_22], %28 {strides = array<i32>} : memref<8x384xf32, #tpu.memory_space<vmem>>, vector<8x384xf32>,
    } else {
    }
    return
  }
  func.func @transform_0(%arg0: i32, %arg1: i32, %arg2: i32) -> (i32, i32, i32) {
    %c0_i32 = arith.constant 0 : i32
    %c0_i32_0 = arith.constant 0 : i32
    return %arg0, %arg2, %c0_i32 : i32, i32, i32
  }
  func.func @transform_1(%arg0: i32, %arg1: i32, %arg2: i32) -> (i32, i32) {
    %c0_i32 = arith.constant 0 : i32
    %c0_i32_0 = arith.constant 0 : i32
    return %c0_i32, %arg1 : i32, i32
  }
  func.func @transform_2(%arg0: i32, %arg1: i32, %arg2: i32) -> (i32, i32) {
    %c0_i32 = arith.constant 0 : i32
    %c0_i32_0 = arith.constant 0 : i32
    return %c0_i32, %arg1 : i32, i32
  }
  func.func @transform_3(%arg0: i32, %arg1: i32, %arg2: i32) -> (i32, i32, i32) {
    %c0_i32 = arith.constant 0 : i32
    %c0_i32_0 = arith.constant 0 : i32
    return %arg0, %arg2, %c0_i32 : i32, i32, i32
  }
  func.func @transform_4(%arg0: i32, %arg1: i32, %arg2: i32) -> (i32, i32) {
    %c0_i32 = arith.constant 0 : i32
    %c0_i32_0 = arith.constant 0 : i32
    return %arg0, %c0_i32 : i32, i32
  }
  func.func @transform_5(%arg0: i32, %arg1: i32, %arg2: i32) -> (i32, i32) {
    %c0_i32 = arith.constant 0 : i32
    return %arg0, %arg1 : i32, i32
  }
}

</mosaic_0001>

<bundles_post_ra>
// kernel: tpu_custom_call.1
= control target key start
LH: loop header
LB: loop body
LE: loop exit
PB: predicated region body
PF: predicated region fallthrough
CT: control target
= control target key end

     0   :  { %10 = vsyncpa [#allocation3], 0  ;;  %s7801_s0 = inlined_call_operand.hbm [shape: bf16[16,48,384], index: 0, kind: input, shape index: {}]   ;;  %s7802_s1 = inlined_call_operand.vmem [shape: bf16[384,384], index: 1, kind: input, shape index: {}]   ;;  %s7803_s2 = inlined_call_operand.vmem [shape: f32[1,384], index: 2, kind: input, shape index: {}]   ;;  %s7804_s3 = inlined_call_operand.vmem [shape: f32[16,48,1], index: 3, kind: input, shape index: {}]   ;;  %s7805_s4 = inlined_call_operand.vmem [shape: f32[16,1], index: 4, kind: input, shape index: {}]   ;;  %s7806_s5 = inlined_call_operand.hbm [shape: f32[16,384], index: 5, kind: output, shape index: {}]  }
   0x1   :  { %12 = vsyncpa [#allocation3 + $0x1], 0 }
   0x2   :  { %13 = vsyncpa [#allocation4], 0 }
   0x3   :  { %15 = vsyncpa [#allocation4 + $0x1], 0  ;;  %s5770_s18 = smov 0   ;;  %s5772_s19 = smov 0  }
   0x4   :  { %s5774_s20 = smov 0   ;;  %s5776_s21 = smov 0  }
   0x5   :  { %s5778_s22 = smov 0   ;;  %s5780_s23 = smov 0  }
   0x6 LB: > { %s4498_s24 = sadd.s32 4294967295, %s5735_s23   ;;  %s4499_s25 = sadd.s32 4294967294, %s5735_s23   ;;  %s5735_s23 = sphi %s5780_s23, %s21_s23   ;;  %s5731_s22 = sphi %s5778_s22, %s8207_s22   ;;  %s5727_s21 = sphi %s5776_s21, %s8206_s21   ;;  %s5723_s20 = sphi %s5774_s20, %s8205_s20   ;;  %s5719_s19 = sphi %s5772_s19, %s8204_s19   ;;  %s5715_s18 = sphi %s5770_s18, %s8203_s18  }
   0x7   : > { %s40_s26 = sadd.s32 1, %s5731_s22  ;;  %s49_s27 = sadd.s32 1, %s5723_s20 }
   0x8   : > { %p42_p0 = scmp.ge.s32.totalorder %s40_s26, 2  ;;  %p56_p1 = scmp.ne.s32.totalorder %s5723_s20, %s5719_s19 }
   0x9   : > { %p57_p2 = scmp.eq.s32.totalorder %s5735_s23, 0  ;;  %p62_p3 = scmp.ne.s32.totalorder %s5719_s19, %s5715_s18 }
   0xa   : > { %s8209_s26 = smov (%p42_p0, %s40_s26), 0  ;;  %p63_p5 = scmp.eq.s32.totalorder %s4498_s24, 0 }
   0xb   : > { %p5811_p4 = por %p57_p2, %p56_p1  ;;  %s44_s29 = ssub.s32 %s5731_s22, %s8209_s26 }
   0xc   : > { %p194_p6 = scmp.eq.s32.totalorder %s4498_s24, 1  ;;  %p47_p7 = scmp.eq.s32.totalorder %s44_s29, 0 }
   0xd   : > { %p5817_p8 = por %p63_p5, %p62_p3  ;;  %p200_p10 = scmp.eq.s32.totalorder %s4499_s25, 1 }
   0xe   : > { %p5821_p9 = por %p194_p6, %p56_p1  ;;  %p4503_p12 = scmp.ge.s32.totalorder %s5735_s23, 2 }
   0xf   : > { %s5826_s7 = scalar_select %p47_p7, %s5723_s20, %s49_s27  }
  0x10   : > { %p5828_p11 = por %p200_p10, %p62_p3  ;;  %p5276_p13 = scmp.lt.s32.totalorder %s5735_s23, 2 }
  0x11   : > { %s237_s9 = sand.u32 1, %s5723_s20   ;;  %s5259_s11 = smul.u32 576, %s5731_s22 }
  0x12   : > { %s5258_s10 = smul.u32 576, %s237_s9  ;;  %p5269_p0 = pnand %p5276_p13, %p5811_p4 }
  0x13   : > { %s250_s14 = scalar_lea.hbm %s7801_s0, %s5259_s11  ;;  %p4507_p1 = scmp.ge.s32.totalorder %s5735_s23, 1 }
  0x14   : > { %s241_s15 = scalar_lea.vmem [#allocation2], %s5258_s10  ;;  %s251_s17 = sshll.u32 %s250_s14, 4  ;;  %s252_s17 = int_to_ptr.hbm [resolvable:$true] %s251_s17 }
  0x15   : > { %s253_s16 = sshll.u32 %s241_s15, 4  ;;  %s238_s24 = scalar_lea.sflag [#allocation3], %s237_s9  ;;  %s254_s16 = int_to_ptr.vmem [resolvable:$true] %s253_s16 }
  0x16   : > { %s5737_s25 = smov 192   ;;  %s5738_s27 = smov 12  }
  0x17   : > { %5271 = dma.hbm_to_vmem [thread:$0]  (!%p5269_p0), %s252_s17, 9216, %s254_s16, %s238_s24, %s5737_s25, %s5737_s25, %s5738_s27  }
  0x18   : > { %p283_p2 = scmp.lt.s32.totalorder %s5735_s23, 3 }
  0x1a   : > { %p284_p3 = pnand %p4507_p1, %p283_p2 }
  0x1c   : > { %287 = sbr.rel (%p284_p3) target bundleno = 1117 (0x45d), region = 40 }
  0x21   : > { %s5844_s28 = sand.u32 1, %s5719_s19  }
  0x22   : > { %s5260_s29 = smul.u32 576, %s5844_s28  ;;  %s290_s10 = scalar_lea.sflag [#allocation3], %s5844_s28 }
  0x24   : > { %s5848_s11 = scalar_lea.vmem [#allocation2], %s5260_s29 }
  0x25   : > { %5706 = dma.done.wait (%p5817_p8), %s290_s10, 9216  }
  0x26   : > { %5708 = vsyncadd (%p5817_p8), %s290_s10, 4294958080  ;;  %v4885_v0 = vld [vmem:[%s7802_s1 + $0xa8] sm:$0xf]  ;;  %v5184_v1 = vld [vmem:[%s7802_s1 + $0xb0] sm:$0xf0]  ;;  %s4508_s13 = sshll.u32 %s5727_s21, 3 }
  0x27   : > { %v4873_v2 = vld [vmem:[%s7802_s1 + $0x90] sm:$0xf]  ;;  %v4886_v3 = vor.u32 %v5184_v1, %v4885_v0  ;;  %v5181_v4 = vld [vmem:[%s7802_s1 + $0x98] sm:$0xf0]  ;;  %v4861_v6 = vld [vmem:[%s7802_s1 + $0x78] sm:$0xf] }
  0x28   : > { %v4874_v5 = vor.u32 %v5181_v4, %v4873_v2  ;;  %v5178_v7 = vld [vmem:[%s7802_s1 + $0x80] sm:$0xf0]  ;;  %v4849_v9 = vld [vmem:[%s7802_s1 + $0x60] sm:$0xf]  ;;  %v5175_v10 = vld [vmem:[%s7802_s1 + $0x68] sm:$0xf0] }
  0x29   : > { %1341 = vmatpush.bf16.msra.mxu0 %v4886_v3  ;;  %5234 = vmatpush.bf16.msra.mxu1 %v4886_v3  ;;  %v4862_v8 = vor.u32 %v5178_v7, %v4861_v6  ;;  %v4850_v11 = vor.u32 %v5175_v10, %v4849_v9  ;;  %v4837_v12 = vld [vmem:[%s7802_s1 + $0x48] sm:$0xf]  ;;  %v5172_v13 = vld [vmem:[%s7802_s1 + $0x50] sm:$0xf0]  ;;  %v4825_v15 = vld [vmem:[%s7802_s1 + $0x30] sm:$0xf] }
  0x2a   : > { %5235 = vmatpush.bf16.msra.mxu2 %v4886_v3  ;;  %5236 = vmatpush.bf16.msra.mxu3 %v4886_v3  ;;  %v4838_v14 = vor.u32 %v5172_v13, %v4837_v12  ;;  %v5169_v16 = vld [vmem:[%s7802_s1 + $0x38] sm:$0xf0]  ;;  %v4813_v18 = vld [vmem:[%s7802_s1 + $0x18] sm:$0xf]  ;;  %v5166_v19 = vld [vmem:[%s7802_s1 + $0x20] sm:$0xf0] }
  0x2b   : > { %v4826_v17 = vor.u32 %v5169_v16, %v4825_v15  ;;  %v4814_v20 = vor.u32 %v5166_v19, %v4813_v18  ;;  %v4801_v21 = vld [vmem:[%s7802_s1] sm:$0xf]  ;;  %v5163_v22 = vld [vmem:[%s7802_s1 + $0x8] sm:$0xf0]  ;;  %v4585_v25 = vld [vmem:[%s5848_s11 + $0x90] sm:$0xf] }
  0x2c   : > { %v4513_v23 = vld [vmem:[%s5848_s11] sm:$0xf]  ;;  %v5091_v24 = vld [vmem:[%s5848_s11 + $0x8] sm:$0xf0]  ;;  %v5109_v26 = vld [vmem:[%s5848_s11 + $0x98] sm:$0xf0]  ;;  %v4802_v31 = vor.u32 %v5163_v22, %v4801_v21 }
  0x2d   : > { %1342 = vmatpush.bf16.msra.mxu0 %v4874_v5  ;;  %5237 = vmatpush.bf16.msra.mxu1 %v4874_v5  ;;  %v5077_v27 = vld [vmem:[%s7802_s1 + $0x228] sm:$0xf]  ;;  %v5232_v28 = vld [vmem:[%s7802_s1 + $0x230] sm:$0xf0]  ;;  %v5183_v29 = vld [vmem:[%s7802_s1 + $0xac] sm:$0xf]  ;;  %v5937_v43 = vor.u32 %v5091_v24, %v4513_v23  ;;  %v5939_v44 = vor.u32 %v5109_v26, %v4585_v25 }
  0x2e   : > { %5238 = vmatpush.bf16.msra.mxu2 %v4874_v5  ;;  %5239 = vmatpush.bf16.msra.mxu3 %v4874_v5  ;;  %v4887_v30 = vld [vmem:[%s7802_s1 + $0xb4] sm:$0xf0]  ;;  %v4657_v32 = vld [vmem:[%s5848_s11 + $0x120] sm:$0xf]  ;;  %v5127_v33 = vld [vmem:[%s5848_s11 + $0x128] sm:$0xf0]  ;;  %v5078_v38 = vor.u32 %v5232_v28, %v5077_v27 }
  0x2f   : > { %v4729_v34 = vld [vmem:[%s5848_s11 + $0x1b0] sm:$0xf]  ;;  %v5145_v35 = vld [vmem:[%s5848_s11 + $0x1b8] sm:$0xf0]  ;;  %v4981_v36 = vld [vmem:[%s7802_s1 + $0x168] sm:$0xf]  ;;  %v4890_v39 = vor.u32 %v5183_v29, %v4887_v30  ;;  %v5950_v48 = vor.u32 %v5127_v33, %v4657_v32 }
  0x30   : > { %v5208_v37 = vld [vmem:[%s7802_s1 + $0x170] sm:$0xf0]  ;;  %v5207_v40 = vld [vmem:[%s7802_s1 + $0x16c] sm:$0xf]  ;;  %v4983_v41 = vld [vmem:[%s7802_s1 + $0x174] sm:$0xf0]  ;;  %v5952_v49 = vor.u32 %v5145_v35, %v4729_v34 }
  0x31   : > { %1343 = vmatpush.bf16.msra.mxu0 %v4862_v8  ;;  %5240 = vmatpush.bf16.msra.mxu1 %v4862_v8  ;;  %v5065_v42 = vld [vmem:[%s7802_s1 + $0x210] sm:$0xf]  ;;  %7903 = vst [vmem:[#allocation8_spill] sm:$0xff] %v5937_v43  ;;  %v5229_v45 = vld [vmem:[%s7802_s1 + $0x218] sm:$0xf0]  ;;  %v4982_v50 = vor.u32 %v5208_v37, %v4981_v36  ;;  %v4986_v51 = vor.u32 %v5207_v40, %v4983_v41  ;;  %p359_p4 = scmp.lt.s32.totalorder %s4508_s13, 15 }
  0x32   : > { %5241 = vmatpush.bf16.msra.mxu2 %v4862_v8  ;;  %5242 = vmatpush.bf16.msra.mxu3 %v4862_v8  ;;  %7904 = vst [vmem:[#allocation9_spill] sm:$0xff] %v5939_v44  ;;  %v5180_v46 = vld [vmem:[%s7802_s1 + $0x94] sm:$0xf]  ;;  %v4875_v47 = vld [vmem:[%s7802_s1 + $0x9c] sm:$0xf0]  ;;  %v5066_v54 = vor.u32 %v5229_v45, %v5065_v42  ;;  %p369_p5 = scmp.lt.s32.totalorder %s5727_s21, 1 }
  0x33   : > { %7905 = vst [vmem:[#allocation10_spill] sm:$0xff] %v5950_v48  ;;  %v4969_v52 = vld [vmem:[%s7802_s1 + $0x150] sm:$0xf]  ;;  %v5205_v53 = vld [vmem:[%s7802_s1 + $0x158] sm:$0xf0]  ;;  %v4878_v55 = vor.u32 %v5180_v46, %v4875_v47  ;;  %s8211_s13 = smov (!%p359_p4, %s4508_s13), 15 }
  0x34   : > { %7906 = vst [vmem:[#allocation11_spill] sm:$0xff] %v5952_v49  ;;  %v5204_v56 = vld [vmem:[%s7802_s1 + $0x154] sm:$0xf]  ;;  %v4971_v57 = vld [vmem:[%s7802_s1 + $0x15c] sm:$0xf0]  ;;  %v4970_v62 = vor.u32 %v5205_v53, %v4969_v52  ;;  %s7269_s30 = scalar_select %p369_p5, %s5727_s21, 1 }
  0x35   : > { %1344 = vmatpush.bf16.msra.mxu0 %v4850_v11  ;;  %5243 = vmatpush.bf16.msra.mxu1 %v4850_v11  ;;  %v5053_v58 = vld [vmem:[%s7802_s1 + $0x1f8] sm:$0xf]  ;;  %v5226_v59 = vld [vmem:[%s7802_s1 + $0x200] sm:$0xf0]  ;;  %v5177_v60 = vld [vmem:[%s7802_s1 + $0x7c] sm:$0xf]  ;;  %v4974_v63 = vor.u32 %v5204_v56, %v4971_v57 }
  0x36   : > { %5244 = vmatpush.bf16.msra.mxu2 %v4850_v11  ;;  %5245 = vmatpush.bf16.msra.mxu3 %v4850_v11  ;;  %v4863_v61 = vld [vmem:[%s7802_s1 + $0x84] sm:$0xf0]  ;;  %v4957_v0 = vld [vmem:[%s7802_s1 + $0x138] sm:$0xf]  ;;  %v5202_v1 = vld [vmem:[%s7802_s1 + $0x140] sm:$0xf0]  ;;  %v5054_v2 = vor.u32 %v5226_v59, %v5053_v58 }
  0x37   : > { %v4866_v3 = vor.u32 %v5177_v60, %v4863_v61  ;;  %v5201_v4 = vld [vmem:[%s7802_s1 + $0x13c] sm:$0xf]  ;;  %v4959_v5 = vld [vmem:[%s7802_s1 + $0x144] sm:$0xf0]  ;;  %v5041_v6 = vld [vmem:[%s7802_s1 + $0x1e0] sm:$0xf]  ;;  %v4958_v10 = vor.u32 %v5202_v1, %v4957_v0 }
  0x38   : > { %v5223_v7 = vld [vmem:[%s7802_s1 + $0x1e8] sm:$0xf0]  ;;  %v5174_v8 = vld [vmem:[%s7802_s1 + $0x64] sm:$0xf]  ;;  %v4851_v9 = vld [vmem:[%s7802_s1 + $0x6c] sm:$0xf0]  ;;  %v4962_v11 = vor.u32 %v5201_v4, %v4959_v5 }
  0x39   : > { %1345 = vmatpush.bf16.msra.mxu0 %v4838_v14  ;;  %5246 = vmatpush.bf16.msra.mxu1 %v4838_v14  ;;  %v4945_v12 = vld [vmem:[%s7802_s1 + $0x120] sm:$0xf]  ;;  %v5042_v13 = vor.u32 %v5223_v7, %v5041_v6  ;;  %v5199_v15 = vld [vmem:[%s7802_s1 + $0x128] sm:$0xf0]  ;;  %v5198_v16 = vld [vmem:[%s7802_s1 + $0x124] sm:$0xf] }
  0x3a   : > { %5247 = vmatpush.bf16.msra.mxu2 %v4838_v14  ;;  %5248 = vmatpush.bf16.msra.mxu3 %v4838_v14  ;;  %v4854_v14 = vor.u32 %v5174_v8, %v4851_v9  ;;  %v4525_v18 = vld [vmem:[%s5848_s11 + $0x18] sm:$0xf]  ;;  %v5094_v19 = vld [vmem:[%s5848_s11 + $0x20] sm:$0xf0]  ;;  %v5112_v21 = vld [vmem:[%s5848_s11 + $0xb0] sm:$0xf0]  ;;  %v4946_v26 = vor.u32 %v5199_v15, %v4945_v12 }
  0x3b   : > { %v4669_v22 = vld [vmem:[%s5848_s11 + $0x138] sm:$0xf]  ;;  %v5130_v23 = vld [vmem:[%s5848_s11 + $0x140] sm:$0xf0]  ;;  %v4741_v24 = vld [vmem:[%s5848_s11 + $0x1c8] sm:$0xf]  ;;  %v6026_v28 = vor.u32 %v5094_v19, %v4525_v18 }
  0x3c   : > { %v5148_v25 = vld [vmem:[%s5848_s11 + $0x1d0] sm:$0xf0]  ;;  %v6030_v30 = vor.u32 %v5130_v23, %v4669_v22  ;;  %v5029_v32 = vld [vmem:[%s7802_s1 + $0x1c8] sm:$0xf]  ;;  %v5171_v34 = vld [vmem:[%s7802_s1 + $0x4c] sm:$0xf] }
  0x3d   : > { %1346 = vmatpush.bf16.msra.mxu0 %v4826_v17  ;;  %5249 = vmatpush.bf16.msra.mxu1 %v4826_v17  ;;  %7907 = vst [vmem:[#allocation12_spill] sm:$0xff] %v6026_v28  ;;  %v5220_v33 = vld [vmem:[%s7802_s1 + $0x1d0] sm:$0xf0]  ;;  %v4839_v36 = vld [vmem:[%s7802_s1 + $0x54] sm:$0xf0]  ;;  %vm4266_vm0 = vcmask 1041409  }
  0x3e   : > { %5250 = vmatpush.bf16.msra.mxu2 %v4826_v17  ;;  %5251 = vmatpush.bf16.msra.mxu3 %v4826_v17  ;;  %v4947_v17 = vld [vmem:[%s7802_s1 + $0x12c] sm:$0xf0]  ;;  %7909 = vst [vmem:[#allocation14_spill] sm:$0xff] %v6030_v30  ;;  %v5030_v35 = vor.u32 %v5220_v33, %v5029_v32  ;;  %v4933_v37 = vld [vmem:[%s7802_s1 + $0x108] sm:$0xf]  ;;  %s4510_s25 = sshll.u32 %s7269_s30, 3 }
  0x3f   : > { %v4950_v27 = vor.u32 %v5198_v16, %v4947_v17  ;;  %v5195_v41 = vld [vmem:[%s7802_s1 + $0x10c] sm:$0xf]  ;;  %v4935_v42 = vld [vmem:[%s7802_s1 + $0x114] sm:$0xf0]  ;;  %v5017_v45 = vld [vmem:[%s7802_s1 + $0x1b0] sm:$0xf]  ;;  %s372_s10 = scalar_lea.vmem %s7805_s4, %s4510_s25 }
  0x40   : > { %v4938_v46 = vor.u32 %v5195_v41, %v4935_v42  ;;  %v5217_v47 = vld [vmem:[%s7802_s1 + $0x1b8] sm:$0xf0]  ;;  %v4609_v56 = vld [vmem:[%s5848_s11 + $0xc0] sm:$0xf]  ;;  %v5115_v57 = vld [vmem:[%s5848_s11 + $0xc8] sm:$0xf0] }
  0x41   : > { %1347 = vmatpush.bf16.msra.mxu0 %v4814_v20  ;;  %5252 = vmatpush.bf16.msra.mxu1 %v4814_v20  ;;  %v5018_v52 = vor.u32 %v5217_v47, %v5017_v45  ;;  %v4681_v58 = vld [vmem:[%s5848_s11 + $0x150] sm:$0xf]  ;;  %v5133_v59 = vld [vmem:[%s5848_s11 + $0x158] sm:$0xf0]  ;;  %v4753_v60 = vld [vmem:[%s5848_s11 + $0x1e0] sm:$0xf] }
  0x42   : > { %5253 = vmatpush.bf16.msra.mxu2 %v4814_v20  ;;  %5254 = vmatpush.bf16.msra.mxu3 %v4814_v20  ;;  %v4597_v20 = vld [vmem:[%s5848_s11 + $0xa8] sm:$0xf]  ;;  %v5151_v61 = vld [vmem:[%s5848_s11 + $0x1e8] sm:$0xf0]  ;;  %v6086_v0 = vor.u32 %v5133_v59, %v4681_v58  ;;  %v5192_v4 = vld [vmem:[%s7802_s1 + $0xf4] sm:$0xf] }
  0x43   : > { %v6028_v29 = vor.u32 %v5112_v21, %v4597_v20  ;;  %v6088_v1 = vor.u32 %v5151_v61, %v4753_v60  ;;  %v4923_v6 = vld [vmem:[%s7802_s1 + $0xfc] sm:$0xf0]  ;;  %v5005_v7 = vld [vmem:[%s7802_s1 + $0x198] sm:$0xf]  ;;  %v5214_v8 = vld [vmem:[%s7802_s1 + $0x1a0] sm:$0xf0] }
  0x44   : > { %7913 = vst [vmem:[#allocation18_spill] sm:$0xff] %v6086_v0  ;;  %v4926_v9 = vor.u32 %v5192_v4, %v4923_v6  ;;  %v4815_v12 = vld [vmem:[%s7802_s1 + $0x24] sm:$0xf0]  ;;  %v5100_v15 = vld [vmem:[%s5848_s11 + $0x50] sm:$0xf0]  ;;  %vm4268_vm1 = vcmask 1042434  }
  0x45   : > { %1348 = vmatpush.bf16.msra.mxu0 %v4802_v31  ;;  %5255 = vmatpush.bf16.msra.mxu1 %v4802_v31  ;;  %7908 = vst [vmem:[#allocation13_spill] sm:$0xff] %v6028_v29  ;;  %v4621_v16 = vld [vmem:[%s5848_s11 + $0xd8] sm:$0xf]  ;;  %v5118_v17 = vld [vmem:[%s5848_s11 + $0xe0] sm:$0xf0]  ;;  %vm4270_vm2 = vcmask 1043459  }
  0x46   : > { %5256 = vmatpush.bf16.msra.mxu2 %v4802_v31  ;;  %5257 = vmatpush.bf16.msra.mxu3 %v4802_v31  ;;  %v6032_v31 = vor.u32 %v5148_v25, %v4741_v24  ;;  %7914 = vst [vmem:[#allocation19_spill] sm:$0xff] %v6088_v1  ;;  %v4693_v18 = vld [vmem:[%s5848_s11 + $0x168] sm:$0xf]  ;;  %v5136_v19 = vld [vmem:[%s5848_s11 + $0x170] sm:$0xf0]  ;;  %v6128_v23 = vor.u32 %v5118_v17, %v4621_v16  ;;  %vm4272_vm3 = vcmask 1044484  }
  0x47   : > { %v4765_v20 = vld [vmem:[%s5848_s11 + $0x1f8] sm:$0xf]  ;;  %v5154_v21 = vld [vmem:[%s5848_s11 + $0x200] sm:$0xf0]  ;;  %v6130_v24 = vor.u32 %v5136_v19, %v4693_v18  ;;  %v5189_v32 = vld [vmem:[%s7802_s1 + $0xdc] sm:$0xf] }
  0x48   : > { %1349 = vmatmul.bf16.vlgmr.msra.gmra.mxu0 %v5937_v43  ;;  %1379 = vmatmul.bf16.vlgmr.msra.gmra.mxu1 %v5939_v44  ;;  %7910 = vst [vmem:[#allocation15_spill] sm:$0xff] %v6032_v31  ;;  %v6132_v25 = vor.u32 %v5154_v21, %v4765_v20  ;;  %v4897_v41 = vld [vmem:[%s7802_s1 + $0xc0] sm:$0xf]  ;;  %v5187_v45 = vld [vmem:[%s7802_s1 + $0xc8] sm:$0xf0]  ;;  %vm4274_vm4 = vcmask 1045509  }
  0x49   : > { %1409 = vmatmul.bf16.vlgmr.msra.gmra.mxu2 %v5950_v48  ;;  %1439 = vmatmul.bf16.vlgmr.msra.gmra.mxu3 %v5952_v49  ;;  %7916 = vst [vmem:[#allocation21_spill] sm:$0xff] %v6128_v23  ;;  %v4899_v47 = vld [vmem:[%s7802_s1 + $0xcc] sm:$0xf0]  ;;  %v5157_v59 = vld [vmem:[%s5848_s11 + $0x218] sm:$0xf0]  ;;  %vm4276_vm5 = vcmask 1046534  }
  0x4a   : > { %1599 = vmatpush.bf16.msrb.mxu2 %v5078_v38  ;;  %1728 = vmatpush.bf16.msrb.mxu3 %v4890_v39  ;;  %v5196_v38 = vld [vmem:[%s7802_s1 + $0x110] sm:$0xf0]  ;;  %v4842_v39 = vor.u32 %v5171_v34, %v4839_v36  ;;  %7917 = vst [vmem:[#allocation22_spill] sm:$0xff] %v6130_v24  ;;  %v4911_v34 = vld [vmem:[%s7802_s1 + $0xe4] sm:$0xf0]  ;;  %vm4278_vm9 = vcmask 1047559  }
  0x4b   : > { %1470 = vmatpush.bf16.msrb.mxu1 %v4982_v50  ;;  %1857 = vmatpush.bf16.msrb.mxu0 %v4986_v51  ;;  %v4934_v40 = vor.u32 %v5196_v38, %v4933_v37  ;;  %v5168_v50 = vld [vmem:[%s7802_s1 + $0x34] sm:$0xf]  ;;  %v4827_v51 = vld [vmem:[%s7802_s1 + $0x3c] sm:$0xf0]  ;;  %7918 = vst [vmem:[#allocation23_spill] sm:$0xff] %v6132_v25  ;;  %v4914_v37 = vor.u32 %v5189_v32, %v4911_v34  ;;  %s5261_s9 = smul.u32 24, %s5844_s28 }
  0x4c   : > { %v4830_v53 = vor.u32 %v5168_v50, %v4827_v51  ;;  %v5211_v36 = vld [vmem:[%s7802_s1 + $0x188] sm:$0xf0]  ;;  %v4898_v50 = vor.u32 %v5187_v45, %v4897_v41  ;;  %v4777_v58 = vld [vmem:[%s5848_s11 + $0x210] sm:$0xf]  ;;  %v4573_v16 = vld [vmem:[%s5848_s11 + $0x78] sm:$0xf] }
  0x4d   : > { %v4893_v4 = vld [vmem:[%s7802_s1 + $0xb0] sm:$0xf]  ;;  %v5106_v17 = vld [vmem:[%s5848_s11 + $0x80] sm:$0xf0]  ;;  %v4645_v18 = vld [vmem:[%s5848_s11 + $0x108] sm:$0xf] }
  0x4e   : > { %1600 = vmatpush.bf16.msrb.mxu2 %v5066_v54  ;;  %1729 = vmatpush.bf16.msrb.mxu3 %v4878_v55  ;;  %v4537_v54 = vld [vmem:[%s5848_s11 + $0x30] sm:$0xf]  ;;  %v5097_v55 = vld [vmem:[%s5848_s11 + $0x38] sm:$0xf0]  ;;  %v5124_v19 = vld [vmem:[%s5848_s11 + $0x110] sm:$0xf0]  ;;  %v6226_v32 = vor.u32 %v5106_v17, %v4573_v16 }
  0x4f   : > { %1471 = vmatpush.bf16.msrb.mxu1 %v4970_v62  ;;  %1858 = vmatpush.bf16.msrb.mxu0 %v4974_v63  ;;  %v6082_v62 = vor.u32 %v5097_v55, %v4537_v54  ;;  %v6084_v63 = vor.u32 %v5115_v57, %v4609_v56  ;;  %v4633_v54 = vld [vmem:[%s5848_s11 + $0xf0] sm:$0xf]  ;;  %v5121_v55 = vld [vmem:[%s5848_s11 + $0xf8] sm:$0xf0]  ;;  %v4705_v56 = vld [vmem:[%s5848_s11 + $0x180] sm:$0xf] }
  0x50   : > { %v5139_v57 = vld [vmem:[%s5848_s11 + $0x188] sm:$0xf0]  ;;  %v6184_v61 = vor.u32 %v5121_v55, %v4633_v54  ;;  %v4989_v6 = vld [vmem:[%s7802_s1 + $0x170] sm:$0xf]  ;;  %v4717_v20 = vld [vmem:[%s5848_s11 + $0x198] sm:$0xf] }
  0x51   : > { %7911 = vst [vmem:[#allocation16_spill] sm:$0xff] %v6082_v62  ;;  %v5142_v21 = vld [vmem:[%s5848_s11 + $0x1a0] sm:$0xf0]  ;;  %v4527_v45 = vld [vmem:[%s5848_s11 + $0x24] sm:$0xf0]  ;;  %s5263_s12 = smul.u32 24, %s5727_s21 }
  0x52   : > { %1601 = vmatpush.bf16.msrb.mxu2 %v5054_v2  ;;  %1730 = vmatpush.bf16.msrb.mxu3 %v4866_v3  ;;  %7912 = vst [vmem:[#allocation17_spill] sm:$0xff] %v6084_v63  ;;  %v4921_v2 = vld [vmem:[%s7802_s1 + $0xf0] sm:$0xf]  ;;  %v5193_v3 = vld [vmem:[%s7802_s1 + $0xf8] sm:$0xf0]  ;;  %v6230_v34 = vor.u32 %v5142_v21, %v4717_v20  ;;  %s343_s15 = scalar_lea.vmem [#allocation5], %s5261_s9 }
  0x53   : > { %1472 = vmatpush.bf16.msrb.mxu1 %v4958_v10  ;;  %1859 = vmatpush.bf16.msrb.mxu0 %v4962_v11  ;;  %v4922_v5 = vor.u32 %v5193_v3, %v4921_v2  ;;  %v5006_v10 = vor.u32 %v5214_v8, %v5005_v7  ;;  %v5165_v11 = vld [vmem:[%s7802_s1 + $0x1c] sm:$0xf]  ;;  %7920 = vst [vmem:[#allocation25_spill] sm:$0xff] %v6184_v61  ;;  %v4977_v54 = vld [vmem:[%s7802_s1 + $0x158] sm:$0xf]  ;;  %s4349_s14 = scalar_lea.hbm %s7806_s5, %s5263_s12  ;;  %s4351_s21 = sshll.u32 %s343_s15, 4  ;;  %s4352_s21 = int_to_ptr.vmem [resolvable:$true] %s4351_s21 }
  0x54   : > { %v6186_v2 = vor.u32 %v5139_v57, %v4705_v56  ;;  %v6188_v3 = vor.u32 %v5157_v59, %v4777_v58  ;;  %v5209_v8 = vld [vmem:[%s7802_s1 + $0x178] sm:$0xf0]  ;;  %7923 = vst [vmem:[#allocation28_spill] sm:$0xff] %v6226_v32  ;;  %v5206_v56 = vld [vmem:[%s7802_s1 + $0x160] sm:$0xf0]  ;;  %s4336_s17 = scalar_lea.sflag [#allocation4], %s5844_s28 }
  0x55   : > { %7925 = vst [vmem:[#allocation30_spill] sm:$0xff] %v6230_v34  ;;  %v4978_v57 = vor.u32 %v5206_v56, %v4977_v54  ;;  %v5228_v58 = vld [vmem:[%s7802_s1 + $0x214] sm:$0xf]  ;;  %v5067_v59 = vld [vmem:[%s7802_s1 + $0x21c] sm:$0xf0]  ;;  %s5673_s29 = scalar_lea.hbm %s7806_s5, 48 }
  0x56   : > { %1602 = vmatpush.bf16.msrb.mxu2 %v5042_v13  ;;  %1731 = vmatpush.bf16.msrb.mxu3 %v4854_v14  ;;  %v4818_v13 = vor.u32 %v5165_v11, %v4815_v12  ;;  %v4549_v14 = vld [vmem:[%s5848_s11 + $0x48] sm:$0xf]  ;;  %7921 = vst [vmem:[#allocation26_spill] sm:$0xff] %v6186_v2  ;;  %v4990_v11 = vor.u32 %v5209_v8, %v4989_v6  ;;  %v5230_v6 = vld [vmem:[%s7802_s1 + $0x220] sm:$0xf0] }
  0x57   : > { %1473 = vmatpush.bf16.msrb.mxu1 %v4946_v26  ;;  %1860 = vmatpush.bf16.msrb.mxu0 %v4950_v27  ;;  %v6126_v22 = vor.u32 %v5100_v15, %v4549_v14  ;;  %v4909_v26 = vld [vmem:[%s7802_s1 + $0xd8] sm:$0xf]  ;;  %v5190_v27 = vld [vmem:[%s7802_s1 + $0xe0] sm:$0xf0]  ;;  %7922 = vst [vmem:[#allocation27_spill] sm:$0xff] %v6188_v3 }
  0x58   : > { %1354 = vmatmul.bf16.gmra.mxu0 %v6026_v28  ;;  %1384 = vmatmul.bf16.gmra.mxu1 %v6028_v29  ;;  %v4910_v33 = vor.u32 %v5190_v27, %v4909_v26  ;;  %v5233_v14 = vld [vmem:[%s7802_s1 + $0x238] sm:$0xf0]  ;;  %v4789_v26 = vld [vmem:[%s5848_s11 + $0x228] sm:$0xf]  ;;  %v5160_v27 = vld [vmem:[%s5848_s11 + $0x230] sm:$0xf0] }
  0x59   : > { %1414 = vmatmul.bf16.gmra.mxu2 %v6030_v30  ;;  %1444 = vmatmul.bf16.gmra.mxu3 %v6032_v31  ;;  %7915 = vst [vmem:[#allocation20_spill] sm:$0xff] %v6126_v22  ;;  %v5096_v8 = vld [vmem:[%s5848_s11 + $0x34] sm:$0xf]  ;;  %v5099_v20 = vld [vmem:[%s5848_s11 + $0x4c] sm:$0xf] }
  0x5a   : > { %1603 = vmatpush.bf16.msrb.mxu2 %v5030_v35  ;;  %1732 = vmatpush.bf16.msrb.mxu3 %v4842_v39  ;;  %v4993_v35 = vld [vmem:[%s7802_s1 + $0x180] sm:$0xf]  ;;  %v5162_v39 = vld [vmem:[%s7802_s1 + $0x4] sm:$0xf]  ;;  %v4551_v21 = vld [vmem:[%s5848_s11 + $0x54] sm:$0xf0] }
  0x5b   : > { %1474 = vmatpush.bf16.msrb.mxu1 %v4934_v40  ;;  %1861 = vmatpush.bf16.msrb.mxu0 %v4938_v46  ;;  %v4994_v38 = vor.u32 %v5211_v36, %v4993_v35  ;;  %v4803_v40 = vld [vmem:[%s7802_s1 + $0xc] sm:$0xf0]  ;;  %v5186_v46 = vld [vmem:[%s7802_s1 + $0xc4] sm:$0xf]  ;;  %v6232_v35 = vor.u32 %v5160_v27, %v4789_v26  ;;  %v5101_v27 = vld [vmem:[%s5848_s11 + $0x58] sm:$0xf0] }
  0x5c   : > { %v4806_v42 = vor.u32 %v5162_v39, %v4803_v40  ;;  %v4902_v51 = vor.u32 %v5186_v46, %v4899_v47  ;;  %v5090_v36 = vld [vmem:[%s5848_s11 + $0x4] sm:$0xf]  ;;  %v5092_v39 = vld [vmem:[%s5848_s11 + $0x10] sm:$0xf0]  ;;  %v4533_v46 = vld [vmem:[%s5848_s11 + $0x20] sm:$0xf] }
  0x5d   : > { %7926 = vst [vmem:[#allocation31_spill] sm:$0xff] %v6232_v35  ;;  %v5095_v47 = vld [vmem:[%s5848_s11 + $0x28] sm:$0xf0]  ;;  %v4557_v26 = vld [vmem:[%s5848_s11 + $0x50] sm:$0xf] }
  0x5e   : > { %1604 = vmatpush.bf16.msrb.mxu2 %v5018_v52  ;;  %1733 = vmatpush.bf16.msrb.mxu3 %v4830_v53  ;;  %v4561_v52 = vld [vmem:[%s5848_s11 + $0x60] sm:$0xf]  ;;  %v5103_v53 = vld [vmem:[%s5848_s11 + $0x68] sm:$0xf0]  ;;  %v5102_v54 = vld [vmem:[%s5848_s11 + $0x64] sm:$0xf] }
  0x5f   : > { %1475 = vmatpush.bf16.msrb.mxu1 %v4922_v5  ;;  %1862 = vmatpush.bf16.msrb.mxu0 %v4926_v9  ;;  %v6182_v60 = vor.u32 %v5103_v53, %v4561_v52  ;;  %v5185_v5 = vld [vmem:[%s7802_s1 + $0xb8] sm:$0xf0]  ;;  %v5231_v9 = vld [vmem:[%s7802_s1 + $0x22c] sm:$0xf]  ;;  %v4881_v52 = vld [vmem:[%s7802_s1 + $0x98] sm:$0xf] }
  0x60   : > { %v4894_v7 = vor.u32 %v5185_v5, %v4893_v4  ;;  %v5182_v53 = vld [vmem:[%s7802_s1 + $0xa0] sm:$0xf0]  ;;  %v5073_v4 = vld [vmem:[%s7802_s1 + $0x218] sm:$0xf]  ;;  %v5070_v5 = vor.u32 %v5228_v58, %v5067_v59  ;;  %v4569_v56 = vld [vmem:[%s5848_s11 + $0x68] sm:$0xf] }
  0x61   : > { %7919 = vst [vmem:[#allocation24_spill] sm:$0xff] %v6182_v60  ;;  %v4882_v55 = vor.u32 %v5182_v53, %v4881_v52 }
  0x62   : > { %1605 = vmatpush.bf16.msrb.mxu2 %v5006_v10  ;;  %1734 = vmatpush.bf16.msrb.mxu3 %v4818_v13  ;;  %v5079_v10 = vld [vmem:[%s7802_s1 + $0x234] sm:$0xf0]  ;;  %v5085_v13 = vld [vmem:[%s7802_s1 + $0x230] sm:$0xf] }
  0x63   : > { %1476 = vmatpush.bf16.msrb.mxu1 %v4910_v33  ;;  %1863 = vmatpush.bf16.msrb.mxu0 %v4914_v37  ;;  %v5082_v12 = vor.u32 %v5231_v9, %v5079_v10  ;;  %v5086_v15 = vor.u32 %v5233_v14, %v5085_v13  ;;  %v6228_v33 = vor.u32 %v5124_v19, %v4645_v18  ;;  %v4515_v37 = vld [vmem:[%s5848_s11 + $0xc] sm:$0xf0]  ;;  %v4539_v9 = vld [vmem:[%s5848_s11 + $0x3c] sm:$0xf0]  ;;  %v4545_v10 = vld [vmem:[%s5848_s11 + $0x38] sm:$0xf] }
  0x64   : > { %v6242_v40 = vor.u32 %v5090_v36, %v4515_v37 }
  0x65   : > { %7924 = vst [vmem:[#allocation29_spill] sm:$0xff] %v6228_v33 }
  0x66   : > { %1606 = vmatpush.bf16.msrb.mxu2 %v4994_v38  ;;  %1735 = vmatpush.bf16.msrb.mxu3 %v4806_v42  ;;  %v4521_v38 = vld [vmem:[%s5848_s11 + $0x8] sm:$0xf]  ;;  %7927 = vst [vmem:[#allocation32_spill] sm:$0xff] %v6242_v40  ;;  %v5093_v42 = vld [vmem:[%s5848_s11 + $0x1c] sm:$0xf] }
  0x67   : > { %1477 = vmatpush.bf16.msrb.mxu1 %v4898_v50  ;;  %1864 = vmatpush.bf16.msrb.mxu0 %v4902_v51  ;;  %v6244_v41 = vor.u32 %v5092_v39, %v4521_v38  ;;  %v6254_v50 = vor.u32 %v5093_v42, %v4527_v45  ;;  %v6256_v51 = vor.u32 %v5095_v47, %v4533_v46 }
  0x68   : > { %1359 = vmatmul.bf16.gmra.mxu0 %v6082_v62  ;;  %1389 = vmatmul.bf16.gmra.mxu1 %v6084_v63  ;;  %v6318_v38 = vor.u32 %v5099_v20, %v4551_v21  ;;  %v6324_v45 = vor.u32 %v5101_v27, %v4557_v26  ;;  %v5203_v20 = vld [vmem:[%s7802_s1 + $0x148] sm:$0xf0] }
  0x69   : > { %1419 = vmatmul.bf16.gmra.mxu2 %v6086_v0  ;;  %1449 = vmatmul.bf16.gmra.mxu3 %v6088_v1  ;;  %7928 = vst [vmem:[#allocation33_spill] sm:$0xff] %v6244_v41 }
  0x6a   : > { %2115 = vmatpush.bf16.msra.mxu2 %v4894_v7  ;;  %2244 = vmatpush.bf16.msra.mxu3 %v4990_v11  ;;  %7929 = vst [vmem:[#allocation34_spill] sm:$0xff] %v6254_v50  ;;  %v5074_v7 = vor.u32 %v5230_v6, %v5073_v4  ;;  %v5098_v11 = vld [vmem:[%s5848_s11 + $0x40] sm:$0xf0] }
  0x6b   : > { %1986 = vmatpush.bf16.msra.mxu1 %v5082_v12  ;;  %2373 = vmatpush.bf16.msra.mxu0 %v5086_v15  ;;  %7930 = vst [vmem:[#allocation35_spill] sm:$0xff] %v6256_v51  ;;  %v6290_v12 = vor.u32 %v5096_v8, %v4539_v9  ;;  %v6296_v15 = vor.u32 %v5098_v11, %v4545_v10  ;;  %v4869_v8 = vld [vmem:[%s7802_s1 + $0x80] sm:$0xf]  ;;  %v5179_v9 = vld [vmem:[%s7802_s1 + $0x88] sm:$0xf0] }
  0x6c   : > { %7935 = vst [vmem:[#allocation40_spill] sm:$0xff] %v6318_v38  ;;  %v4965_v10 = vld [vmem:[%s7802_s1 + $0x140] sm:$0xf]  ;;  %v4870_v11 = vor.u32 %v5179_v9, %v4869_v8 }
  0x6d   : > { %7931 = vst [vmem:[#allocation36_spill] sm:$0xff] %v6290_v12  ;;  %v4966_v21 = vor.u32 %v5203_v20, %v4965_v10  ;;  %v5061_v8 = vld [vmem:[%s7802_s1 + $0x200] sm:$0xf]  ;;  %v5227_v10 = vld [vmem:[%s7802_s1 + $0x208] sm:$0xf0] }
  0x6e   : > { %2116 = vmatpush.bf16.msra.mxu2 %v4882_v55  ;;  %2245 = vmatpush.bf16.msra.mxu3 %v4978_v57  ;;  %7932 = vst [vmem:[#allocation37_spill] sm:$0xff] %v6296_v15  ;;  %v4563_v55 = vld [vmem:[%s5848_s11 + $0x6c] sm:$0xf0]  ;;  %v5104_v57 = vld [vmem:[%s5848_s11 + $0x70] sm:$0xf0] }
  0x6f   : > { %1987 = vmatpush.bf16.msra.mxu1 %v5070_v5  ;;  %2374 = vmatpush.bf16.msra.mxu0 %v5074_v7  ;;  %7936 = vst [vmem:[#allocation41_spill] sm:$0xff] %v6324_v45  ;;  %v6346_v4 = vor.u32 %v5102_v54, %v4563_v55  ;;  %v6352_v7 = vor.u32 %v5104_v57, %v4569_v56  ;;  %v5225_v56 = vld [vmem:[%s7802_s1 + $0x1fc] sm:$0xf]  ;;  %v5055_v57 = vld [vmem:[%s7802_s1 + $0x204] sm:$0xf0] }
  0x70   : > { %v5058_v9 = vor.u32 %v5225_v56, %v5055_v57  ;;  %v5105_v20 = vld [vmem:[%s5848_s11 + $0x7c] sm:$0xf] }
  0x71   : > { %7939 = vst [vmem:[#allocation44_spill] sm:$0xff] %v6346_v4 }
  0x72   : > { %7940 = vst [vmem:[#allocation45_spill] sm:$0xff] %v6352_v7  ;;  %2117 = vmatpush.bf16.msra.mxu2 %v4870_v11  ;;  %2246 = vmatpush.bf16.msra.mxu3 %v4966_v21  ;;  %v5062_v11 = vor.u32 %v5227_v10, %v5061_v8  ;;  %v4575_v21 = vld [vmem:[%s5848_s11 + $0x84] sm:$0xf0] }
  0x73   : > { %1988 = vmatpush.bf16.msra.mxu1 %v5058_v9  ;;  %v6398_v56 = vor.u32 %v5105_v20, %v4575_v21  ;;  %v5108_v21 = vld [vmem:[%s5848_s11 + $0x94] sm:$0xf] }
  0x74   : > { %2375 = vmatpush.bf16.msra.mxu0 %v5062_v11 }
  0x75   : > { %7943 = vst [vmem:[#allocation48_spill] sm:$0xff] %v6398_v56 }
  0x78   : > { %1364 = vmatmul.bf16.gmra.mxu0 %v6126_v22  ;;  %1394 = vmatmul.bf16.gmra.mxu1 %v6128_v23 }
  0x79   : > { %1424 = vmatmul.bf16.gmra.mxu2 %v6130_v24  ;;  %1454 = vmatmul.bf16.gmra.mxu3 %v6132_v25 }
  0x88   : > { %1369 = vmatmul.bf16.gmra.mxu0 %v6182_v60  ;;  %1399 = vmatmul.bf16.gmra.mxu1 %v6184_v61 }
  0x89   : > { %1429 = vmatmul.bf16.gmra.mxu2 %v6186_v2  ;;  %1459 = vmatmul.bf16.gmra.mxu3 %v6188_v3 }
  0x98   : > { %1374 = vmatmul.bf16.gmra.mxu0 %v6226_v32  ;;  %1404 = vmatmul.bf16.gmra.mxu1 %v6228_v33 }
  0x99   : > { %1434 = vmatmul.bf16.gmra.mxu2 %v6230_v34  ;;  %1464 = vmatmul.bf16.gmra.mxu3 %v6232_v35 }
  0xa8   : > { %1478 = vmatmul.bf16.vlgmr.msrb.gmra.mxu1 %v6242_v40  ;;  %1865 = vmatmul.bf16.vlgmr.msrb.gmra.mxu0 %v6242_v40 }
  0xa9   : > { %1607 = vmatmul.bf16.vlgmr.msrb.gmra.mxu2 %v6244_v41  ;;  %1736 = vmatmul.bf16.vlgmr.msrb.gmra.mxu3 %v5937_v43  ;;  %v5119_v43 = vld [vmem:[%s5848_s11 + $0xe8] sm:$0xf0] }
  0xb8   : > { %1483 = vmatmul.bf16.gmra.mxu1 %v6254_v50  ;;  %1870 = vmatmul.bf16.gmra.mxu0 %v6254_v50  ;;  %v4617_v50 = vld [vmem:[%s5848_s11 + $0xc8] sm:$0xf] }
  0xb9   : > { %1612 = vmatmul.bf16.gmra.mxu2 %v6256_v51  ;;  %1741 = vmatmul.bf16.gmra.mxu3 %v6026_v28  ;;  %v5116_v28 = vld [vmem:[%s5848_s11 + $0xd0] sm:$0xf0] }
  0xba   : > { %v6508_v40 = vor.u32 %v5116_v28, %v4617_v50  ;;  %v5117_v28 = vld [vmem:[%s5848_s11 + $0xdc] sm:$0xf]  ;;  %v4623_v50 = vld [vmem:[%s5848_s11 + $0xe4] sm:$0xf0] }
  0xbc   : > { %7961 = vst [vmem:[#allocation66_spill] sm:$0xff] %v6508_v40 }
  0xc5   : > { %v6292_v13 = vpop.f32.mrf.mxu0  ;;  %v6294_v14 = vpop.f32.mrf.mxu1 }
  0xc8   : > { %1488 = vmatmul.bf16.gmra.mxu1 %v6290_v12  ;;  %1875 = vmatmul.bf16.gmra.mxu0 %v6290_v12 }
  0xc9   : > { %1617 = vmatmul.bf16.gmra.mxu2 %v6296_v15  ;;  %1746 = vmatmul.bf16.gmra.mxu3 %v6082_v62 }
  0xcc   : > { %v6302_v16 = vpop.f32.mrf.mxu2  ;;  %v6304_v17 = vpop.f32.mrf.mxu3 }
  0xcd   : > { %7933 = vst [vmem:[#allocation38_spill] sm:$0xff] %v6304_v17  ;;  %v6306_v18 = vpop.f32.mrf.mxu0  ;;  %v6308_v19 = vpop.f32.mrf.mxu1 }
  0xd4   : > { %v6314_v36 = vpop.f32.mrf.mxu2  ;;  %v6316_v37 = vpop.f32.mrf.mxu3 }
  0xd5   : > { %7934 = vst [vmem:[#allocation39_spill] sm:$0xff] %v6316_v37  ;;  %v6320_v39 = vpop.f32.mrf.mxu0  ;;  %v6322_v42 = vpop.f32.mrf.mxu1  ;;  %v4599_v37 = vld [vmem:[%s5848_s11 + $0xb4] sm:$0xf0] }
  0xd8   : > { %1493 = vmatmul.bf16.gmra.mxu1 %v6318_v38  ;;  %1880 = vmatmul.bf16.gmra.mxu0 %v6318_v38 }
  0xd9   : > { %1622 = vmatmul.bf16.gmra.mxu2 %v6324_v45  ;;  %1751 = vmatmul.bf16.gmra.mxu3 %v6126_v22  ;;  %v5111_v45 = vld [vmem:[%s5848_s11 + $0xac] sm:$0xf] }
  0xdc   : > { %v6330_v46 = vpop.f32.mrf.mxu2  ;;  %v6332_v47 = vpop.f32.mrf.mxu3 }
  0xdd   : > { %7937 = vst [vmem:[#allocation42_spill] sm:$0xff] %v6332_v47  ;;  %v6334_v52 = vpop.f32.mrf.mxu0  ;;  %v6336_v53 = vpop.f32.mrf.mxu1 }
  0xe4   : > { %v6342_v58 = vpop.f32.mrf.mxu2  ;;  %v6344_v59 = vpop.f32.mrf.mxu3 }
  0xe5   : > { %7938 = vst [vmem:[#allocation43_spill] sm:$0xff] %v6344_v59  ;;  %v6348_v5 = vpop.f32.mrf.mxu0  ;;  %v6350_v6 = vpop.f32.mrf.mxu1 }
  0xe8   : > { %1498 = vmatmul.bf16.gmra.mxu1 %v6346_v4  ;;  %1885 = vmatmul.bf16.gmra.mxu0 %v6346_v4  ;;  %v5107_v4 = vld [vmem:[%s5848_s11 + $0x88] sm:$0xf0] }
  0xe9   : > { %1627 = vmatmul.bf16.gmra.mxu2 %v6352_v7  ;;  %1756 = vmatmul.bf16.gmra.mxu3 %v6182_v60 }
  0xec   : > { %v6370_v26 = vpop.f32.mrf.mxu2  ;;  %v6372_v27 = vpop.f32.mrf.mxu3 }
  0xed   : > { %7941 = vst [vmem:[#allocation46_spill] sm:$0xff] %v6372_v27  ;;  %v6374_v54 = vpop.f32.mrf.mxu0  ;;  %v6376_v55 = vpop.f32.mrf.mxu1  ;;  %v4581_v27 = vld [vmem:[%s5848_s11 + $0x80] sm:$0xf] }
  0xee   : > { %v6404_v8 = vor.u32 %v5107_v4, %v4581_v27  ;;  %v4593_v4 = vld [vmem:[%s5848_s11 + $0x98] sm:$0xf]  ;;  %v5110_v27 = vld [vmem:[%s5848_s11 + $0xa0] sm:$0xf0] }
  0xef   : > { %v6432_v38 = vor.u32 %v5110_v27, %v4593_v4  ;;  %v4605_v4 = vld [vmem:[%s5848_s11 + $0xb0] sm:$0xf]  ;;  %v5113_v27 = vld [vmem:[%s5848_s11 + $0xb8] sm:$0xf0] }
  0xf0   : > { %7944 = vst [vmem:[#allocation49_spill] sm:$0xff] %v6404_v8  ;;  %v6460_v62 = vor.u32 %v5113_v27, %v4605_v4  ;;  %v5200_v27 = vld [vmem:[%s7802_s1 + $0x130] sm:$0xf0] }
  0xf1   : > { %7949 = vst [vmem:[#allocation54_spill] sm:$0xff] %v6432_v38 }
  0xf2   : > { %7955 = vst [vmem:[#allocation60_spill] sm:$0xff] %v6460_v62 }
  0xf4   : > { %v6394_v60 = vpop.f32.mrf.mxu2  ;;  %v6396_v7 = vpop.f32.mrf.mxu3 }
  0xf5   : > { %7942 = vst [vmem:[#allocation47_spill] sm:$0xff] %v6396_v7  ;;  %v6400_v57 = vpop.f32.mrf.mxu0  ;;  %v6402_v59 = vpop.f32.mrf.mxu1  ;;  %v4587_v7 = vld [vmem:[%s5848_s11 + $0x9c] sm:$0xf0] }
  0xf8   : > { %1503 = vmatmul.bf16.gmra.mxu1 %v6398_v56  ;;  %1890 = vmatmul.bf16.gmra.mxu0 %v6398_v56 }
  0xf9   : > { %1632 = vmatmul.bf16.gmra.mxu2 %v6404_v8  ;;  %1761 = vmatmul.bf16.gmra.mxu3 %v6226_v32  ;;  %v6426_v32 = vor.u32 %v5108_v21, %v4587_v7 }
  0xfb   : > { %7948 = vst [vmem:[#allocation53_spill] sm:$0xff] %v6426_v32 }
  0xfc   : > { %v6410_v9 = vpop.f32.mrf.mxu2  ;;  %v6412_v10 = vpop.f32.mrf.mxu3 }
  0xfd   : > { %7945 = vst [vmem:[#allocation50_spill] sm:$0xff] %v6412_v10  ;;  %v6414_v11 = vpop.f32.mrf.mxu0  ;;  %v6416_v20 = vpop.f32.mrf.mxu1 }
 0x104   : > { %v6422_v47 = vpop.f32.mrf.mxu2  ;;  %v6424_v56 = vpop.f32.mrf.mxu3 }
 0x105   : > { %7946 = vst [vmem:[#allocation51_spill] sm:$0xff] %v6422_v47  ;;  %v6428_v8 = vpop.f32.mrf.mxu0  ;;  %v6430_v10 = vpop.f32.mrf.mxu1  ;;  %v6524_v47 = vor.u32 %v5117_v28, %v4623_v50  ;;  %v5122_v28 = vld [vmem:[%s5848_s11 + $0x100] sm:$0xf0] }
 0x106   : > { %7947 = vst [vmem:[#allocation52_spill] sm:$0xff] %v6424_v56 }
 0x107   : > { %7962 = vst [vmem:[#allocation67_spill] sm:$0xff] %v6524_v47 }
 0x108   : > { %1508 = vmatmul.bf16.gmra.mxu1 %v6426_v32  ;;  %1895 = vmatmul.bf16.gmra.mxu0 %v6426_v32  ;;  %v6454_v32 = vor.u32 %v5111_v45, %v4599_v37  ;;  %v5176_v37 = vld [vmem:[%s7802_s1 + $0x70] sm:$0xf0]  ;;  %v4953_v45 = vld [vmem:[%s7802_s1 + $0x128] sm:$0xf] }
 0x109   : > { %1637 = vmatmul.bf16.gmra.mxu2 %v6432_v38  ;;  %1766 = vmatmul.bf16.gmra.mxu3 %v5939_v44 }
 0x10a   : > { %7954 = vst [vmem:[#allocation59_spill] sm:$0xff] %v6454_v32 }
 0x10c   : > { %v6438_v22 = vpop.f32.mrf.mxu2  ;;  %v6440_v56 = vpop.f32.mrf.mxu3 }
 0x10d   : > { %7950 = vst [vmem:[#allocation55_spill] sm:$0xff] %v6438_v22  ;;  %v6442_v7 = vpop.f32.mrf.mxu0  ;;  %v6444_v21 = vpop.f32.mrf.mxu1 }
 0x10e   : > { %7951 = vst [vmem:[#allocation56_spill] sm:$0xff] %v6440_v56 }
 0x114   : > { %v6450_v17 = vpop.f32.mrf.mxu2  ;;  %v6452_v12 = vpop.f32.mrf.mxu3 }
 0x115   : > { %7952 = vst [vmem:[#allocation57_spill] sm:$0xff] %v6450_v17  ;;  %v6456_v38 = vpop.f32.mrf.mxu0  ;;  %v6458_v44 = vpop.f32.mrf.mxu1 }
 0x116   : > { %7953 = vst [vmem:[#allocation58_spill] sm:$0xff] %v6452_v12  ;;  %v4857_v12 = vld [vmem:[%s7802_s1 + $0x68] sm:$0xf] }
 0x117   : > { %v4858_v4 = vor.u32 %v5176_v37, %v4857_v12  ;;  %v5222_v12 = vld [vmem:[%s7802_s1 + $0x1e4] sm:$0xf]  ;;  %v5043_v37 = vld [vmem:[%s7802_s1 + $0x1ec] sm:$0xf0] }
 0x118   : > { %1513 = vmatmul.bf16.gmra.mxu1 %v6454_v32  ;;  %1900 = vmatmul.bf16.gmra.mxu0 %v6454_v32  ;;  %v4954_v32 = vor.u32 %v5200_v27, %v4953_v45  ;;  %v5049_v45 = vld [vmem:[%s7802_s1 + $0x1e8] sm:$0xf]  ;;  %v5046_v27 = vor.u32 %v5222_v12, %v5043_v37 }
 0x119   : > { %1642 = vmatmul.bf16.gmra.mxu2 %v6460_v62  ;;  %1771 = vmatmul.bf16.gmra.mxu3 %v6028_v29 }
 0x11a   : > { %2118 = vmatpush.bf16.msra.mxu2 %v4858_v4  ;;  %2247 = vmatpush.bf16.msra.mxu3 %v4954_v32  ;;  %v5224_v4 = vld [vmem:[%s7802_s1 + $0x1f0] sm:$0xf0]  ;;  %v4611_v32 = vld [vmem:[%s5848_s11 + $0xcc] sm:$0xf0] }
 0x11b   : > { %1989 = vmatpush.bf16.msra.mxu1 %v5046_v27 }
 0x11c   : > { %v6478_v29 = vpop.f32.mrf.mxu2  ;;  %v6480_v62 = vpop.f32.mrf.mxu3 }
 0x11d   : > { %7956 = vst [vmem:[#allocation61_spill] sm:$0xff] %v6478_v29  ;;  %v6482_v56 = vpop.f32.mrf.mxu0  ;;  %v6484_v15 = vpop.f32.mrf.mxu1  ;;  %v5114_v29 = vld [vmem:[%s5848_s11 + $0xc4] sm:$0xf] }
 0x11e   : > { %7957 = vst [vmem:[#allocation62_spill] sm:$0xff] %v6480_v62  ;;  %v5050_v62 = vor.u32 %v5224_v4, %v5049_v45  ;;  %v6506_v22 = vor.u32 %v5114_v29, %v4611_v32 }
 0x120   : > { %2376 = vmatpush.bf16.msra.mxu0 %v5050_v62  ;;  %7960 = vst [vmem:[#allocation65_spill] sm:$0xff] %v6506_v22 }
 0x124   : > { %v6502_v51 = vpop.f32.mrf.mxu2  ;;  %v6504_v17 = vpop.f32.mrf.mxu3 }
 0x125   : > { %7958 = vst [vmem:[#allocation63_spill] sm:$0xff] %v6502_v51  ;;  %v1479_v12 = vpop.f32.mrf.mxu1  ;;  %v1866_v37 = vpop.f32.mrf.mxu0  ;;  %v4629_v51 = vld [vmem:[%s5848_s11 + $0xe0] sm:$0xf] }
 0x126   : > { %7959 = vst [vmem:[#allocation64_spill] sm:$0xff] %v6504_v17  ;;  %v1480_v62 = vadd.f32 %v1479_v12, %v6292_v13 }
 0x128   : > { %1518 = vmatmul.bf16.gmra.mxu1 %v6506_v22  ;;  %1905 = vmatmul.bf16.gmra.mxu0 %v6506_v22 }
 0x129   : > { %1647 = vmatmul.bf16.gmra.mxu2 %v6508_v40  ;;  %1776 = vmatmul.bf16.gmra.mxu3 %v6084_v63 }
 0x12c   : > { %v1608_v45 = vpop.f32.mrf.mxu2  ;;  %v1737_v29 = vpop.f32.mrf.mxu3 }
 0x12d   : > { %v6515_v27 = vadd.f32 %v1608_v45, %v1480_v62  ;;  %v6517_v4 = vadd.f32 %v1866_v37, %v1737_v29  ;;  %v1481_v32 = vpop.f32.mrf.mxu1  ;;  %v1868_v17 = vpop.f32.mrf.mxu0  ;;  %v6530_v62 = vor.u32 %v5119_v43, %v4629_v51  ;;  %v5120_v43 = vld [vmem:[%s5848_s11 + $0xf4] sm:$0xf]  ;;  %v4635_v51 = vld [vmem:[%s5848_s11 + $0xfc] sm:$0xf0] }
 0x12e   : > { %v1482_v22 = vadd.f32 %v1481_v32, %v6306_v18  ;;  %v4641_v32 = vld [vmem:[%s5848_s11 + $0xf8] sm:$0xf] }
 0x12f   : > { %7964 = vst [vmem:[#allocation69_spill] sm:$0xff] %v6530_v62 }
 0x134   : > { %v1610_v41 = vpop.f32.mrf.mxu2  ;;  %v1739_v40 = vpop.f32.mrf.mxu3 }
 0x135   : > { %v6526_v63 = vadd.f32 %v1610_v41, %v1482_v22  ;;  %v6528_v13 = vadd.f32 %v1868_v17, %v1739_v40  ;;  %v1484_v12 = vpop.f32.mrf.mxu1  ;;  %v1871_v37 = vpop.f32.mrf.mxu0 }
 0x136   : > { %v1485_v22 = vadd.f32 %v1484_v12, %v6320_v39 }
 0x137   : > { %7963 = vst [vmem:[#allocation68_spill] sm:$0xff] %v6526_v63  ;;  %v6546_v63 = vor.u32 %v5120_v43, %v4635_v51 }
 0x138   : > { %1523 = vmatmul.bf16.gmra.mxu1 %v6524_v47  ;;  %1910 = vmatmul.bf16.gmra.mxu0 %v6524_v47 }
 0x139   : > { %1652 = vmatmul.bf16.gmra.mxu2 %v6530_v62  ;;  %1781 = vmatmul.bf16.gmra.mxu3 %v6128_v23  ;;  %7965 = vst [vmem:[#allocation70_spill] sm:$0xff] %v6546_v63 }
 0x13c   : > { %v1613_v41 = vpop.f32.mrf.mxu2  ;;  %v1742_v40 = vpop.f32.mrf.mxu3 }
 0x13d   : > { %v6537_v17 = vadd.f32 %v1613_v41, %v1485_v22  ;;  %v6539_v18 = vadd.f32 %v1871_v37, %v1742_v40  ;;  %v1486_v45 = vpop.f32.mrf.mxu1  ;;  %v1873_v29 = vpop.f32.mrf.mxu0  ;;  %v6552_v37 = vor.u32 %v5122_v28, %v4641_v32  ;;  %v5197_v40 = vld [vmem:[%s7802_s1 + $0x118] sm:$0xf0] }
 0x13e   : > { %v1487_v50 = vadd.f32 %v1486_v45, %v6334_v52  ;;  %v4845_v52 = vld [vmem:[%s7802_s1 + $0x50] sm:$0xf] }
 0x13f   : > { %7966 = vst [vmem:[#allocation71_spill] sm:$0xff] %v6552_v37 }
 0x144   : > { %v1615_v47 = vpop.f32.mrf.mxu2  ;;  %v1744_v62 = vpop.f32.mrf.mxu3 }
 0x145   : > { %v6548_v23 = vadd.f32 %v1615_v47, %v1487_v50  ;;  %v6550_v39 = vadd.f32 %v1873_v29, %v1744_v62  ;;  %v1489_v12 = vpop.f32.mrf.mxu1  ;;  %v1876_v22 = vpop.f32.mrf.mxu0  ;;  %v5173_v47 = vld [vmem:[%s7802_s1 + $0x58] sm:$0xf0]  ;;  %v4941_v62 = vld [vmem:[%s7802_s1 + $0x110] sm:$0xf] }
 0x146   : > { %v4846_v41 = vor.u32 %v5173_v47, %v4845_v52  ;;  %v1490_v45 = vadd.f32 %v1489_v12, %v6348_v5  ;;  %v4942_v29 = vor.u32 %v5197_v40, %v4941_v62  ;;  %v5219_v47 = vld [vmem:[%s7802_s1 + $0x1cc] sm:$0xf]  ;;  %v5031_v5 = vld [vmem:[%s7802_s1 + $0x1d4] sm:$0xf0]  ;;  %v5037_v12 = vld [vmem:[%s7802_s1 + $0x1d0] sm:$0xf] }
 0x147   : > { %v5034_v62 = vor.u32 %v5219_v47, %v5031_v5  ;;  %v5123_v40 = vld [vmem:[%s5848_s11 + $0x10c] sm:$0xf] }
 0x148   : > { %1528 = vmatmul.bf16.gmra.mxu1 %v6546_v63  ;;  %1915 = vmatmul.bf16.gmra.mxu0 %v6546_v63 }
 0x149   : > { %1657 = vmatmul.bf16.gmra.mxu2 %v6552_v37  ;;  %1786 = vmatmul.bf16.gmra.mxu3 %v6184_v61 }
 0x14a   : > { %2119 = vmatpush.bf16.msra.mxu2 %v4846_v41  ;;  %2248 = vmatpush.bf16.msra.mxu3 %v4942_v29  ;;  %v4653_v29 = vld [vmem:[%s5848_s11 + $0x110] sm:$0xf] }
 0x14b   : > { %1990 = vmatpush.bf16.msra.mxu1 %v5034_v62 }
 0x14c   : > { %v1618_v43 = vpop.f32.mrf.mxu2  ;;  %v1747_v51 = vpop.f32.mrf.mxu3 }
 0x14d   : > { %v6571_v32 = vadd.f32 %v1618_v43, %v1490_v45  ;;  %v6573_v28 = vadd.f32 %v1876_v22, %v1747_v51  ;;  %v1491_v50 = vpop.f32.mrf.mxu1  ;;  %v1878_v52 = vpop.f32.mrf.mxu0  ;;  %v5221_v22 = vld [vmem:[%s7802_s1 + $0x1d8] sm:$0xf0]  ;;  %v4647_v45 = vld [vmem:[%s5848_s11 + $0x114] sm:$0xf0] }
 0x14e   : > { %v5038_v41 = vor.u32 %v5221_v22, %v5037_v12  ;;  %v5125_v43 = vld [vmem:[%s5848_s11 + $0x118] sm:$0xf0]  ;;  %v1492_v51 = vadd.f32 %v1491_v50, %v6374_v54  ;;  %v6592_v37 = vor.u32 %v5123_v40, %v4647_v45  ;;  %v5126_v40 = vld [vmem:[%s5848_s11 + $0x124] sm:$0xf]  ;;  %v4659_v45 = vld [vmem:[%s5848_s11 + $0x12c] sm:$0xf0] }
 0x14f   : > { %7967 = vst [vmem:[#allocation72_spill] sm:$0xff] %v6571_v32  ;;  %v6598_v62 = vor.u32 %v5125_v43, %v4653_v29  ;;  %v4665_v29 = vld [vmem:[%s5848_s11 + $0x128] sm:$0xf]  ;;  %v5128_v43 = vld [vmem:[%s5848_s11 + $0x130] sm:$0xf0] }
 0x150   : > { %2377 = vmatpush.bf16.msra.mxu0 %v5038_v41  ;;  %7968 = vst [vmem:[#allocation73_spill] sm:$0xff] %v6592_v37 }
 0x151   : > { %7970 = vst [vmem:[#allocation75_spill] sm:$0xff] %v6598_v62 }
 0x154   : > { %v1620_v63 = vpop.f32.mrf.mxu2  ;;  %v1749_v61 = vpop.f32.mrf.mxu3 }
 0x155   : > { %v6594_v32 = vadd.f32 %v1620_v63, %v1492_v51  ;;  %v6596_v47 = vadd.f32 %v1878_v52, %v1749_v61  ;;  %v1494_v5 = vpop.f32.mrf.mxu1  ;;  %v1881_v12 = vpop.f32.mrf.mxu0 }
 0x156   : > { %v1495_v63 = vadd.f32 %v1494_v5, %v6400_v57 }
 0x157   : > { %7969 = vst [vmem:[#allocation74_spill] sm:$0xff] %v6594_v32  ;;  %v6614_v32 = vor.u32 %v5126_v40, %v4659_v45  ;;  %v5129_v40 = vld [vmem:[%s5848_s11 + $0x13c] sm:$0xf]  ;;  %v4671_v45 = vld [vmem:[%s5848_s11 + $0x144] sm:$0xf0] }
 0x158   : > { %1533 = vmatmul.bf16.gmra.mxu1 %v6592_v37  ;;  %1920 = vmatmul.bf16.gmra.mxu0 %v6592_v37 }
 0x159   : > { %1662 = vmatmul.bf16.gmra.mxu2 %v6598_v62  ;;  %1791 = vmatmul.bf16.gmra.mxu3 %v6228_v33  ;;  %7971 = vst [vmem:[#allocation76_spill] sm:$0xff] %v6614_v32 }
 0x15c   : > { %v1623_v54 = vpop.f32.mrf.mxu2  ;;  %v1752_v61 = vpop.f32.mrf.mxu3 }
 0x15d   : > { %v6605_v50 = vadd.f32 %v1623_v54, %v1495_v63  ;;  %v6607_v52 = vadd.f32 %v1881_v12, %v1752_v61  ;;  %v1496_v22 = vpop.f32.mrf.mxu1  ;;  %v1883_v41 = vpop.f32.mrf.mxu0  ;;  %v6620_v63 = vor.u32 %v5128_v43, %v4665_v29  ;;  %v4677_v29 = vld [vmem:[%s5848_s11 + $0x140] sm:$0xf]  ;;  %v5131_v43 = vld [vmem:[%s5848_s11 + $0x148] sm:$0xf0] }
 0x15e   : > { %v1497_v51 = vadd.f32 %v1496_v22, %v6414_v11 }
 0x15f   : > { %7973 = vst [vmem:[#allocation78_spill] sm:$0xff] %v6620_v63 }
 0x164   : > { %v1625_v37 = vpop.f32.mrf.mxu2  ;;  %v1754_v62 = vpop.f32.mrf.mxu3 }
 0x165   : > { %v6616_v33 = vadd.f32 %v1625_v37, %v1497_v51  ;;  %v6618_v57 = vadd.f32 %v1883_v41, %v1754_v62  ;;  %v1499_v5 = vpop.f32.mrf.mxu1  ;;  %v1886_v12 = vpop.f32.mrf.mxu0 }
 0x166   : > { %v1500_v11 = vadd.f32 %v1499_v5, %v6428_v8 }
 0x167   : > { %7972 = vst [vmem:[#allocation77_spill] sm:$0xff] %v6616_v33  ;;  %v6636_v33 = vor.u32 %v5129_v40, %v4671_v45 }
 0x168   : > { %1538 = vmatmul.bf16.gmra.mxu1 %v6614_v32  ;;  %1925 = vmatmul.bf16.gmra.mxu0 %v6614_v32 }
 0x169   : > { %1667 = vmatmul.bf16.gmra.mxu2 %v6620_v63  ;;  %1796 = vmatmul.bf16.gmra.mxu3 %v5950_v48  ;;  %7974 = vst [vmem:[#allocation79_spill] sm:$0xff] %v6636_v33 }
 0x16c   : > { %v1628_v37 = vpop.f32.mrf.mxu2  ;;  %v1757_v62 = vpop.f32.mrf.mxu3 }
 0x16d   : > { %v6627_v54 = vadd.f32 %v1628_v37, %v1500_v11  ;;  %v6629_v61 = vadd.f32 %v1886_v12, %v1757_v62  ;;  %v1501_v22 = vpop.f32.mrf.mxu1  ;;  %v1888_v41 = vpop.f32.mrf.mxu0  ;;  %v6642_v12 = vor.u32 %v5131_v43, %v4677_v29  ;;  %v5194_v62 = vld [vmem:[%s7802_s1 + $0x100] sm:$0xf0] }
 0x16e   : > { %v1502_v51 = vadd.f32 %v1501_v22, %v6442_v7  ;;  %v4833_v7 = vld [vmem:[%s7802_s1 + $0x38] sm:$0xf] }
 0x16f   : > { %7975 = vst [vmem:[#allocation80_spill] sm:$0xff] %v6642_v12 }
 0x174   : > { %v1630_v32 = vpop.f32.mrf.mxu2  ;;  %v1759_v63 = vpop.f32.mrf.mxu3 }
 0x175   : > { %v6638_v48 = vadd.f32 %v1630_v32, %v1502_v51  ;;  %v6640_v8 = vadd.f32 %v1888_v41, %v1759_v63  ;;  %v1504_v5 = vpop.f32.mrf.mxu1  ;;  %v1891_v11 = vpop.f32.mrf.mxu0  ;;  %v5170_v32 = vld [vmem:[%s7802_s1 + $0x40] sm:$0xf0]  ;;  %v4929_v63 = vld [vmem:[%s7802_s1 + $0xf8] sm:$0xf] }
 0x176   : > { %v4834_v37 = vor.u32 %v5170_v32, %v4833_v7  ;;  %v1505_v22 = vadd.f32 %v1504_v5, %v6456_v38  ;;  %v4930_v41 = vor.u32 %v5194_v62, %v4929_v63  ;;  %v5216_v32 = vld [vmem:[%s7802_s1 + $0x1b4] sm:$0xf]  ;;  %v5019_v38 = vld [vmem:[%s7802_s1 + $0x1bc] sm:$0xf0]  ;;  %v5025_v5 = vld [vmem:[%s7802_s1 + $0x1b8] sm:$0xf] }
 0x177   : > { %v5022_v63 = vor.u32 %v5216_v32, %v5019_v38  ;;  %v5132_v62 = vld [vmem:[%s5848_s11 + $0x154] sm:$0xf] }
 0x178   : > { %1543 = vmatmul.bf16.gmra.mxu1 %v6636_v33  ;;  %1930 = vmatmul.bf16.gmra.mxu0 %v6636_v33 }
 0x179   : > { %1672 = vmatmul.bf16.gmra.mxu2 %v6642_v12  ;;  %1801 = vmatmul.bf16.gmra.mxu3 %v6030_v30 }
 0x17a   : > { %2120 = vmatpush.bf16.msra.mxu2 %v4834_v37  ;;  %2249 = vmatpush.bf16.msra.mxu3 %v4930_v41  ;;  %v4689_v41 = vld [vmem:[%s5848_s11 + $0x158] sm:$0xf] }
 0x17b   : > { %1991 = vmatpush.bf16.msra.mxu1 %v5022_v63 }
 0x17c   : > { %v1633_v40 = vpop.f32.mrf.mxu2  ;;  %v1762_v45 = vpop.f32.mrf.mxu3 }
 0x17d   : > { %v6661_v29 = vadd.f32 %v1633_v40, %v1505_v22  ;;  %v6663_v43 = vadd.f32 %v1891_v11, %v1762_v45  ;;  %v1506_v51 = vpop.f32.mrf.mxu1  ;;  %v1893_v7 = vpop.f32.mrf.mxu0  ;;  %v5218_v11 = vld [vmem:[%s7802_s1 + $0x1c0] sm:$0xf0]  ;;  %v4683_v22 = vld [vmem:[%s5848_s11 + $0x15c] sm:$0xf0] }
 0x17e   : > { %v5026_v37 = vor.u32 %v5218_v11, %v5025_v5  ;;  %v5134_v40 = vld [vmem:[%s5848_s11 + $0x160] sm:$0xf0]  ;;  %v1507_v45 = vadd.f32 %v1506_v51, %v6482_v56 }
 0x17f   : > { %7976 = vst [vmem:[#allocation81_spill] sm:$0xff] %v6661_v29  ;;  %v6682_v29 = vor.u32 %v5132_v62, %v4683_v22  ;;  %v6688_v63 = vor.u32 %v5134_v40, %v4689_v41  ;;  %v5135_v62 = vld [vmem:[%s5848_s11 + $0x16c] sm:$0xf]  ;;  %v4695_v22 = vld [vmem:[%s5848_s11 + $0x174] sm:$0xf0] }
 0x180   : > { %2378 = vmatpush.bf16.msra.mxu0 %v5026_v37  ;;  %v4701_v41 = vld [vmem:[%s5848_s11 + $0x170] sm:$0xf]  ;;  %v5137_v40 = vld [vmem:[%s5848_s11 + $0x178] sm:$0xf0] }
 0x181   : > { %7977 = vst [vmem:[#allocation82_spill] sm:$0xff] %v6682_v29 }
 0x182   : > { %7979 = vst [vmem:[#allocation84_spill] sm:$0xff] %v6688_v63 }
 0x184   : > { %v1635_v33 = vpop.f32.mrf.mxu2  ;;  %v1764_v30 = vpop.f32.mrf.mxu3 }
 0x185   : > { %v6684_v12 = vadd.f32 %v1635_v33, %v1507_v45  ;;  %v6686_v32 = vadd.f32 %v1893_v7, %v1764_v30  ;;  %v1509_v38 = vpop.f32.mrf.mxu1  ;;  %v1896_v5 = vpop.f32.mrf.mxu0 }
 0x186   : > { %v1510_v33 = vadd.f32 %v1509_v38, %v6294_v14 }
 0x187   : > { %7978 = vst [vmem:[#allocation83_spill] sm:$0xff] %v6684_v12  ;;  %v6704_v12 = vor.u32 %v5135_v62, %v4695_v22  ;;  %v5138_v62 = vld [vmem:[%s5848_s11 + $0x184] sm:$0xf]  ;;  %v4707_v22 = vld [vmem:[%s5848_s11 + $0x18c] sm:$0xf0] }
 0x188   : > { %1548 = vmatmul.bf16.gmra.mxu1 %v6682_v29  ;;  %1935 = vmatmul.bf16.gmra.mxu0 %v6682_v29 }
 0x189   : > { %1677 = vmatmul.bf16.gmra.mxu2 %v6688_v63  ;;  %1806 = vmatmul.bf16.gmra.mxu3 %v6086_v0  ;;  %7980 = vst [vmem:[#allocation85_spill] sm:$0xff] %v6704_v12 }
 0x18c   : > { %v1638_v56 = vpop.f32.mrf.mxu2  ;;  %v1767_v30 = vpop.f32.mrf.mxu3 }
 0x18d   : > { %v6695_v51 = vadd.f32 %v1638_v56, %v1510_v33  ;;  %v6697_v7 = vadd.f32 %v1896_v5, %v1767_v30  ;;  %v1511_v11 = vpop.f32.mrf.mxu1  ;;  %v1898_v37 = vpop.f32.mrf.mxu0  ;;  %v6710_v33 = vor.u32 %v5137_v40, %v4701_v41  ;;  %v4713_v41 = vld [vmem:[%s5848_s11 + $0x188] sm:$0xf]  ;;  %v5140_v40 = vld [vmem:[%s5848_s11 + $0x190] sm:$0xf0] }
 0x18e   : > { %v1512_v45 = vadd.f32 %v1511_v11, %v6308_v19 }
 0x18f   : > { %7982 = vst [vmem:[#allocation87_spill] sm:$0xff] %v6710_v33 }
 0x194   : > { %v1640_v29 = vpop.f32.mrf.mxu2  ;;  %v1769_v63 = vpop.f32.mrf.mxu3 }
 0x195   : > { %v6706_v0 = vadd.f32 %v1640_v29, %v1512_v45  ;;  %v6708_v14 = vadd.f32 %v1898_v37, %v1769_v63  ;;  %v1514_v38 = vpop.f32.mrf.mxu1  ;;  %v1901_v5 = vpop.f32.mrf.mxu0 }
 0x196   : > { %v1515_v19 = vadd.f32 %v1514_v38, %v6322_v42 }
 0x197   : > { %7981 = vst [vmem:[#allocation86_spill] sm:$0xff] %v6706_v0  ;;  %v6726_v0 = vor.u32 %v5138_v62, %v4707_v22 }
 0x198   : > { %1553 = vmatmul.bf16.gmra.mxu1 %v6704_v12  ;;  %1940 = vmatmul.bf16.gmra.mxu0 %v6704_v12 }
 0x199   : > { %1682 = vmatmul.bf16.gmra.mxu2 %v6710_v33  ;;  %1811 = vmatmul.bf16.gmra.mxu3 %v6130_v24  ;;  %7983 = vst [vmem:[#allocation88_spill] sm:$0xff] %v6726_v0 }
 0x19c   : > { %v1643_v29 = vpop.f32.mrf.mxu2  ;;  %v1772_v63 = vpop.f32.mrf.mxu3 }
 0x19d   : > { %v6717_v56 = vadd.f32 %v1643_v29, %v1515_v19  ;;  %v6719_v30 = vadd.f32 %v1901_v5, %v1772_v63  ;;  %v1516_v11 = vpop.f32.mrf.mxu1  ;;  %v1903_v37 = vpop.f32.mrf.mxu0  ;;  %v6732_v5 = vor.u32 %v5140_v40, %v4713_v41  ;;  %v5191_v63 = vld [vmem:[%s7802_s1 + $0xe8] sm:$0xf0] }
 0x19e   : > { %v1517_v45 = vadd.f32 %v1516_v11, %v6336_v53  ;;  %v4821_v53 = vld [vmem:[%s7802_s1 + $0x20] sm:$0xf] }
 0x1a4   : > { %v1645_v12 = vpop.f32.mrf.mxu2  ;;  %v1774_v33 = vpop.f32.mrf.mxu3 }
 0x1a5   : > { %v6728_v24 = vadd.f32 %v1645_v12, %v1517_v45  ;;  %v6730_v42 = vadd.f32 %v1903_v37, %v1774_v33  ;;  %v1519_v38 = vpop.f32.mrf.mxu1  ;;  %v1906_v19 = vpop.f32.mrf.mxu0  ;;  %v5167_v12 = vld [vmem:[%s7802_s1 + $0x28] sm:$0xf0]  ;;  %v4917_v33 = vld [vmem:[%s7802_s1 + $0xe0] sm:$0xf] }
 0x1a6   : > { %v4822_v29 = vor.u32 %v5167_v12, %v4821_v53  ;;  %v1520_v11 = vadd.f32 %v1519_v38, %v6350_v6  ;;  %v4918_v37 = vor.u32 %v5191_v63, %v4917_v33  ;;  %v5213_v12 = vld [vmem:[%s7802_s1 + $0x19c] sm:$0xf]  ;;  %v5007_v6 = vld [vmem:[%s7802_s1 + $0x1a4] sm:$0xf0]  ;;  %v5013_v38 = vld [vmem:[%s7802_s1 + $0x1a0] sm:$0xf] }
 0x1a7   : > { %v5010_v33 = vor.u32 %v5213_v12, %v5007_v6  ;;  %v5141_v63 = vld [vmem:[%s5848_s11 + $0x19c] sm:$0xf] }
 0x1a8   : > { %1558 = vmatmul.bf16.gmra.mxu1 %v6726_v0  ;;  %1945 = vmatmul.bf16.gmra.mxu0 %v6726_v0 }
 0x1a9   : > { %1687 = vmatmul.bf16.gmra.mxu2 %v6732_v5  ;;  %1816 = vmatmul.bf16.gmra.mxu3 %v6186_v2 }
 0x1aa   : > { %2121 = vmatpush.bf16.msra.mxu2 %v4822_v29  ;;  %2250 = vmatpush.bf16.msra.mxu3 %v4918_v37  ;;  %v4725_v37 = vld [vmem:[%s5848_s11 + $0x1a0] sm:$0xf] }
 0x1ab   : > { %1992 = vmatpush.bf16.msra.mxu1 %v5010_v33 }
 0x1ac   : > { %v1648_v62 = vpop.f32.mrf.mxu2  ;;  %v1777_v22 = vpop.f32.mrf.mxu3 }
 0x1ad   : > { %v6751_v41 = vadd.f32 %v1648_v62, %v1520_v11  ;;  %v6753_v40 = vadd.f32 %v1906_v19, %v1777_v22  ;;  %v1521_v45 = vpop.f32.mrf.mxu1  ;;  %v1908_v53 = vpop.f32.mrf.mxu0  ;;  %v5215_v19 = vld [vmem:[%s7802_s1 + $0x1a8] sm:$0xf0]  ;;  %v4719_v11 = vld [vmem:[%s5848_s11 + $0x1a4] sm:$0xf0] }
 0x1ae   : > { %v5014_v29 = vor.u32 %v5215_v19, %v5013_v38  ;;  %v5143_v62 = vld [vmem:[%s5848_s11 + $0x1a8] sm:$0xf0]  ;;  %v1522_v22 = vadd.f32 %v1521_v45, %v6376_v55  ;;  %v6772_v0 = vor.u32 %v5141_v63, %v4719_v11  ;;  %v5144_v63 = vld [vmem:[%s5848_s11 + $0x1b4] sm:$0xf]  ;;  %v4731_v11 = vld [vmem:[%s5848_s11 + $0x1bc] sm:$0xf0] }
 0x1af   : > { %7984 = vst [vmem:[#allocation89_spill] sm:$0xff] %v6751_v41  ;;  %v6778_v33 = vor.u32 %v5143_v62, %v4725_v37  ;;  %v4737_v37 = vld [vmem:[%s5848_s11 + $0x1b8] sm:$0xf]  ;;  %v5146_v62 = vld [vmem:[%s5848_s11 + $0x1c0] sm:$0xf0] }
 0x1b0   : > { %7985 = vst [vmem:[#allocation90_spill] sm:$0xff] %v6753_v40  ;;  %2379 = vmatpush.bf16.msra.mxu0 %v5014_v29 }
 0x1b1   : > { %7986 = vst [vmem:[#allocation91_spill] sm:$0xff] %v6772_v0 }
 0x1b2   : > { %7988 = vst [vmem:[#allocation93_spill] sm:$0xff] %v6778_v33 }
 0x1b4   : > { %v1650_v41 = vpop.f32.mrf.mxu2  ;;  %v1779_v40 = vpop.f32.mrf.mxu3 }
 0x1b5   : > { %v6774_v2 = vadd.f32 %v1650_v41, %v1522_v22  ;;  %v6776_v12 = vadd.f32 %v1908_v53, %v1779_v40  ;;  %v1524_v6 = vpop.f32.mrf.mxu1  ;;  %v1911_v38 = vpop.f32.mrf.mxu0 }
 0x1b6   : > { %v1525_v55 = vadd.f32 %v1524_v6, %v6402_v59 }
 0x1b7   : > { %7987 = vst [vmem:[#allocation92_spill] sm:$0xff] %v6774_v2  ;;  %v6794_v2 = vor.u32 %v5144_v63, %v4731_v11  ;;  %v5147_v63 = vld [vmem:[%s5848_s11 + $0x1cc] sm:$0xf]  ;;  %v4743_v11 = vld [vmem:[%s5848_s11 + $0x1d4] sm:$0xf0] }
 0x1b8   : > { %1563 = vmatmul.bf16.gmra.mxu1 %v6772_v0  ;;  %1950 = vmatmul.bf16.gmra.mxu0 %v6772_v0 }
 0x1b9   : > { %1692 = vmatmul.bf16.gmra.mxu2 %v6778_v33  ;;  %1821 = vmatmul.bf16.gmra.mxu3 %v6230_v34  ;;  %7989 = vst [vmem:[#allocation94_spill] sm:$0xff] %v6794_v2 }
 0x1bc   : > { %v1653_v41 = vpop.f32.mrf.mxu2  ;;  %v1782_v40 = vpop.f32.mrf.mxu3 }
 0x1bd   : > { %v6785_v45 = vadd.f32 %v1653_v41, %v1525_v55  ;;  %v6787_v53 = vadd.f32 %v1911_v38, %v1782_v40  ;;  %v1526_v19 = vpop.f32.mrf.mxu1  ;;  %v1913_v29 = vpop.f32.mrf.mxu0  ;;  %v6800_v55 = vor.u32 %v5146_v62, %v4737_v37  ;;  %v4749_v37 = vld [vmem:[%s5848_s11 + $0x1d0] sm:$0xf]  ;;  %v5149_v62 = vld [vmem:[%s5848_s11 + $0x1d8] sm:$0xf0] }
 0x1be   : > { %v1527_v22 = vadd.f32 %v1526_v19, %v6416_v20 }
 0x1bf   : > { %7991 = vst [vmem:[#allocation96_spill] sm:$0xff] %v6800_v55 }
 0x1c4   : > { %v1655_v0 = vpop.f32.mrf.mxu2  ;;  %v1784_v33 = vpop.f32.mrf.mxu3 }
 0x1c5   : > { %v6796_v34 = vadd.f32 %v1655_v0, %v1527_v22  ;;  %v6798_v59 = vadd.f32 %v1913_v29, %v1784_v33  ;;  %v1529_v6 = vpop.f32.mrf.mxu1  ;;  %v1916_v38 = vpop.f32.mrf.mxu0 }
 0x1c6   : > { %v1530_v0 = vadd.f32 %v1529_v6, %v6430_v10 }
 0x1c7   : > { %7990 = vst [vmem:[#allocation95_spill] sm:$0xff] %v6796_v34  ;;  %v6816_v34 = vor.u32 %v5147_v63, %v4743_v11 }
 0x1c8   : > { %1568 = vmatmul.bf16.gmra.mxu1 %v6794_v2  ;;  %1955 = vmatmul.bf16.gmra.mxu0 %v6794_v2 }
 0x1c9   : > { %1697 = vmatmul.bf16.gmra.mxu2 %v6800_v55  ;;  %1826 = vmatmul.bf16.gmra.mxu3 %v5952_v49  ;;  %7992 = vst [vmem:[#allocation97_spill] sm:$0xff] %v6816_v34 }
 0x1cc   : > { %v1658_v20 = vpop.f32.mrf.mxu2  ;;  %v1787_v33 = vpop.f32.mrf.mxu3 }
 0x1cd   : > { %v6807_v41 = vadd.f32 %v1658_v20, %v1530_v0  ;;  %v6809_v40 = vadd.f32 %v1916_v38, %v1787_v33  ;;  %v1531_v19 = vpop.f32.mrf.mxu1  ;;  %v1918_v29 = vpop.f32.mrf.mxu0  ;;  %v6822_v38 = vor.u32 %v5149_v62, %v4749_v37  ;;  %v5188_v33 = vld [vmem:[%s7802_s1 + $0xd0] sm:$0xf0] }
 0x1ce   : > { %v1532_v22 = vadd.f32 %v1531_v19, %v6444_v21  ;;  %v4809_v21 = vld [vmem:[%s7802_s1 + $0x8] sm:$0xf] }
 0x1d4   : > { %v1660_v2 = vpop.f32.mrf.mxu2  ;;  %v1789_v55 = vpop.f32.mrf.mxu3 }
 0x1d5   : > { %v6818_v49 = vadd.f32 %v1660_v2, %v1532_v22  ;;  %v6820_v10 = vadd.f32 %v1918_v29, %v1789_v55  ;;  %v1534_v6 = vpop.f32.mrf.mxu1  ;;  %v1921_v0 = vpop.f32.mrf.mxu0  ;;  %v5164_v2 = vld [vmem:[%s7802_s1 + $0x10] sm:$0xf0]  ;;  %v4905_v55 = vld [vmem:[%s7802_s1 + $0xc8] sm:$0xf] }
 0x1d6   : > { %v4810_v20 = vor.u32 %v5164_v2, %v4809_v21  ;;  %v1535_v19 = vadd.f32 %v1534_v6, %v6458_v44  ;;  %v4906_v29 = vor.u32 %v5188_v33, %v4905_v55  ;;  %v5210_v2 = vld [vmem:[%s7802_s1 + $0x184] sm:$0xf]  ;;  %v4995_v44 = vld [vmem:[%s7802_s1 + $0x18c] sm:$0xf0]  ;;  %v5001_v6 = vld [vmem:[%s7802_s1 + $0x188] sm:$0xf] }
 0x1d7   : > { %v4998_v55 = vor.u32 %v5210_v2, %v4995_v44  ;;  %v5150_v33 = vld [vmem:[%s5848_s11 + $0x1e4] sm:$0xf] }
 0x1d8   : > { %1573 = vmatmul.bf16.gmra.mxu1 %v6816_v34  ;;  %1960 = vmatmul.bf16.gmra.mxu0 %v6816_v34 }
 0x1d9   : > { %1702 = vmatmul.bf16.gmra.mxu2 %v6822_v38  ;;  %1831 = vmatmul.bf16.gmra.mxu3 %v6032_v31 }
 0x1da   : > { %2122 = vmatpush.bf16.msra.mxu2 %v4810_v20  ;;  %2251 = vmatpush.bf16.msra.mxu3 %v4906_v29  ;;  %v4761_v29 = vld [vmem:[%s5848_s11 + $0x1e8] sm:$0xf] }
 0x1db   : > { %1993 = vmatpush.bf16.msra.mxu1 %v4998_v55 }
 0x1dc   : > { %v1663_v63 = vpop.f32.mrf.mxu2  ;;  %v1792_v11 = vpop.f32.mrf.mxu3 }
 0x1dd   : > { %v6841_v37 = vadd.f32 %v1663_v63, %v1535_v19  ;;  %v6843_v62 = vadd.f32 %v1921_v0, %v1792_v11  ;;  %v1536_v22 = vpop.f32.mrf.mxu1  ;;  %v1923_v21 = vpop.f32.mrf.mxu0  ;;  %v5212_v0 = vld [vmem:[%s7802_s1 + $0x190] sm:$0xf0]  ;;  %v4755_v19 = vld [vmem:[%s5848_s11 + $0x1ec] sm:$0xf0] }
 0x1de   : > { %v5002_v20 = vor.u32 %v5212_v0, %v5001_v6  ;;  %v5152_v63 = vld [vmem:[%s5848_s11 + $0x1f0] sm:$0xf0]  ;;  %v1537_v11 = vadd.f32 %v1536_v22, %v6484_v15  ;;  %v6862_v34 = vor.u32 %v5150_v33, %v4755_v19  ;;  %v5153_v33 = vld [vmem:[%s5848_s11 + $0x1fc] sm:$0xf]  ;;  %v4767_v19 = vld [vmem:[%s5848_s11 + $0x204] sm:$0xf0] }
 0x1df   : > { %7993 = vst [vmem:[#allocation98_spill] sm:$0xff] %v6841_v37  ;;  %v6868_v55 = vor.u32 %v5152_v63, %v4761_v29  ;;  %v4773_v29 = vld [vmem:[%s5848_s11 + $0x200] sm:$0xf]  ;;  %v5155_v63 = vld [vmem:[%s5848_s11 + $0x208] sm:$0xf0] }
 0x1e0   : > { %7994 = vst [vmem:[#allocation99_spill] sm:$0xff] %v6843_v62  ;;  %2380 = vmatpush.bf16.msra.mxu0 %v5002_v20 }
 0x1e1   : > { %7995 = vst [vmem:[#allocation100_spill] sm:$0xff] %v6862_v34 }
 0x1e2   : > { %7997 = vst [vmem:[#allocation102_spill] sm:$0xff] %v6868_v55 }
 0x1e4   : > { %v1665_v37 = vpop.f32.mrf.mxu2  ;;  %v1794_v62 = vpop.f32.mrf.mxu3 }
 0x1e5   : > { %v6864_v31 = vadd.f32 %v1665_v37, %v1537_v11  ;;  %v6866_v2 = vadd.f32 %v1923_v21, %v1794_v62  ;;  %v1539_v44 = vpop.f32.mrf.mxu1  ;;  %v1926_v6 = vpop.f32.mrf.mxu0 }
 0x1e6   : > { %v1540_v15 = vadd.f32 %v1539_v44, %v6302_v16 }
 0x1e7   : > { %7996 = vst [vmem:[#allocation101_spill] sm:$0xff] %v6864_v31 }
 0x1e8   : > { %1578 = vmatmul.bf16.gmra.mxu1 %v6862_v34  ;;  %1965 = vmatmul.bf16.gmra.mxu0 %v6862_v34 }
 0x1e9   : > { %1707 = vmatmul.bf16.gmra.mxu2 %v6868_v55  ;;  %1836 = vmatmul.bf16.gmra.mxu3 %v6088_v1  ;;  %v6884_v55 = vor.u32 %v5153_v33, %v4767_v19  ;;  %v5156_v33 = vld [vmem:[%s5848_s11 + $0x214] sm:$0xf]  ;;  %v4779_v19 = vld [vmem:[%s5848_s11 + $0x21c] sm:$0xf0] }
 0x1eb   : > { %8000 = vst [vmem:[#allocation105_spill] sm:$0xff] %v6884_v55 }
 0x1ec   : > { %v1668_v37 = vpop.f32.mrf.mxu2  ;;  %v1797_v62 = vpop.f32.mrf.mxu3 }
 0x1ed   : > { %v6875_v22 = vadd.f32 %v1668_v37, %v1540_v15  ;;  %v6877_v21 = vadd.f32 %v1926_v6, %v1797_v62  ;;  %v1541_v0 = vpop.f32.mrf.mxu1  ;;  %v1928_v20 = vpop.f32.mrf.mxu0  ;;  %v6890_v15 = vor.u32 %v5155_v63, %v4773_v29  ;;  %v4785_v29 = vld [vmem:[%s5848_s11 + $0x218] sm:$0xf]  ;;  %v5158_v63 = vld [vmem:[%s5848_s11 + $0x220] sm:$0xf0] }
 0x1ee   : > { %v1542_v11 = vadd.f32 %v1541_v0, %v6314_v36 }
 0x1ef   : > { %7998 = vst [vmem:[#allocation103_spill] sm:$0xff] %v6875_v22 }
 0x1f0   : > { %7999 = vst [vmem:[#allocation104_spill] sm:$0xff] %v6877_v21 }
 0x1f1   : > { %8003 = vst [vmem:[#allocation108_spill] sm:$0xff] %v6890_v15 }
 0x1f4   : > { %v1670_v31 = vpop.f32.mrf.mxu2  ;;  %v1799_v34 = vpop.f32.mrf.mxu3 }
 0x1f5   : > { %v6886_v1 = vadd.f32 %v1670_v31, %v1542_v11  ;;  %v6888_v16 = vadd.f32 %v1928_v20, %v1799_v34  ;;  %v1544_v44 = vpop.f32.mrf.mxu1  ;;  %v1931_v6 = vpop.f32.mrf.mxu0 }
 0x1f6   : > { %v1545_v31 = vadd.f32 %v1544_v44, %v6330_v46 }
 0x1f7   : > { %8001 = vst [vmem:[#allocation106_spill] sm:$0xff] %v6886_v1  ;;  %v6906_v1 = vor.u32 %v5156_v33, %v4779_v19  ;;  %v5159_v33 = vld [vmem:[%s5848_s11 + $0x22c] sm:$0xf]  ;;  %v4791_v19 = vld [vmem:[%s5848_s11 + $0x234] sm:$0xf0] }
 0x1f8   : > { %8002 = vst [vmem:[#allocation107_spill] sm:$0xff] %v6888_v16  ;;  %1583 = vmatmul.bf16.gmra.mxu1 %v6884_v55  ;;  %1970 = vmatmul.bf16.gmra.mxu0 %v6884_v55 }
 0x1f9   : > { %1712 = vmatmul.bf16.gmra.mxu2 %v6890_v15  ;;  %1841 = vmatmul.bf16.gmra.mxu3 %v6132_v25  ;;  %8006 = vst [vmem:[#allocation111_spill] sm:$0xff] %v6906_v1 }
 0x1fc   : > { %v1673_v36 = vpop.f32.mrf.mxu2  ;;  %v1802_v34 = vpop.f32.mrf.mxu3 }
 0x1fd   : > { %v6897_v37 = vadd.f32 %v1673_v36, %v1545_v31  ;;  %v6899_v62 = vadd.f32 %v1931_v6, %v1802_v34  ;;  %v1546_v0 = vpop.f32.mrf.mxu1  ;;  %v1933_v20 = vpop.f32.mrf.mxu0  ;;  %v6912_v31 = vor.u32 %v5158_v63, %v4785_v29  ;;  %v4797_v29 = vld [vmem:[%s5848_s11 + $0x230] sm:$0xf]  ;;  %v5161_v63 = vld [vmem:[%s5848_s11 + $0x238] sm:$0xf0]  ;;  %s5262_s11 = smul.u32 48, %s8211_s13 }
 0x1fe   : > { %v1547_v11 = vadd.f32 %v1546_v0, %v6342_v58 }
 0x1ff   : > { %8004 = vst [vmem:[#allocation109_spill] sm:$0xff] %v6897_v37  ;;  %s6954_s16 = scalar_lea.vmem %s7804_s3, %s5262_s11 }
 0x200   : > { %8005 = vst [vmem:[#allocation110_spill] sm:$0xff] %v6899_v62 }
 0x201   : > { %8009 = vst [vmem:[#allocation114_spill] sm:$0xff] %v6912_v31 }
 0x204   : > { %v1675_v55 = vpop.f32.mrf.mxu2  ;;  %v1804_v15 = vpop.f32.mrf.mxu3 }
 0x205   : > { %v6908_v25 = vadd.f32 %v1675_v55, %v1547_v11  ;;  %v6910_v46 = vadd.f32 %v1933_v20, %v1804_v15  ;;  %v1549_v44 = vpop.f32.mrf.mxu1  ;;  %v1936_v6 = vpop.f32.mrf.mxu0 }
 0x206   : > { %v1550_v58 = vadd.f32 %v1549_v44, %v6370_v26 }
 0x207   : > { %8007 = vst [vmem:[#allocation112_spill] sm:$0xff] %v6908_v25 }
 0x208   : > { %8008 = vst [vmem:[#allocation113_spill] sm:$0xff] %v6910_v46  ;;  %1588 = vmatmul.bf16.gmra.mxu1 %v6906_v1  ;;  %1975 = vmatmul.bf16.gmra.mxu0 %v6906_v1 }
 0x209   : > { %1717 = vmatmul.bf16.gmra.mxu2 %v6912_v31  ;;  %1846 = vmatmul.bf16.gmra.mxu3 %v6188_v3  ;;  %v6928_v3 = vor.u32 %v5159_v33, %v4791_v19  ;;  %v8018_v19 = vld [vmem:[#allocation51_spill] sm:$0xff] }
 0x20b   : > { %8012 = vst [vmem:[#allocation117_spill] sm:$0xff] %v6928_v3 }
 0x20c   : > { %v1678_v55 = vpop.f32.mrf.mxu2  ;;  %v1807_v15 = vpop.f32.mrf.mxu3 }
 0x20d   : > { %v6919_v36 = vadd.f32 %v1678_v55, %v1550_v58  ;;  %v6921_v34 = vadd.f32 %v1936_v6, %v1807_v15  ;;  %v1551_v0 = vpop.f32.mrf.mxu1  ;;  %v1938_v20 = vpop.f32.mrf.mxu0  ;;  %v6934_v55 = vor.u32 %v5161_v63, %v4797_v29 }
 0x20e   : > { %v1552_v11 = vadd.f32 %v1551_v0, %v6394_v60 }
 0x20f   : > { %8010 = vst [vmem:[#allocation115_spill] sm:$0xff] %v6919_v36  ;;  %v8087_v36 = vld [vmem:[#allocation62_spill] sm:$0xff] }
 0x210   : > { %8011 = vst [vmem:[#allocation116_spill] sm:$0xff] %v6921_v34 }
 0x211   : > { %8015 = vst [vmem:[#allocation120_spill] sm:$0xff] %v6934_v55 }
 0x214   : > { %v1680_v1 = vpop.f32.mrf.mxu2  ;;  %v1809_v25 = vpop.f32.mrf.mxu3 }
 0x215   : > { %v6930_v26 = vadd.f32 %v1680_v1, %v1552_v11  ;;  %v6932_v44 = vadd.f32 %v1938_v20, %v1809_v25  ;;  %v1554_v58 = vpop.f32.mrf.mxu1  ;;  %v1941_v6 = vpop.f32.mrf.mxu0 }
 0x216   : > { %v1555_v60 = vadd.f32 %v1554_v58, %v6410_v9  ;;  %v8021_v58 = vld [vmem:[#allocation33_spill] sm:$0xff] }
 0x217   : > { %8013 = vst [vmem:[#allocation118_spill] sm:$0xff] %v6930_v26 }
 0x218   : > { %8014 = vst [vmem:[#allocation119_spill] sm:$0xff] %v6932_v44  ;;  %1593 = vmatmul.bf16.gmra.mxu1 %v6928_v3  ;;  %1980 = vmatmul.bf16.gmra.mxu0 %v6928_v3  ;;  %v8085_v44 = vld [vmem:[#allocation13_spill] sm:$0xff] }
 0x219   : > { %1722 = vmatmul.bf16.gmra.mxu2 %v6934_v55  ;;  %1851 = vmatmul.bf16.gmra.mxu3 %v6232_v35 }
 0x21c   : > { %v1683_v1 = vpop.f32.mrf.mxu2  ;;  %v1812_v15 = vpop.f32.mrf.mxu3 }
 0x21d   : > { %v6942_v25 = vadd.f32 %v1683_v1, %v1555_v60  ;;  %v6944_v0 = vadd.f32 %v1941_v6, %v1812_v15  ;;  %v1556_v20 = vpop.f32.mrf.mxu1  ;;  %v1943_v33 = vpop.f32.mrf.mxu0  ;;  %v8022_v6 = vld [vmem:[#allocation8_spill] sm:$0xff]  ;;  %v3543_v1 = vld [vmem:[%s6954_s16] sm:$0xff]  ;;  %v5739_v15 = vmov 0  }
 0x21e   : > { %v1557_v29 = vadd.f32 %v1556_v20, %v8018_v19  ;;  %v8023_v60 = vld [vmem:[#allocation32_spill] sm:$0xff]  ;;  %5330 = vset.pattern.permute.xlu0 %v5739_v15  ;;  %5331 = vset.pattern.permute.xlu1 %v5739_v15  ;;  %v8024_v20 = vld [vmem:[#allocation55_spill] sm:$0xff] }
 0x21f   : > { %8016 = vst [vmem:[#allocation121_spill] sm:$0xff] %v6942_v25  ;;  %3596 = vperm.xlu0 %5330, %v3543_v1   ;;  %5332 = vset.pattern.permute.xlu2 %v5739_v15  ;;  %v8027_v25 = vld [vmem:[#allocation57_spill] sm:$0xff] }
 0x220   : > { %8017 = vst [vmem:[#allocation122_spill] sm:$0xff] %v6944_v0 }
 0x224   : > { %v1685_v63 = vpop.f32.mrf.mxu2  ;;  %v1814_v11 = vpop.f32.mrf.mxu3 }
 0x225   : > { %v6947_v3 = vadd.f32 %v1685_v63, %v1557_v29  ;;  %v6949_v26 = vadd.f32 %v1943_v33, %v1814_v11  ;;  %v1559_v35 = vpop.f32.mrf.mxu1  ;;  %v1946_v9 = vpop.f32.mrf.mxu0 }
 0x226   : > { %v1560_v33 = vadd.f32 %v1559_v35, %v8024_v20  ;;  %v8030_v20 = vld [vmem:[#allocation35_spill] sm:$0xff] }
 0x227   : > { %8019 = vst [vmem:[#allocation51_spill] sm:$0xff] %v6947_v3 }
 0x228   : > { %8020 = vst [vmem:[#allocation123_spill] sm:$0xff] %v6949_v26  ;;  %1994 = vmatmul.bf16.vlgmr.msra.gmra.mxu1 %v8021_v58  ;;  %2381 = vmatmul.bf16.vlgmr.msra.gmra.mxu0 %v8021_v58 }
 0x229   : > { %2123 = vmatmul.bf16.vlgmr.msra.gmra.mxu2 %v8022_v6  ;;  %2252 = vmatmul.bf16.vlgmr.msra.gmra.mxu3 %v8023_v60  ;;  %v3544_v6 = vld [vmem:[%s6954_s16 + $0x8] sm:$0xff] }
 0x22a   : > { %3601 = vperm.xlu0 %5330, %v3544_v6  }
 0x22c   : > { %v1688_v19 = vpop.f32.mrf.mxu2  ;;  %v1817_v29 = vpop.f32.mrf.mxu3 }
 0x22d   : > { %v6962_v63 = vadd.f32 %v1688_v19, %v1560_v33  ;;  %v6964_v11 = vadd.f32 %v1946_v9, %v1817_v29  ;;  %v1561_v58 = vpop.f32.mrf.mxu1  ;;  %v1948_v3 = vpop.f32.mrf.mxu0  ;;  %v8031_v9 = vld [vmem:[#allocation12_spill] sm:$0xff]  ;;  %v8032_v33 = vld [vmem:[#allocation34_spill] sm:$0xff] }
 0x22e   : > { %v1562_v60 = vadd.f32 %v1561_v58, %v8027_v25  ;;  %v3545_v19 = vld [vmem:[%s6954_s16 + $0x10] sm:$0xff]  ;;  %v8033_v25 = vld [vmem:[#allocation61_spill] sm:$0xff] }
 0x22f   : > { %8025 = vst [vmem:[#allocation33_spill] sm:$0xff] %v6962_v63  ;;  %3606 = vperm.xlu1 %5331, %v3545_v19  }
 0x230   : > { %8026 = vst [vmem:[#allocation8_spill] sm:$0xff] %v6964_v11 }
 0x234   : > { %v1690_v26 = vpop.f32.mrf.mxu2  ;;  %v1819_v0 = vpop.f32.mrf.mxu3 }
 0x235   : > { %v6968_v55 = vadd.f32 %v1690_v26, %v1562_v60  ;;  %v6970_v35 = vadd.f32 %v1948_v3, %v1819_v0  ;;  %v1564_v1 = vpop.f32.mrf.mxu1  ;;  %v1951_v15 = vpop.f32.mrf.mxu0 }
 0x236   : > { %v1565_v29 = vadd.f32 %v1564_v1, %v8033_v25  ;;  %v8039_v25 = vld [vmem:[#allocation37_spill] sm:$0xff] }
 0x237   : > { %8028 = vst [vmem:[#allocation32_spill] sm:$0xff] %v6968_v55  ;;  %v3546_v55 = vld [vmem:[%s6954_s16 + $0x18] sm:$0xff] }
 0x238   : > { %8029 = vst [vmem:[#allocation55_spill] sm:$0xff] %v6970_v35  ;;  %1999 = vmatmul.bf16.gmra.mxu1 %v8030_v20  ;;  %2386 = vmatmul.bf16.gmra.mxu0 %v8030_v20  ;;  %v8036_v35 = vld [vmem:[#allocation63_spill] sm:$0xff] }
 0x239   : > { %2128 = vmatmul.bf16.gmra.mxu2 %v8031_v9  ;;  %2257 = vmatmul.bf16.gmra.mxu3 %v8032_v33 }
 0x23a   : > { %3611 = vperm.xlu1 %5331, %v3546_v55  }
 0x23c   : > { %v1693_v58 = vpop.f32.mrf.mxu2  ;;  %v1822_v26 = vpop.f32.mrf.mxu3 }
 0x23d   : > { %v6978_v6 = vadd.f32 %v1693_v58, %v1565_v29  ;;  %v6980_v3 = vadd.f32 %v1951_v15, %v1822_v26  ;;  %v1566_v0 = vpop.f32.mrf.mxu1  ;;  %v1953_v60 = vpop.f32.mrf.mxu0  ;;  %v8040_v15 = vld [vmem:[#allocation16_spill] sm:$0xff]  ;;  %v8042_v58 = vld [vmem:[#allocation38_spill] sm:$0xff] }
 0x23e   : > { %v1567_v20 = vadd.f32 %v1566_v0, %v8036_v35  ;;  %v8041_v29 = vld [vmem:[#allocation36_spill] sm:$0xff] }
 0x23f   : > { %8034 = vst [vmem:[#allocation57_spill] sm:$0xff] %v6978_v6 }
 0x240   : > { %8035 = vst [vmem:[#allocation35_spill] sm:$0xff] %v6980_v3  ;;  %v8075_v3 = vld [vmem:[#allocation54_spill] sm:$0xff] }
 0x244   : > { %v1695_v63 = vpop.f32.mrf.mxu2  ;;  %v1824_v9 = vpop.f32.mrf.mxu3 }
 0x245   : > { %v6984_v11 = vadd.f32 %v1695_v63, %v1567_v20  ;;  %v6986_v33 = vadd.f32 %v1953_v60, %v1824_v9  ;;  %v1569_v19 = vpop.f32.mrf.mxu1  ;;  %v1956_v1 = vpop.f32.mrf.mxu0  ;;  %v8045_v9 = vld [vmem:[#allocation39_spill] sm:$0xff] }
 0x246   : > { %v1570_v55 = vadd.f32 %v1569_v19, %v8042_v58  ;;  %v8048_v58 = vld [vmem:[#allocation41_spill] sm:$0xff] }
 0x247   : > { %8037 = vst [vmem:[#allocation12_spill] sm:$0xff] %v6984_v11 }
 0x248   : > { %8038 = vst [vmem:[#allocation34_spill] sm:$0xff] %v6986_v33  ;;  %2004 = vmatmul.bf16.gmra.mxu1 %v8039_v25  ;;  %2391 = vmatmul.bf16.gmra.mxu0 %v8039_v25 }
 0x249   : > { %2133 = vmatmul.bf16.gmra.mxu2 %v8040_v15  ;;  %2262 = vmatmul.bf16.gmra.mxu3 %v8041_v29 }
 0x24c   : > { %v1698_v26 = vpop.f32.mrf.mxu2  ;;  %v1827_v35 = vpop.f32.mrf.mxu3 }
 0x24d   : > { %v6993_v0 = vadd.f32 %v1698_v26, %v1570_v55  ;;  %v6995_v63 = vadd.f32 %v1956_v1, %v1827_v35  ;;  %v1571_v60 = vpop.f32.mrf.mxu1  ;;  %v1958_v20 = vpop.f32.mrf.mxu0  ;;  %v8049_v1 = vld [vmem:[#allocation20_spill] sm:$0xff]  ;;  %v8051_v35 = vld [vmem:[#allocation42_spill] sm:$0xff] }
 0x24e   : > { %v1572_v11 = vadd.f32 %v1571_v60, %v8045_v9  ;;  %v8050_v55 = vld [vmem:[#allocation40_spill] sm:$0xff] }
 0x24f   : > { %8043 = vst [vmem:[#allocation61_spill] sm:$0xff] %v6993_v0  ;;  %v3549_v26 = vld [vmem:[%s6954_s16 + $0x30] sm:$0xff]  ;;  %v3550_v0 = vld [vmem:[%s6954_s16 + $0x38] sm:$0xff] }
 0x250   : > { %8044 = vst [vmem:[#allocation63_spill] sm:$0xff] %v6995_v63  ;;  %3626 = vperm.xlu0 %5330, %v3549_v26   ;;  %3631 = vperm.xlu1 %5331, %v3550_v0   ;;  %v3548_v0 = vld [vmem:[%s6954_s16 + $0x28] sm:$0xff] }
 0x254   : > { %v1700_v33 = vpop.f32.mrf.mxu2  ;;  %v1829_v6 = vpop.f32.mrf.mxu3 }
 0x255   : > { %v6998_v25 = vadd.f32 %v1700_v33, %v1572_v11  ;;  %v7000_v15 = vadd.f32 %v1958_v20, %v1829_v6  ;;  %v1574_v29 = vpop.f32.mrf.mxu1  ;;  %v1961_v19 = vpop.f32.mrf.mxu0 }
 0x256   : > { %v1575_v60 = vadd.f32 %v1574_v29, %v8051_v35 }
 0x257   : > { %8046 = vst [vmem:[#allocation37_spill] sm:$0xff] %v6998_v25 }
 0x258   : > { %8047 = vst [vmem:[#allocation16_spill] sm:$0xff] %v7000_v15  ;;  %2009 = vmatmul.bf16.gmra.mxu1 %v8048_v58  ;;  %2396 = vmatmul.bf16.gmra.mxu0 %v8048_v58  ;;  %v3547_v15 = vld [vmem:[%s6954_s16 + $0x20] sm:$0xff]  ;;  %v8054_v58 = vld [vmem:[#allocation43_spill] sm:$0xff] }
 0x259   : > { %2138 = vmatmul.bf16.gmra.mxu2 %v8049_v1  ;;  %2267 = vmatmul.bf16.gmra.mxu3 %v8050_v55 }
 0x25a   : > { %3616 = vperm.xlu2 %5332, %v3547_v15   ;;  %v8060_v15 = vld [vmem:[#allocation46_spill] sm:$0xff] }
 0x25c   : > { %v1703_v11 = vpop.f32.mrf.mxu2  ;;  %v1832_v33 = vpop.f32.mrf.mxu3 }
 0x25d   : > { %v7008_v6 = vadd.f32 %v1703_v11, %v1575_v60  ;;  %v7010_v20 = vadd.f32 %v1961_v19, %v1832_v33  ;;  %v1576_v9 = vpop.f32.mrf.mxu1  ;;  %v1963_v25 = vpop.f32.mrf.mxu0  ;;  %v8057_v19 = vld [vmem:[#allocation45_spill] sm:$0xff]  ;;  %v8058_v11 = vld [vmem:[#allocation24_spill] sm:$0xff] }
 0x25e   : > { %v1577_v1 = vadd.f32 %v1576_v9, %v8054_v58  ;;  %v8059_v33 = vld [vmem:[#allocation44_spill] sm:$0xff] }
 0x25f   : > { %8052 = vst [vmem:[#allocation36_spill] sm:$0xff] %v7008_v6 }
 0x260   : > { %8053 = vst [vmem:[#allocation38_spill] sm:$0xff] %v7010_v20 }
 0x262   : > { %3621 = vperm.xlu2 %5332, %v3548_v0  }
 0x264   : > { %v1705_v55 = vpop.f32.mrf.mxu2  ;;  %v1834_v63 = vpop.f32.mrf.mxu3 }
 0x265   : > { %v7015_v26 = vadd.f32 %v1705_v55, %v1577_v1  ;;  %v7017_v29 = vadd.f32 %v1963_v25, %v1834_v63  ;;  %v1579_v35 = vpop.f32.mrf.mxu1  ;;  %v1966_v60 = vpop.f32.mrf.mxu0 }
 0x266   : > { %v1580_v9 = vadd.f32 %v1579_v35, %v8060_v15 }
 0x267   : > { %8055 = vst [vmem:[#allocation39_spill] sm:$0xff] %v7015_v26 }
 0x268   : > { %8056 = vst [vmem:[#allocation41_spill] sm:$0xff] %v7017_v29  ;;  %2014 = vmatmul.bf16.gmra.mxu1 %v8057_v19  ;;  %2401 = vmatmul.bf16.gmra.mxu0 %v8057_v19  ;;  %v3552_v29 = vld [vmem:[%s6954_s16 + $0x48] sm:$0xff] }
 0x269   : > { %2143 = vmatmul.bf16.gmra.mxu2 %v8058_v11  ;;  %2272 = vmatmul.bf16.gmra.mxu3 %v8059_v33  ;;  %v8063_v19 = vld [vmem:[#allocation47_spill] sm:$0xff] }
 0x26a   : > { %3641 = vperm.xlu0 %5330, %v3552_v29   ;;  %v3553_v29 = vld [vmem:[%s6954_s16 + $0x50] sm:$0xff] }
 0x26b   : > { %3646 = vperm.xlu1 %5331, %v3553_v29  }
 0x26c   : > { %v1708_v58 = vpop.f32.mrf.mxu2  ;;  %v1837_v1 = vpop.f32.mrf.mxu3 }
 0x26d   : > { %v7025_v55 = vadd.f32 %v1708_v58, %v1580_v9  ;;  %v7027_v63 = vadd.f32 %v1966_v60, %v1837_v1  ;;  %v1581_v25 = vpop.f32.mrf.mxu1  ;;  %v1968_v26 = vpop.f32.mrf.mxu0  ;;  %v8066_v9 = vld [vmem:[#allocation49_spill] sm:$0xff]  ;;  %v8067_v60 = vld [vmem:[#allocation28_spill] sm:$0xff]  ;;  %v8069_v1 = vld [vmem:[#allocation50_spill] sm:$0xff] }
 0x26e   : > { %v1582_v6 = vadd.f32 %v1581_v25, %v8063_v19  ;;  %v8068_v58 = vld [vmem:[#allocation48_spill] sm:$0xff] }
 0x26f   : > { %8061 = vst [vmem:[#allocation20_spill] sm:$0xff] %v7025_v55 }
 0x270   : > { %8062 = vst [vmem:[#allocation40_spill] sm:$0xff] %v7027_v63 }
 0x274   : > { %v1710_v11 = vpop.f32.mrf.mxu2  ;;  %v1839_v20 = vpop.f32.mrf.mxu3 }
 0x275   : > { %v7031_v33 = vadd.f32 %v1710_v11, %v1582_v6  ;;  %v7033_v0 = vadd.f32 %v1968_v26, %v1839_v20  ;;  %v1584_v35 = vpop.f32.mrf.mxu1  ;;  %v1971_v15 = vpop.f32.mrf.mxu0 }
 0x276   : > { %v1585_v25 = vadd.f32 %v1584_v35, %v8069_v1 }
 0x277   : > { %8064 = vst [vmem:[#allocation42_spill] sm:$0xff] %v7031_v33 }
 0x278   : > { %8065 = vst [vmem:[#allocation43_spill] sm:$0xff] %v7033_v0  ;;  %2019 = vmatmul.bf16.gmra.mxu1 %v8066_v9  ;;  %2406 = vmatmul.bf16.gmra.mxu0 %v8066_v9  ;;  %v3551_v0 = vld [vmem:[%s6954_s16 + $0x40] sm:$0xff]  ;;  %v8072_v9 = vld [vmem:[#allocation52_spill] sm:$0xff] }
 0x279   : > { %2148 = vmatmul.bf16.gmra.mxu2 %v8067_v60  ;;  %2277 = vmatmul.bf16.gmra.mxu3 %v8068_v58 }
 0x27a   : > { %3636 = vperm.xlu2 %5332, %v3551_v0   ;;  %v3555_v0 = vld [vmem:[%s6954_s16 + $0x60] sm:$0xff] }
 0x27b   : > { %3656 = vperm.xlu0 %5330, %v3555_v0  }
 0x27c   : > { %v1713_v19 = vpop.f32.mrf.mxu2  ;;  %v1842_v6 = vpop.f32.mrf.mxu3 }
 0x27d   : > { %v7041_v11 = vadd.f32 %v1713_v19, %v1585_v25  ;;  %v7043_v20 = vadd.f32 %v1971_v15, %v1842_v6  ;;  %v1586_v26 = vpop.f32.mrf.mxu1  ;;  %v1973_v33 = vpop.f32.mrf.mxu0  ;;  %v8076_v15 = vld [vmem:[#allocation9_spill] sm:$0xff]  ;;  %v8078_v19 = vld [vmem:[#allocation56_spill] sm:$0xff] }
 0x27e   : > { %v1587_v55 = vadd.f32 %v1586_v26, %v8072_v9  ;;  %v8077_v25 = vld [vmem:[#allocation53_spill] sm:$0xff] }
 0x27f   : > { %8070 = vst [vmem:[#allocation45_spill] sm:$0xff] %v7041_v11  ;;  %v8081_v11 = vld [vmem:[#allocation58_spill] sm:$0xff] }
 0x280   : > { %8071 = vst [vmem:[#allocation24_spill] sm:$0xff] %v7043_v20 }
 0x284   : > { %v1715_v60 = vpop.f32.mrf.mxu2  ;;  %v1844_v63 = vpop.f32.mrf.mxu3 }
 0x285   : > { %v7047_v58 = vadd.f32 %v1715_v60, %v1587_v55  ;;  %v7049_v29 = vadd.f32 %v1973_v33, %v1844_v63  ;;  %v1589_v35 = vpop.f32.mrf.mxu1  ;;  %v1976_v1 = vpop.f32.mrf.mxu0 }
 0x286   : > { %v1590_v6 = vadd.f32 %v1589_v35, %v8078_v19 }
 0x287   : > { %8073 = vst [vmem:[#allocation44_spill] sm:$0xff] %v7047_v58 }
 0x288   : > { %8074 = vst [vmem:[#allocation46_spill] sm:$0xff] %v7049_v29  ;;  %2024 = vmatmul.bf16.gmra.mxu1 %v8075_v3  ;;  %2411 = vmatmul.bf16.gmra.mxu0 %v8075_v3  ;;  %v2598_v3 = vld [vmem:[%s7803_s2] sm:$0x7]  ;;  %v3556_v29 = vld [vmem:[%s6954_s16 + $0x68] sm:$0xff] }
 0x289   : > { %2153 = vmatmul.bf16.gmra.mxu2 %v8076_v15  ;;  %2282 = vmatmul.bf16.gmra.mxu3 %v8077_v25  ;;  %v2600_v58 = vperm.slane %v2598_v3, 0  ;;  %v2601_v15 = vperm.slane %v2598_v3, 1 }
 0x28a   : > { %3661 = vperm.xlu1 %5331, %v3556_v29  }
 0x28b   : > { %v2606_v0 = vpack.c.bf16 %v2601_v15, %v2600_v58 }
 0x28c   : > { %v1718_v26 = vpop.f32.mrf.mxu2  ;;  %v1847_v55 = vpop.f32.mrf.mxu3 }
 0x28d   : > { %v7057_v9 = vadd.f32 %v1718_v26, %v1590_v6  ;;  %v7059_v63 = vadd.f32 %v1976_v1, %v1847_v55  ;;  %v1591_v33 = vpop.f32.mrf.mxu1  ;;  %v1978_v60 = vpop.f32.mrf.mxu0  ;;  %v8084_v55 = vld [vmem:[#allocation60_spill] sm:$0xff] }
 0x28e   : > { %v1592_v25 = vadd.f32 %v1591_v33, %v8081_v11  ;;  %v8086_v11 = vld [vmem:[#allocation59_spill] sm:$0xff]  ;;  %v2602_v33 = vperm.slane %v2598_v3, 2  ;;  %v8090_v3 = vld [vmem:[#allocation64_spill] sm:$0xff] }
 0x28f   : > { %8079 = vst [vmem:[#allocation47_spill] sm:$0xff] %v7057_v9  ;;  %v2610_v9 = vunpack.c.l.b16 %v2606_v0 }
 0x290   : > { %8080 = vst [vmem:[#allocation49_spill] sm:$0xff] %v7059_v63  ;;  %v2611_v63 = vunpack.c.h.b16 %v2606_v0 }
 0x291   : > { %v2613_v15 = vpack.c.b16 %v2610_v9, %v2610_v9 }
 0x294   : > { %v1720_v20 = vpop.f32.mrf.mxu2  ;;  %v1849_v35 = vpop.f32.mrf.mxu3 }
 0x295   : > { %v7066_v19 = vadd.f32 %v1720_v20, %v1592_v25  ;;  %v7068_v1 = vadd.f32 %v1978_v60, %v1849_v35  ;;  %v1594_v6 = vpop.f32.mrf.mxu1  ;;  %v1981_v26 = vpop.f32.mrf.mxu0  ;;  %v3554_v20 = vld [vmem:[%s6954_s16 + $0x58] sm:$0xff]  ;;  %v2614_v25 = vpack.c.b16 %v2611_v63, %v2611_v63 }
 0x296   : > { %v1595_v58 = vadd.f32 %v1594_v6, %v8087_v36  ;;  %3651 = vperm.xlu2 %5332, %v3554_v20   ;;  %v3558_v36 = vld [vmem:[%s6954_s16 + $0x78] sm:$0xff] }
 0x297   : > { %8082 = vst [vmem:[#allocation28_spill] sm:$0xff] %v7066_v19  ;;  %v2621_v34 = vpack.i.b16 %v2614_v25, %v2614_v25  ;;  %3671 = vperm.xlu0 %5330, %v3558_v36  }
 0x298   : > { %8083 = vst [vmem:[#allocation48_spill] sm:$0xff] %v7068_v1  ;;  %2029 = vmatmul.bf16.gmra.mxu1 %v8084_v55  ;;  %2416 = vmatmul.bf16.gmra.mxu0 %v8084_v55  ;;  %v2607_v1 = vpack.c.bf16 %v2602_v33, %v2602_v33 }
 0x299   : > { %2158 = vmatmul.bf16.gmra.mxu2 %v8085_v44  ;;  %2287 = vmatmul.bf16.gmra.mxu3 %v8086_v11  ;;  %v2617_v44 = vpack.i.b16 %v2613_v15, %v2613_v15  ;;  %v2623_v62 = vperm.slane %v2621_v34, 0  ;;  %v8093_v15 = vld [vmem:[#allocation66_spill] sm:$0xff]  ;;  %v8095_v34 = vld [vmem:[#allocation65_spill] sm:$0xff] }
 0x29a   : > { %v2612_v11 = vunpack.c.l.b16 %v2607_v1 }
 0x29b   : > { %v2619_v37 = vperm.slane %v2617_v44, 0 }
 0x29c   : > { %v1723_v29 = vpop.f32.mrf.mxu2  ;;  %v1852_v60 = vpop.f32.mrf.mxu3  ;;  %v2615_v20 = vpack.c.b16 %v2612_v11, %v2612_v11 }
 0x29d   : > { %v7076_v35 = vadd.f32 %v1723_v29, %v1595_v58  ;;  %v7078_v19 = vadd.f32 %v1981_v26, %v1852_v60  ;;  %v1596_v55 = vpop.f32.mrf.mxu1  ;;  %v1983_v0 = vpop.f32.mrf.mxu0  ;;  %v7088_v29 = vunpack.c.l.bf16 %v2619_v37  ;;  %v7090_v60 = vunpack.c.l.bf16 %v2623_v62 }
 0x29e   : > { %v1597_v31 = vadd.f32 %v1596_v55, %v8090_v3 }
 0x29f   : > { %8088 = vst [vmem:[#allocation50_spill] sm:$0xff] %v7076_v35 }
 0x2a0   : > { %8089 = vst [vmem:[#allocation52_spill] sm:$0xff] %v7078_v19  ;;  %v8100_v19 = vld [vmem:[#allocation72_spill] sm:$0xff] }
 0x2a4   : > { %v1725_v6 = vpop.f32.mrf.mxu2  ;;  %v1854_v46 = vpop.f32.mrf.mxu3 }
 0x2a5   : > { %v7082_v9 = vadd.f32 %v1725_v6, %v1597_v31  ;;  %v7084_v63 = vadd.f32 %v1983_v0, %v1854_v46  ;;  %v1995_v26 = vpop.f32.mrf.mxu1  ;;  %v2382_v58 = vpop.f32.mrf.mxu0  ;;  %v8094_v31 = vld [vmem:[#allocation17_spill] sm:$0xff]  ;;  %v2625_v46 = vpack.i.b16 %v2615_v20, %v2615_v20  ;;  %v3559_v0 = vld [vmem:[%s6954_s16 + $0x80] sm:$0xff] }
 0x2a6   : > { %v1996_v33 = vadd.f32 %v1995_v26, %v6517_v4  ;;  %3676 = vperm.xlu1 %5331, %v3559_v0  }
 0x2a7   : > { %8091 = vst [vmem:[#allocation54_spill] sm:$0xff] %v7082_v9  ;;  %v2627_v11 = vperm.slane %v2625_v46, 0  ;;  %v3557_v46 = vld [vmem:[%s6954_s16 + $0x70] sm:$0xff] }
 0x2a8   : > { %8092 = vst [vmem:[#allocation9_spill] sm:$0xff] %v7084_v63  ;;  %v2502_v1 = vpack.c.bf16 %v1996_v33, %v6515_v27  ;;  %2034 = vmatmul.bf16.gmra.mxu1 %v8093_v15  ;;  %2421 = vmatmul.bf16.gmra.mxu0 %v8093_v15 }
 0x2a9   : > { %2163 = vmatmul.bf16.gmra.mxu2 %v8094_v31  ;;  %2292 = vmatmul.bf16.gmra.mxu3 %v8095_v34 }
 0x2aa   : > { %v2628_v25 = vunpack.c.l.bf16 %v2502_v1  ;;  %v2629_v55 = vunpack.c.h.bf16 %v2502_v1  ;;  %v8096_v1 = vld [vmem:[#allocation68_spill] sm:$0xff]  ;;  %3666 = vperm.xlu2 %5332, %v3557_v46   ;;  %v8098_v46 = vld [vmem:[#allocation21_spill] sm:$0xff] }
 0x2ac   : > { %v2775_v4 = vadd.f32 %v7088_v29, %v2628_v25  ;;  %v2776_v27 = vadd.f32 %v7090_v60, %v2629_v55  ;;  %v2124_v37 = vpop.f32.mrf.mxu2  ;;  %v2253_v44 = vpop.f32.mrf.mxu3  ;;  %v7101_v25 = vunpack.c.l.bf16 %v2627_v11 }
 0x2ad   : > { %v2254_v62 = vadd.f32 %v2253_v44, %v2124_v37  ;;  %v1997_v3 = vpop.f32.mrf.mxu1  ;;  %v2384_v36 = vpop.f32.mrf.mxu0 }
 0x2ae   : > { %v2919_v6 = vpack.c.bf16 %v2776_v27, %v2775_v4  ;;  %v1998_v26 = vadd.f32 %v1997_v3, %v6528_v13 }
 0x2af   : > { %v2383_v33 = vadd.f32 %v2382_v58, %v2254_v62 }
 0x2b0   : > { %v3015_v20 = vunpack.c.l.bf16 %v2919_v6  ;;  %v3016_v15 = vunpack.c.h.bf16 %v2919_v6  ;;  %v2504_v31 = vpack.c.bf16 %v1998_v26, %v8096_v1 }
 0x2b1   : > { %v2503_v34 = vpack.c.bf16 %v2383_v33, %v2383_v33 }
 0x2b2   : > { %5333 = vtanh.f32 %v3015_v20  ;;  %v2631_v55 = vunpack.c.l.bf16 %v2504_v31  ;;  %v2632_v9 = vunpack.c.h.bf16 %v2504_v31 }
 0x2b3   : > { %5335 = vtanh.f32 %v3016_v15  ;;  %v2630_v0 = vunpack.c.l.bf16 %v2503_v34 }
 0x2b4   : > { %v2778_v37 = vadd.f32 %v7088_v29, %v2631_v55  ;;  %v2779_v4 = vadd.f32 %v7090_v60, %v2632_v9  ;;  %v2126_v27 = vpop.f32.mrf.mxu2  ;;  %v2255_v13 = vpop.f32.mrf.mxu3  ;;  %v8097_v9 = vld [vmem:[#allocation69_spill] sm:$0xff] }
 0x2b5   : > { %v2777_v58 = vadd.f32 %v7101_v25, %v2630_v0  ;;  %v2256_v44 = vadd.f32 %v2255_v13, %v2126_v27  ;;  %v2000_v62 = vpop.f32.mrf.mxu1  ;;  %v2387_v3 = vpop.f32.mrf.mxu0 }
 0x2b6   : > { %v2921_v11 = vpack.c.bf16 %v2779_v4, %v2778_v37  ;;  %v2001_v6 = vadd.f32 %v2000_v62, %v6539_v18  ;;  %v8099_v37 = vld [vmem:[#allocation67_spill] sm:$0xff]  ;;  %v3597_v18 = vpop.permute.xlu0 %3596 }
 0x2b7   : > { %v2920_v26 = vpack.c.bf16 %v2777_v58, %v2777_v58  ;;  %v2385_v33 = vadd.f32 %v2384_v36, %v2256_v44  ;;  %v3561_v58 = vld [vmem:[%s6954_s16 + $0x90] sm:$0xff] }
 0x2b8   : > { %v5334_v20 = vpop.eup %5333  ;;  %v3018_v15 = vunpack.c.l.bf16 %v2921_v11  ;;  %v3019_v1 = vunpack.c.h.bf16 %v2921_v11  ;;  %v2506_v31 = vpack.c.bf16 %v2001_v6, %v6537_v17  ;;  %2039 = vmatmul.bf16.gmra.mxu1 %v8097_v9  ;;  %2426 = vmatmul.bf16.gmra.mxu0 %v8097_v9 }
 0x2b9   : > { %v5336_v34 = vpop.eup %5335  ;;  %v3017_v55 = vunpack.c.l.bf16 %v2920_v26  ;;  %v2505_v0 = vpack.c.bf16 %v2385_v33, %v2385_v33  ;;  %2168 = vmatmul.bf16.gmra.mxu2 %v8098_v46  ;;  %2297 = vmatmul.bf16.gmra.mxu3 %v8099_v37 }
 0x2ba   : > { %5337 = vtanh.f32 %v3018_v15  ;;  %v2634_v36 = vunpack.c.l.bf16 %v2506_v31  ;;  %v2635_v4 = vunpack.c.h.bf16 %v2506_v31  ;;  %v3303_v27 = vpack.c.bf16 %v5336_v34, %v5334_v20  ;;  %3686 = vperm.xlu0 %5330, %v3561_v58  }
 0x2bb   : > { %5339 = vtanh.f32 %v3017_v55  ;;  %v2633_v13 = vunpack.c.l.bf16 %v2505_v0 }
 0x2bc   : > { %5341 = vtanh.f32 %v3019_v1  ;;  %v2781_v17 = vadd.f32 %v7088_v29, %v2634_v36  ;;  %v2782_v44 = vadd.f32 %v7090_v60, %v2635_v4  ;;  %v2129_v62 = vpop.f32.mrf.mxu2  ;;  %v2258_v11 = vpop.f32.mrf.mxu3  ;;  %v3399_v6 = vunpack.c.l.bf16 %v3303_v27 }
 0x2bd   : > { %v2780_v26 = vadd.f32 %v7101_v25, %v2633_v13  ;;  %v2259_v33 = vadd.f32 %v2258_v11, %v2129_v62  ;;  %v3400_v9 = vunpack.c.h.bf16 %v3303_v27  ;;  %v2002_v15 = vpop.f32.mrf.mxu1  ;;  %v2389_v46 = vpop.f32.mrf.mxu0 }
 0x2be   : > { %v2923_v31 = vpack.c.bf16 %v2782_v44, %v2781_v17  ;;  %v3834_v20 = vmul.f32 %v3597_v18, %v3399_v6  ;;  %v2003_v34 = vadd.f32 %v2002_v15, %v6550_v39  ;;  %v7119_v39 = vpop.permute.xlu0 %3601  ;;  %v3562_v6 = vld [vmem:[%s6954_s16 + $0x98] sm:$0xff] }
 0x2bf   : > { %v2922_v55 = vpack.c.bf16 %v2780_v26, %v2780_v26  ;;  %v2388_v1 = vadd.f32 %v2387_v3, %v2259_v33  ;;  %v3835_v0 = vmul.f32 %v3597_v18, %v3400_v9  ;;  %3691 = vperm.xlu1 %5331, %v3562_v6  }
 0x2c0   : > { %v5338_v37 = vpop.eup %5337  ;;  %v3021_v36 = vunpack.c.l.bf16 %v2923_v31  ;;  %v3022_v4 = vunpack.c.h.bf16 %v2923_v31  ;;  %v2508_v35 = vpack.c.bf16 %v2003_v34, %v6548_v23 }
 0x2c1   : > { %v5340_v58 = vpop.eup %5339  ;;  %v3020_v63 = vunpack.c.l.bf16 %v2922_v55  ;;  %v2507_v13 = vpack.c.bf16 %v2388_v1, %v2388_v1 }
 0x2c2   : > { %v5342_v62 = vpop.eup %5341  ;;  %5343 = vtanh.f32 %v3021_v36  ;;  %v3304_v27 = vpack.c.bf16 %v5340_v58, %v5340_v58  ;;  %v2637_v11 = vunpack.c.l.bf16 %v2508_v35  ;;  %v2638_v17 = vunpack.c.h.bf16 %v2508_v35 }
 0x2c3   : > { %5345 = vtanh.f32 %v3022_v4  ;;  %v2636_v44 = vunpack.c.l.bf16 %v2507_v13  ;;  %v3305_v3 = vpack.c.bf16 %v5342_v62, %v5338_v37 }
 0x2c4   : > { %v3401_v26 = vunpack.c.l.bf16 %v3304_v27  ;;  %v2784_v33 = vadd.f32 %v7088_v29, %v2637_v11  ;;  %v2785_v9 = vadd.f32 %v7090_v60, %v2638_v17  ;;  %v2131_v23 = vpop.f32.mrf.mxu2  ;;  %v2260_v15 = vpop.f32.mrf.mxu3  ;;  %5347 = vtanh.f32 %v3020_v63 }
 0x2c5   : > { %v2783_v31 = vadd.f32 %v7101_v25, %v2636_v44  ;;  %v2261_v34 = vadd.f32 %v2260_v15, %v2131_v23  ;;  %v3402_v55 = vunpack.c.l.bf16 %v3305_v3  ;;  %v3403_v35 = vunpack.c.h.bf16 %v3305_v3  ;;  %v2005_v1 = vpop.f32.mrf.mxu1  ;;  %v2392_v36 = vpop.f32.mrf.mxu0  ;;  %v8101_v23 = vld [vmem:[#allocation71_spill] sm:$0xff] }
 0x2c6   : > { %v3836_v4 = vmul.f32 %v3597_v18, %v3401_v26  ;;  %v2925_v58 = vpack.c.bf16 %v2785_v9, %v2784_v33  ;;  %v2006_v37 = vadd.f32 %v2005_v1, %v6573_v28  ;;  %v8102_v9 = vld [vmem:[#allocation25_spill] sm:$0xff]  ;;  %v3607_v15 = vpop.permute.xlu1 %3606 }
 0x2c7   : > { %v2924_v13 = vpack.c.bf16 %v2783_v31, %v2783_v31  ;;  %v2390_v62 = vadd.f32 %v2389_v46, %v2261_v34  ;;  %v3837_v27 = vmul.f32 %v7119_v39, %v3402_v55  ;;  %v3838_v11 = vmul.f32 %v7119_v39, %v3403_v35  ;;  %v8103_v46 = vld [vmem:[#allocation70_spill] sm:$0xff] }
 0x2c8   : > { %v5344_v17 = vpop.eup %5343  ;;  %v3024_v63 = vunpack.c.l.bf16 %v2925_v58  ;;  %v3025_v6 = vunpack.c.h.bf16 %v2925_v58  ;;  %v2510_v44 = vpack.c.bf16 %v2006_v37, %v8100_v19  ;;  %2044 = vmatmul.bf16.gmra.mxu1 %v8101_v23  ;;  %2431 = vmatmul.bf16.gmra.mxu0 %v8101_v23 }
 0x2c9   : > { %v5346_v3 = vpop.eup %5345  ;;  %v3023_v18 = vunpack.c.l.bf16 %v2924_v13  ;;  %v2509_v26 = vpack.c.bf16 %v2390_v62, %v2390_v62  ;;  %v3978_v33 = vadd.f32 %v3837_v27, %v3834_v20  ;;  %v3989_v28 = vadd.f32 %v3838_v11, %v3835_v0  ;;  %2173 = vmatmul.bf16.gmra.mxu2 %v8102_v9  ;;  %2302 = vmatmul.bf16.gmra.mxu3 %v8103_v46  ;;  %v3560_v62 = vld [vmem:[%s6954_s16 + $0x88] sm:$0xff] }
 0x2ca   : > { %v5348_v31 = vpop.eup %5347  ;;  %5349 = vtanh.f32 %v3024_v63  ;;  %v2640_v34 = vunpack.c.l.bf16 %v2510_v44  ;;  %v2641_v55 = vunpack.c.h.bf16 %v2510_v44  ;;  %v3307_v19 = vpack.c.bf16 %v5346_v3, %v5344_v17  ;;  %3681 = vperm.xlu2 %5332, %v3560_v62  }
 0x2cb   : > { %5351 = vtanh.f32 %v3023_v18  ;;  %v2639_v35 = vunpack.c.l.bf16 %v2509_v26  ;;  %v3306_v1 = vpack.c.bf16 %v5348_v31, %v5348_v31 }
 0x2cc   : > { %5353 = vtanh.f32 %v3025_v6  ;;  %v2787_v58 = vadd.f32 %v7088_v29, %v2640_v34  ;;  %v2788_v20 = vadd.f32 %v7090_v60, %v2641_v55  ;;  %v2134_v0 = vpop.f32.mrf.mxu2  ;;  %v2263_v37 = vpop.f32.mrf.mxu3  ;;  %v3405_v13 = vunpack.c.l.bf16 %v3307_v19 }
 0x2cd   : > { %v2786_v27 = vadd.f32 %v7101_v25, %v2639_v35  ;;  %v3404_v11 = vunpack.c.l.bf16 %v3306_v1  ;;  %v2264_v23 = vadd.f32 %v2263_v37, %v2134_v0  ;;  %v3406_v63 = vunpack.c.h.bf16 %v3307_v19  ;;  %v2007_v9 = vpop.f32.mrf.mxu1  ;;  %v2394_v44 = vpop.f32.mrf.mxu0  ;;  %v8104_v35 = vld [vmem:[#allocation74_spill] sm:$0xff] }
 0x2ce   : > { %v2927_v17 = vpack.c.bf16 %v2788_v20, %v2787_v58  ;;  %v3840_v3 = vmul.f32 %v3607_v15, %v3405_v13  ;;  %v2008_v6 = vadd.f32 %v2007_v9, %v6596_v47 }
 0x2cf   : > { %v2926_v18 = vpack.c.bf16 %v2786_v27, %v2786_v27  ;;  %v3839_v26 = vmul.f32 %v7119_v39, %v3404_v11  ;;  %v2393_v46 = vadd.f32 %v2392_v36, %v2264_v23  ;;  %v3841_v31 = vmul.f32 %v3607_v15, %v3406_v63  ;;  %v3612_v36 = vpop.permute.xlu1 %3611 }
 0x2d0   : > { %v5350_v34 = vpop.eup %5349  ;;  %v3027_v55 = vunpack.c.l.bf16 %v2927_v17  ;;  %v3028_v16 = vunpack.c.h.bf16 %v2927_v17  ;;  %v3979_v22 = vadd.f32 %v3978_v33, %v3840_v3  ;;  %v2512_v1 = vpack.c.bf16 %v2008_v6, %v8104_v35 }
 0x2d1   : > { %v5352_v0 = vpop.eup %5351  ;;  %v3026_v19 = vunpack.c.l.bf16 %v2926_v18  ;;  %v4000_v37 = vadd.f32 %v3839_v26, %v3836_v4  ;;  %v2511_v21 = vpack.c.bf16 %v2393_v46, %v2393_v46  ;;  %v3990_v62 = vadd.f32 %v3989_v28, %v3841_v31 }
 0x2d2   : > { %v5354_v58 = vpop.eup %5353  ;;  %5355 = vtanh.f32 %v3027_v55  ;;  %v3308_v20 = vpack.c.bf16 %v5352_v0, %v5352_v0  ;;  %v2643_v47 = vunpack.c.l.bf16 %v2512_v1  ;;  %v2644_v13 = vunpack.c.h.bf16 %v2512_v1 }
 0x2d3   : > { %5357 = vtanh.f32 %v3028_v16  ;;  %v2642_v39 = vunpack.c.l.bf16 %v2511_v21  ;;  %v3309_v27 = vpack.c.bf16 %v5354_v58, %v5350_v34 }
 0x2d4   : > { %v3407_v11 = vunpack.c.l.bf16 %v3308_v20  ;;  %v2790_v23 = vadd.f32 %v7088_v29, %v2643_v47  ;;  %v2791_v33 = vadd.f32 %v7090_v60, %v2644_v13  ;;  %v2136_v63 = vpop.f32.mrf.mxu2  ;;  %v2265_v9 = vpop.f32.mrf.mxu3  ;;  %5359 = vtanh.f32 %v3026_v19  ;;  %v8105_v20 = vld [vmem:[#allocation75_spill] sm:$0xff] }
 0x2d5   : > { %v2789_v4 = vadd.f32 %v7101_v25, %v2642_v39  ;;  %v2266_v28 = vadd.f32 %v2265_v9, %v2136_v63  ;;  %v3408_v17 = vunpack.c.l.bf16 %v3309_v27  ;;  %v3409_v3 = vunpack.c.h.bf16 %v3309_v27  ;;  %v2010_v6 = vpop.f32.mrf.mxu1  ;;  %v2397_v18 = vpop.f32.mrf.mxu0  ;;  %v3564_v47 = vld [vmem:[%s6954_s16 + $0xa8] sm:$0xff] }
 0x2d6   : > { %v3842_v16 = vmul.f32 %v3607_v15, %v3407_v11  ;;  %v2929_v21 = vpack.c.bf16 %v2791_v33, %v2790_v23  ;;  %v2011_v26 = vadd.f32 %v2010_v6, %v6607_v52  ;;  %v8106_v11 = vld [vmem:[#allocation29_spill] sm:$0xff]  ;;  %v3617_v23 = vpop.permute.xlu2 %3616  ;;  %3701 = vperm.xlu0 %5330, %v3564_v47  }
 0x2d7   : > { %v2928_v46 = vpack.c.bf16 %v2789_v4, %v2789_v4  ;;  %v2395_v31 = vadd.f32 %v2394_v44, %v2266_v28  ;;  %v3843_v34 = vmul.f32 %v3612_v36, %v3408_v17  ;;  %v3844_v55 = vmul.f32 %v3612_v36, %v3409_v3  ;;  %v8107_v44 = vld [vmem:[#allocation73_spill] sm:$0xff] }
 0x2d8   : > { %v5356_v35 = vpop.eup %5355  ;;  %v4001_v1 = vadd.f32 %v4000_v37, %v3842_v16  ;;  %v3030_v0 = vunpack.c.l.bf16 %v2929_v21  ;;  %v3031_v19 = vunpack.c.h.bf16 %v2929_v21  ;;  %v2514_v58 = vpack.c.bf16 %v2011_v26, %v6605_v50  ;;  %2049 = vmatmul.bf16.gmra.mxu1 %v8105_v20  ;;  %2436 = vmatmul.bf16.gmra.mxu0 %v8105_v20 }
 0x2d9   : > { %v5358_v13 = vpop.eup %5357  ;;  %v3029_v15 = vunpack.c.l.bf16 %v2928_v46  ;;  %v2513_v39 = vpack.c.bf16 %v2395_v31, %v2395_v31  ;;  %v3980_v27 = vadd.f32 %v3979_v22, %v3843_v34  ;;  %v3991_v52 = vadd.f32 %v3990_v62, %v3844_v55  ;;  %2178 = vmatmul.bf16.gmra.mxu2 %v8106_v11  ;;  %2307 = vmatmul.bf16.gmra.mxu3 %v8107_v44  ;;  %v8108_v11 = vld [vmem:[#allocation77_spill] sm:$0xff] }
 0x2da   : > { %v5360_v37 = vpop.eup %5359  ;;  %5361 = vtanh.f32 %v3030_v0  ;;  %v2646_v33 = vunpack.c.l.bf16 %v2514_v58  ;;  %v2647_v63 = vunpack.c.h.bf16 %v2514_v58  ;;  %v3311_v50 = vpack.c.bf16 %v5358_v13, %v5356_v35 }
 0x2db   : > { %5363 = vtanh.f32 %v3029_v15  ;;  %v2645_v9 = vunpack.c.l.bf16 %v2513_v39  ;;  %v3310_v4 = vpack.c.bf16 %v5360_v37, %v5360_v37  ;;  %v3565_v37 = vld [vmem:[%s6954_s16 + $0xb0] sm:$0xff] }
 0x2dc   : > { %5365 = vtanh.f32 %v3031_v19  ;;  %v2793_v28 = vadd.f32 %v7088_v29, %v2646_v33  ;;  %v2794_v22 = vadd.f32 %v7090_v60, %v2647_v63  ;;  %v2139_v62 = vpop.f32.mrf.mxu2  ;;  %v2268_v17 = vpop.f32.mrf.mxu3  ;;  %v3411_v3 = vunpack.c.l.bf16 %v3311_v50  ;;  %3706 = vperm.xlu1 %5331, %v3565_v37  }
 0x2dd   : > { %v2792_v6 = vadd.f32 %v7101_v25, %v2645_v9  ;;  %v3410_v16 = vunpack.c.l.bf16 %v3310_v4  ;;  %v2269_v21 = vadd.f32 %v2268_v17, %v2139_v62  ;;  %v3412_v26 = vunpack.c.h.bf16 %v3311_v50  ;;  %v2012_v46 = vpop.f32.mrf.mxu1  ;;  %v2399_v31 = vpop.f32.mrf.mxu0 }
 0x2de   : > { %v2931_v34 = vpack.c.bf16 %v2794_v22, %v2793_v28  ;;  %v3846_v55 = vmul.f32 %v3617_v23, %v3411_v3  ;;  %v2013_v35 = vadd.f32 %v2012_v46, %v6618_v57  ;;  %v7156_v62 = vpop.permute.xlu2 %3621 }
 0x2df   : > { %v2930_v0 = vpack.c.bf16 %v2792_v6, %v2792_v6  ;;  %v3845_v19 = vmul.f32 %v3612_v36, %v3410_v16  ;;  %v2398_v58 = vadd.f32 %v2397_v18, %v2269_v21  ;;  %v3847_v20 = vmul.f32 %v3617_v23, %v3412_v26 }
 0x2e0   : > { %v5362_v47 = vpop.eup %5361  ;;  %v3033_v13 = vunpack.c.l.bf16 %v2931_v34  ;;  %v3034_v15 = vunpack.c.h.bf16 %v2931_v34  ;;  %v3981_v39 = vadd.f32 %v3980_v27, %v3846_v55  ;;  %v2516_v44 = vpack.c.bf16 %v2013_v35, %v8108_v11 }
 0x2e1   : > { %v5364_v33 = vpop.eup %5363  ;;  %v3032_v63 = vunpack.c.l.bf16 %v2930_v0  ;;  %v4002_v50 = vadd.f32 %v4001_v1, %v3845_v19  ;;  %v2515_v9 = vpack.c.bf16 %v2398_v58, %v2398_v58  ;;  %v3992_v4 = vadd.f32 %v3991_v52, %v3847_v20  ;;  %v3567_v58 = vld [vmem:[%s6954_s16 + $0xc0] sm:$0xff] }
 0x2e2   : > { %v5366_v28 = vpop.eup %5365  ;;  %5367 = vtanh.f32 %v3033_v13  ;;  %v3312_v57 = vpack.c.bf16 %v5364_v33, %v5364_v33  ;;  %v2649_v22 = vunpack.c.l.bf16 %v2516_v44  ;;  %v2650_v36 = vunpack.c.h.bf16 %v2516_v44  ;;  %3716 = vperm.xlu0 %5330, %v3567_v58  }
 0x2e3   : > { %5369 = vtanh.f32 %v3034_v15  ;;  %v2648_v18 = vunpack.c.l.bf16 %v2515_v9  ;;  %v3313_v17 = vpack.c.bf16 %v5366_v28, %v5362_v47  ;;  %v8109_v9 = vld [vmem:[#allocation78_spill] sm:$0xff] }
 0x2e4   : > { %v3413_v27 = vunpack.c.l.bf16 %v3312_v57  ;;  %v2796_v3 = vadd.f32 %v7088_v29, %v2649_v22  ;;  %v2797_v6 = vadd.f32 %v7090_v60, %v2650_v36  ;;  %v2141_v1 = vpop.f32.mrf.mxu2  ;;  %v2270_v16 = vpop.f32.mrf.mxu3  ;;  %5371 = vtanh.f32 %v3032_v63  ;;  %v8110_v22 = vld [vmem:[#allocation10_spill] sm:$0xff]  ;;  %v8111_v36 = vld [vmem:[#allocation76_spill] sm:$0xff] }
 0x2e5   : > { %v2795_v52 = vadd.f32 %v7101_v25, %v2648_v18  ;;  %v2271_v21 = vadd.f32 %v2270_v16, %v2141_v1  ;;  %v3414_v26 = vunpack.c.l.bf16 %v3313_v17  ;;  %v3415_v46 = vunpack.c.h.bf16 %v3313_v17  ;;  %v2015_v34 = vpop.f32.mrf.mxu1  ;;  %v2402_v55 = vpop.f32.mrf.mxu0  ;;  %v3563_v18 = vld [vmem:[%s6954_s16 + $0xa0] sm:$0xff] }
 0x2e6   : > { %v3848_v35 = vmul.f32 %v3617_v23, %v3413_v27  ;;  %v2933_v0 = vpack.c.bf16 %v2797_v6, %v2796_v3  ;;  %v2016_v19 = vadd.f32 %v2015_v34, %v6629_v61  ;;  %3696 = vperm.xlu2 %5332, %v3563_v18   ;;  %v3627_v1 = vpop.permute.xlu0 %3626 }
 0x2e7   : > { %v2932_v20 = vpack.c.bf16 %v2795_v52, %v2795_v52  ;;  %v2400_v47 = vadd.f32 %v2399_v31, %v2271_v21  ;;  %v3849_v13 = vmul.f32 %v7156_v62, %v3414_v26  ;;  %v3850_v15 = vmul.f32 %v7156_v62, %v3415_v46 }
 0x2e8   : > { %v5368_v11 = vpop.eup %5367  ;;  %v4003_v44 = vadd.f32 %v4002_v50, %v3848_v35  ;;  %v3036_v37 = vunpack.c.l.bf16 %v2933_v0  ;;  %v3037_v33 = vunpack.c.h.bf16 %v2933_v0  ;;  %v2518_v63 = vpack.c.bf16 %v2016_v19, %v6627_v54  ;;  %2054 = vmatmul.bf16.gmra.mxu1 %v8109_v9  ;;  %2441 = vmatmul.bf16.gmra.mxu0 %v8109_v9 }
 0x2e9   : > { %v5370_v61 = vpop.eup %5369  ;;  %v3035_v23 = vunpack.c.l.bf16 %v2932_v20  ;;  %v2517_v28 = vpack.c.bf16 %v2400_v47, %v2400_v47  ;;  %v3982_v31 = vadd.f32 %v3981_v39, %v3849_v13  ;;  %v3993_v57 = vadd.f32 %v3992_v4, %v3850_v15  ;;  %2183 = vmatmul.bf16.gmra.mxu2 %v8110_v22  ;;  %2312 = vmatmul.bf16.gmra.mxu3 %v8111_v36  ;;  %v3570_v13 = vld [vmem:[%s6954_s16 + $0xd8] sm:$0xff] }
 0x2ea   : > { %v5372_v17 = vpop.eup %5371  ;;  %5373 = vtanh.f32 %v3036_v37  ;;  %v2652_v50 = vunpack.c.l.bf16 %v2518_v63  ;;  %v2653_v27 = vunpack.c.h.bf16 %v2518_v63  ;;  %v3315_v3 = vpack.c.bf16 %v5370_v61, %v5368_v11  ;;  %3731 = vperm.xlu0 %5330, %v3570_v13  }
 0x2eb   : > { %5375 = vtanh.f32 %v3035_v23  ;;  %v2651_v54 = vunpack.c.l.bf16 %v2517_v28  ;;  %v3314_v6 = vpack.c.bf16 %v5372_v17, %v5372_v17  ;;  %v3983_v16 = vrot.slane %v3982_v31, 4 }
 0x2ec   : > { %v3994_v52 = vrot.slane %v3993_v57, 4  ;;  %v2799_v39 = vadd.f32 %v7088_v29, %v2652_v50  ;;  %v2800_v4 = vadd.f32 %v7090_v60, %v2653_v27  ;;  %v2144_v21 = vpop.f32.mrf.mxu2  ;;  %v2273_v26 = vpop.f32.mrf.mxu3  ;;  %5377 = vtanh.f32 %v3037_v33 }
 0x2ed   : > { %v2798_v46 = vadd.f32 %v7101_v25, %v2651_v54  ;;  %v3416_v34 = vunpack.c.l.bf16 %v3314_v6  ;;  %v2274_v35 = vadd.f32 %v2273_v26, %v2144_v21  ;;  %v2017_v0 = vpop.f32.mrf.mxu1  ;;  %v2404_v19 = vpop.f32.mrf.mxu0  ;;  %v3417_v20 = vunpack.c.l.bf16 %v3315_v3 }
 0x2ee   : > { %v2935_v58 = vpack.c.bf16 %v2800_v4, %v2799_v39  ;;  %v3418_v47 = vunpack.c.h.bf16 %v3315_v3  ;;  %v3984_v9 = vadd.f32 %v3983_v16, %v3982_v31  ;;  %v7176_v61 = vadd.f32 %v3994_v52, %v3993_v57 }
 0x2ef   : > { %v2934_v15 = vpack.c.bf16 %v2798_v46, %v2798_v46  ;;  %v3851_v11 = vmul.f32 %v7156_v62, %v3416_v34  ;;  %v2403_v37 = vadd.f32 %v2402_v55, %v2274_v35  ;;  %v3852_v33 = vmul.f32 %v3627_v1, %v3417_v20  ;;  %v3573_v34 = vld [vmem:[%s6954_s16 + $0xf0] sm:$0xff] }
 0x2f0   : > { %v5374_v63 = vpop.eup %5373  ;;  %v3039_v36 = vunpack.c.l.bf16 %v2935_v58  ;;  %v3040_v17 = vunpack.c.h.bf16 %v2935_v58  ;;  %v3853_v27 = vmul.f32 %v3627_v1, %v3418_v47  ;;  %v3985_v6 = vrot.slane %v3984_v9, 2  ;;  %v3632_v58 = vpop.permute.xlu1 %3631 }
 0x2f1   : > { %v5376_v23 = vpop.eup %5375  ;;  %v3038_v28 = vunpack.c.l.bf16 %v2934_v15  ;;  %v4004_v22 = vadd.f32 %v4003_v44, %v3851_v11  ;;  %v2519_v18 = vpack.c.bf16 %v2403_v37, %v2403_v37  ;;  %v2018_v55 = vadd.f32 %v2017_v0, %v6640_v8  ;;  %v8112_v37 = vld [vmem:[#allocation80_spill] sm:$0xff] }
 0x2f2   : > { %v3316_v50 = vpack.c.bf16 %v5376_v23, %v5376_v23  ;;  %v5378_v3 = vpop.eup %5377  ;;  %v3996_v57 = vrot.slane %v7176_v61, 2  ;;  %3746 = vperm.xlu0 %5330, %v3573_v34   ;;  %v8113_v23 = vld [vmem:[#allocation81_spill] sm:$0xff] }
 0x2f3   : > { %v2654_v54 = vunpack.c.l.bf16 %v2519_v18  ;;  %5379 = vtanh.f32 %v3038_v28  ;;  %v2520_v26 = vpack.c.bf16 %v2018_v55, %v6638_v48  ;;  %v3317_v46 = vpack.c.bf16 %v5378_v3, %v5374_v63 }
 0x2f4   : > { %v3419_v62 = vunpack.c.l.bf16 %v3316_v50  ;;  %v2146_v39 = vpop.f32.mrf.mxu2  ;;  %v2275_v31 = vpop.f32.mrf.mxu3  ;;  %5381 = vtanh.f32 %v3039_v36  ;;  %v4005_v35 = vrot.slane %v4004_v22, 4  ;;  %v8115_v36 = vld [vmem:[#allocation79_spill] sm:$0xff]  ;;  %v7199_v34 = vadd.f32 %v3996_v57, %v7176_v61 }
 0x2f5   : > { %v2801_v44 = vadd.f32 %v7101_v25, %v2654_v54  ;;  %v2276_v16 = vadd.f32 %v2275_v31, %v2146_v39  ;;  %v2020_v52 = vpop.f32.mrf.mxu1  ;;  %v2407_v4 = vpop.f32.mrf.mxu0  ;;  %5383 = vtanh.f32 %v3040_v17  ;;  %v2655_v47 = vunpack.c.l.bf16 %v2520_v26 }
 0x2f6   : > { %v7181_v21 = vmul.f32 %v3627_v1, %v3419_v62  ;;  %v2021_v20 = vadd.f32 %v2020_v52, %v6663_v43  ;;  %v2656_v13 = vunpack.c.h.bf16 %v2520_v26  ;;  %v3420_v15 = vunpack.c.l.bf16 %v3317_v46  ;;  %v3568_v43 = vld [vmem:[%s6954_s16 + $0xc8] sm:$0xff] }
 0x2f7   : > { %v2936_v8 = vpack.c.bf16 %v2801_v44, %v2801_v44  ;;  %v2405_v0 = vadd.f32 %v2404_v19, %v2276_v16  ;;  %v3421_v11 = vunpack.c.h.bf16 %v3317_v46  ;;  %v7188_v1 = vadd.f32 %v3985_v6, %v3984_v9  ;;  %v8114_v19 = vld [vmem:[#allocation14_spill] sm:$0xff]  ;;  %3721 = vperm.xlu1 %5331, %v3568_v43  }
 0x2f8   : > { %2059 = vmatmul.bf16.gmra.mxu1 %v8112_v37  ;;  %2446 = vmatmul.bf16.gmra.mxu0 %v8112_v37  ;;  %v2522_v28 = vpack.c.bf16 %v2021_v20, %v8113_v23  ;;  %v2802_v17 = vadd.f32 %v7088_v29, %v2655_v47  ;;  %v2803_v50 = vadd.f32 %v7090_v60, %v2656_v13  ;;  %v3576_v37 = vld [vmem:[%s6954_s16 + $0x108] sm:$0xff] }
 0x2f9   : > { %v3041_v48 = vunpack.c.l.bf16 %v2936_v8  ;;  %v2521_v63 = vpack.c.bf16 %v2405_v0, %v2405_v0  ;;  %2188 = vmatmul.bf16.gmra.mxu2 %v8114_v19  ;;  %2317 = vmatmul.bf16.gmra.mxu3 %v8115_v36  ;;  %v5380_v18 = vpop.eup %5379  ;;  %v3855_v3 = vmul.f32 %v3632_v58, %v3420_v15  ;;  %v3856_v54 = vmul.f32 %v3632_v58, %v3421_v11 }
 0x2fa   : > { %v5382_v62 = vpop.eup %5381  ;;  %v7196_v9 = vadd.f32 %v4005_v35, %v4004_v22  ;;  %v3318_v55 = vpack.c.bf16 %v5380_v18, %v5380_v18  ;;  %v2937_v31 = vpack.c.bf16 %v2803_v50, %v2802_v17  ;;  %v2658_v52 = vunpack.c.l.bf16 %v2522_v28  ;;  %3761 = vperm.xlu0 %5330, %v3576_v37   ;;  %v3637_v18 = vpop.permute.xlu2 %3636  ;;  %v3566_v17 = vld [vmem:[%s6954_s16 + $0xb8] sm:$0xff]  ;;  %v3579_v37 = vld [vmem:[%s6954_s16 + $0x120] sm:$0xff] }
 0x2fb   : > { %5385 = vtanh.f32 %v3041_v48  ;;  %v2657_v6 = vunpack.c.l.bf16 %v2521_v63  ;;  %v5384_v39 = vpop.eup %5383  ;;  %v4011_v44 = vadd.f32 %v3855_v3, %v3852_v33  ;;  %v4022_v16 = vadd.f32 %v3856_v54, %v3853_v27  ;;  %3711 = vperm.xlu2 %5332, %v3566_v17   ;;  %v8117_v17 = vld [vmem:[#allocation84_spill] sm:$0xff] }
 0x2fc   : > { %v2149_v26 = vpop.f32.mrf.mxu2  ;;  %v2278_v46 = vpop.f32.mrf.mxu3  ;;  %v3422_v0 = vunpack.c.l.bf16 %v3318_v55  ;;  %v2659_v20 = vunpack.c.h.bf16 %v2522_v28  ;;  %v3042_v47 = vunpack.c.l.bf16 %v2937_v31  ;;  %v3043_v13 = vunpack.c.h.bf16 %v2937_v31  ;;  %v8116_v55 = vld [vmem:[#allocation83_spill] sm:$0xff] }
 0x2fd   : > { %v2804_v8 = vadd.f32 %v7101_v25, %v2657_v6  ;;  %v2022_v22 = vpop.f32.mrf.mxu1  ;;  %v2409_v35 = vpop.f32.mrf.mxu0  ;;  %v2805_v15 = vadd.f32 %v7088_v29, %v2658_v52  ;;  %v2279_v11 = vadd.f32 %v2278_v46, %v2149_v26  ;;  %v3319_v63 = vpack.c.bf16 %v5384_v39, %v5382_v62 }
 0x2fe   : > { %v3857_v27 = vmul.f32 %v3632_v58, %v3422_v0  ;;  %v2806_v48 = vadd.f32 %v7090_v60, %v2659_v20  ;;  %v4007_v61 = vrot.slane %v7196_v9, 2  ;;  %5387 = vtanh.f32 %v3042_v47 }
 0x2ff   : > { %v2938_v33 = vpack.c.bf16 %v2804_v8, %v2804_v8  ;;  %v2408_v57 = vadd.f32 %v2407_v4, %v2279_v11  ;;  %v2023_v23 = vadd.f32 %v2022_v22, %v6686_v32  ;;  %5389 = vtanh.f32 %v3043_v13 }
 0x300   : > { %v4033_v36 = vadd.f32 %v3857_v27, %v7181_v21  ;;  %v2939_v43 = vpack.c.bf16 %v2806_v48, %v2805_v15  ;;  %v3423_v3 = vunpack.c.l.bf16 %v3319_v63  ;;  %v3424_v54 = vunpack.c.h.bf16 %v3319_v63 }
 0x301   : > { %v5386_v28 = vpop.eup %5385  ;;  %v3044_v19 = vunpack.c.l.bf16 %v2938_v33  ;;  %v2523_v50 = vpack.c.bf16 %v2408_v57, %v2408_v57  ;;  %v2524_v39 = vpack.c.bf16 %v2023_v23, %v8116_v55 }
 0x302   : > { %v3320_v58 = vpack.c.bf16 %v5386_v28, %v5386_v28  ;;  %v3045_v62 = vunpack.c.l.bf16 %v2939_v43  ;;  %v3046_v6 = vunpack.c.h.bf16 %v2939_v43  ;;  %v3858_v31 = vmul.f32 %v3637_v18, %v3423_v3  ;;  %3776 = vperm.xlu0 %5330, %v3579_v37  }
 0x303   : > { %5391 = vtanh.f32 %v3044_v19  ;;  %v2660_v4 = vunpack.c.l.bf16 %v2523_v50  ;;  %v3859_v52 = vmul.f32 %v3637_v18, %v3424_v54  ;;  %v2661_v46 = vunpack.c.l.bf16 %v2524_v39  ;;  %v3571_v50 = vld [vmem:[%s6954_s16 + $0xe0] sm:$0xff]  ;;  %v3642_v54 = vpop.permute.xlu0 %3641 }
 0x304   : > { %v3425_v32 = vunpack.c.l.bf16 %v3320_v58  ;;  %v2151_v26 = vpop.f32.mrf.mxu2  ;;  %v2280_v21 = vpop.f32.mrf.mxu3  ;;  %5393 = vtanh.f32 %v3045_v62  ;;  %v2662_v8 = vunpack.c.h.bf16 %v2524_v39  ;;  %v4012_v11 = vadd.f32 %v4011_v44, %v3858_v31  ;;  %v8118_v62 = vld [vmem:[#allocation18_spill] sm:$0xff]  ;;  %3736 = vperm.xlu1 %5331, %v3571_v50  }
 0x305   : > { %v2281_v0 = vadd.f32 %v2280_v21, %v2151_v26  ;;  %v2025_v20 = vpop.f32.mrf.mxu1  ;;  %v7210_v22 = vpop.f32.mrf.mxu0  ;;  %5395 = vtanh.f32 %v3046_v6  ;;  %v2807_v13 = vadd.f32 %v7101_v25, %v2660_v4  ;;  %v4023_v27 = vadd.f32 %v4022_v16, %v3859_v52 }
 0x306   : > { %v5388_v47 = vpop.eup %5387  ;;  %v3860_v15 = vmul.f32 %v3637_v18, %v3425_v32  ;;  %v2808_v48 = vadd.f32 %v7088_v29, %v2661_v46  ;;  %v2809_v63 = vadd.f32 %v7090_v60, %v2662_v8  ;;  %v2026_v43 = vadd.f32 %v2025_v20, %v6697_v7 }
 0x307   : > { %v5390_v33 = vpop.eup %5389  ;;  %v2410_v57 = vadd.f32 %v2409_v35, %v2281_v0  ;;  %v2940_v23 = vpack.c.bf16 %v2807_v13, %v2807_v13  ;;  %v3987_v44 = vrot.slane %v7188_v1, 1  ;;  %v7221_v18 = vadd.f32 %v4007_v61, %v7196_v9  ;;  %v8119_v35 = vld [vmem:[#allocation82_spill] sm:$0xff] }
 0x308   : > { %v4034_v28 = vadd.f32 %v4033_v36, %v3860_v15  ;;  %v3321_v19 = vpack.c.bf16 %v5390_v33, %v5388_v47  ;;  %2064 = vmatmul.bf16.gmra.mxu1 %v8117_v17  ;;  %v2941_v16 = vpack.c.bf16 %v2809_v63, %v2808_v48  ;;  %2451 = vmatmul.bf16.gmra.mxu0 %v8117_v17 }
 0x309   : > { %v5392_v58 = vpop.eup %5391  ;;  %v2525_v3 = vpack.c.bf16 %v2410_v57, %v2410_v57  ;;  %2193 = vmatmul.bf16.gmra.mxu2 %v8118_v62  ;;  %2322 = vmatmul.bf16.gmra.mxu3 %v8119_v35  ;;  %v3047_v36 = vunpack.c.l.bf16 %v2940_v23  ;;  %v2526_v9 = vpack.c.bf16 %v2026_v43, %v6695_v51 }
 0x30a   : > { %v3322_v6 = vpack.c.bf16 %v5392_v58, %v5392_v58  ;;  %v3426_v55 = vunpack.c.l.bf16 %v3321_v19  ;;  %v3427_v7 = vunpack.c.h.bf16 %v3321_v19  ;;  %v5394_v39 = vpop.eup %5393  ;;  %v3048_v4 = vunpack.c.l.bf16 %v2941_v16 }
 0x30b   : > { %v3049_v32 = vunpack.c.h.bf16 %v2941_v16  ;;  %v2663_v31 = vunpack.c.l.bf16 %v2525_v3  ;;  %v5396_v61 = vpop.eup %5395  ;;  %5397 = vtanh.f32 %v3047_v36  ;;  %v2664_v20 = vunpack.c.l.bf16 %v2526_v9  ;;  %v3647_v3 = vpop.permute.xlu1 %3646 }
 0x30c   : > { %v3428_v52 = vunpack.c.l.bf16 %v3322_v6  ;;  %v3861_v26 = vmul.f32 %v3642_v54, %v3426_v55  ;;  %v3862_v21 = vmul.f32 %v3642_v54, %v3427_v7  ;;  %v2154_v46 = vpop.f32.mrf.mxu2  ;;  %v2283_v8 = vpop.f32.mrf.mxu3  ;;  %5399 = vtanh.f32 %v3048_v4  ;;  %v8120_v55 = vld [vmem:[#allocation86_spill] sm:$0xff]  ;;  %v3574_v4 = vld [vmem:[%s6954_s16 + $0xf8] sm:$0xff] }
 0x30d   : > { %v2810_v0 = vadd.f32 %v7101_v25, %v2663_v31  ;;  %v2665_v47 = vunpack.c.h.bf16 %v2526_v9  ;;  %v2027_v13 = vpop.f32.mrf.mxu1  ;;  %v2414_v15 = vpop.f32.mrf.mxu0  ;;  %5401 = vtanh.f32 %v3049_v32  ;;  %v2811_v63 = vadd.f32 %v7088_v29, %v2664_v20  ;;  %3751 = vperm.xlu1 %5331, %v3574_v4  }
 0x30e   : > { %v3863_v37 = vmul.f32 %v3642_v54, %v3428_v52  ;;  %v4013_v33 = vadd.f32 %v4012_v11, %v3861_v26  ;;  %v4024_v48 = vadd.f32 %v4023_v27, %v3862_v21  ;;  %v2284_v23 = vadd.f32 %v2283_v8, %v2154_v46  ;;  %v3586_v54 = vld [vmem:[%s6954_s16 + $0x158] sm:$0xff] }
 0x30f   : > { %v2942_v51 = vpack.c.bf16 %v2810_v0, %v2810_v0  ;;  %v2812_v57 = vadd.f32 %v7090_v60, %v2665_v47  ;;  %v3998_v19 = vrot.slane %v7199_v34, 1  ;;  %v3323_v17 = vpack.c.bf16 %v5396_v61, %v5394_v39  ;;  %3811 = vperm.xlu0 %5330, %v3586_v54  }
 0x310   : > { %v4035_v43 = vadd.f32 %v4034_v28, %v3863_v37  ;;  %v2028_v50 = vadd.f32 %v2027_v13, %v6708_v14  ;;  %v7233_v58 = vadd.f32 %v3987_v44, %v7188_v1  ;;  %v4009_v16 = vrot.slane %v7221_v18, 1 }
 0x311   : > { %v2943_v11 = vpack.c.bf16 %v2812_v57, %v2811_v63  ;;  %v2413_v27 = vadd.f32 %v7210_v22, %v2284_v23  ;;  %v5398_v62 = vpop.eup %5397  ;;  %v3050_v35 = vunpack.c.l.bf16 %v2942_v51  ;;  %v3429_v36 = vunpack.c.l.bf16 %v3323_v17 }
 0x312   : > { %v3430_v6 = vunpack.c.h.bf16 %v3323_v17  ;;  %v2528_v28 = vpack.c.bf16 %v2028_v50, %v8120_v55  ;;  %v5400_v7 = vpop.eup %5399  ;;  %v3324_v44 = vpack.c.bf16 %v5398_v62, %v5398_v62  ;;  %v7246_v17 = vadd.f32 %v3998_v19, %v7199_v34 }
 0x313   : > { %v3051_v14 = vunpack.c.l.bf16 %v2943_v11  ;;  %v3052_v39 = vunpack.c.h.bf16 %v2943_v11  ;;  %v2527_v1 = vpack.c.bf16 %v2413_v27, %v2413_v27  ;;  %v5402_v32 = vpop.eup %5401  ;;  %v3864_v31 = vmul.f32 %v3647_v3, %v3429_v36  ;;  %v8121_v27 = vld [vmem:[#allocation87_spill] sm:$0xff]  ;;  %v3652_v36 = vpop.permute.xlu2 %3651 }
 0x314   : > { %v3865_v9 = vmul.f32 %v3647_v3, %v3430_v6  ;;  %v2667_v61 = vunpack.c.l.bf16 %v2528_v28  ;;  %v2668_v22 = vunpack.c.h.bf16 %v2528_v28  ;;  %v2156_v52 = vpop.f32.mrf.mxu2  ;;  %v2285_v26 = vpop.f32.mrf.mxu3  ;;  %v3431_v46 = vunpack.c.l.bf16 %v3324_v44  ;;  %v8123_v6 = vld [vmem:[#allocation85_spill] sm:$0xff] }
 0x315   : > { %5403 = vtanh.f32 %v3051_v14  ;;  %v2666_v21 = vunpack.c.l.bf16 %v2527_v1  ;;  %v2286_v8 = vadd.f32 %v2285_v26, %v2156_v52  ;;  %v2030_v0 = vpop.f32.mrf.mxu1  ;;  %v7240_v20 = vpop.f32.mrf.mxu0  ;;  %v4014_v47 = vadd.f32 %v4013_v33, %v3864_v31  ;;  %v3569_v31 = vld [vmem:[%s6954_s16 + $0xd0] sm:$0xff] }
 0x316   : > { %5405 = vtanh.f32 %v3052_v39  ;;  %v4025_v13 = vadd.f32 %v4024_v48, %v3865_v9  ;;  %v2814_v37 = vadd.f32 %v7088_v29, %v2667_v61  ;;  %v3866_v63 = vmul.f32 %v3647_v3, %v3431_v46  ;;  %v8122_v3 = vld [vmem:[#allocation22_spill] sm:$0xff]  ;;  %v3577_v39 = vld [vmem:[%s6954_s16 + $0x110] sm:$0xff]  ;;  %3726 = vperm.xlu2 %5332, %v3569_v31  }
 0x317   : > { %v2813_v51 = vadd.f32 %v7101_v25, %v2666_v21  ;;  %v2815_v57 = vadd.f32 %v7090_v60, %v2668_v22  ;;  %v2415_v23 = vadd.f32 %v2414_v15, %v2286_v8  ;;  %5407 = vtanh.f32 %v3050_v35  ;;  %v3582_v15 = vld [vmem:[%s6954_s16 + $0x138] sm:$0xff]  ;;  %3766 = vperm.xlu1 %5331, %v3577_v39  }
 0x318   : > { %v3325_v50 = vpack.c.bf16 %v5402_v32, %v5400_v7  ;;  %v2031_v11 = vadd.f32 %v2030_v0, %v6719_v30  ;;  %2069 = vmatmul.bf16.gmra.mxu1 %v8121_v27  ;;  %v7250_v48 = vadd.f32 %v4035_v43, %v3866_v63  ;;  %v7255_v34 = vadd.f32 %v4009_v16, %v7221_v18 }
 0x319   : > { %v2944_v33 = vpack.c.bf16 %v2813_v51, %v2813_v51  ;;  %v2945_v54 = vpack.c.bf16 %v2815_v57, %v2814_v37  ;;  %v2529_v62 = vpack.c.bf16 %v2415_v23, %v2415_v23  ;;  %2198 = vmatmul.bf16.gmra.mxu2 %v8122_v3  ;;  %2327 = vmatmul.bf16.gmra.mxu3 %v8123_v6  ;;  %v3657_v57 = vpop.permute.xlu0 %3656 }
 0x31a   : > { %v3432_v19 = vunpack.c.l.bf16 %v3325_v50  ;;  %v3433_v35 = vunpack.c.h.bf16 %v3325_v50  ;;  %v2530_v30 = vpack.c.bf16 %v2031_v11, %v6717_v56  ;;  %2456 = vmatmul.bf16.gmra.mxu0 %v8121_v27  ;;  %3791 = vperm.xlu0 %5330, %v3582_v15  }
 0x31b   : > { %v5404_v43 = vpop.eup %5403  ;;  %v3053_v55 = vunpack.c.l.bf16 %v2944_v33  ;;  %v3054_v28 = vunpack.c.l.bf16 %v2945_v54  ;;  %v3055_v7 = vunpack.c.h.bf16 %v2945_v54  ;;  %v2669_v14 = vunpack.c.l.bf16 %v2529_v62  ;;  %v3589_v62 = vld [vmem:[%s6954_s16 + $0x170] sm:$0xff] }
 0x31c   : > { %v5406_v1 = vpop.eup %5405  ;;  %v3867_v18 = vmul.f32 %v3652_v36, %v3432_v19  ;;  %v3868_v16 = vmul.f32 %v3652_v36, %v3433_v35  ;;  %v2670_v44 = vunpack.c.l.bf16 %v2530_v30  ;;  %v2671_v4 = vunpack.c.h.bf16 %v2530_v30  ;;  %v2159_v32 = vpop.f32.mrf.mxu2 }
 0x31d   : > { %v2288_v56 = vpop.f32.mrf.mxu3  ;;  %5409 = vtanh.f32 %v3053_v55  ;;  %v2816_v9 = vadd.f32 %v7101_v25, %v2669_v14  ;;  %v3327_v22 = vpack.c.bf16 %v5406_v1, %v5404_v43  ;;  %v2032_v52 = vpop.f32.mrf.mxu1 }
 0x31e   : > { %v2289_v61 = vadd.f32 %v2288_v56, %v2159_v32  ;;  %v2419_v26 = vpop.f32.mrf.mxu0  ;;  %v5408_v21 = vpop.eup %5407  ;;  %5411 = vtanh.f32 %v3054_v28  ;;  %v4015_v46 = vadd.f32 %v4014_v47, %v3867_v18  ;;  %v4026_v8 = vadd.f32 %v4025_v13, %v3868_v16  ;;  %v3580_v28 = vld [vmem:[%s6954_s16 + $0x128] sm:$0xff] }
 0x31f   : > { %v2817_v0 = vadd.f32 %v7088_v29, %v2670_v44  ;;  %5413 = vtanh.f32 %v3055_v7  ;;  %v2946_v37 = vpack.c.bf16 %v2816_v9, %v2816_v9  ;;  %v3326_v51 = vpack.c.bf16 %v5408_v21, %v5408_v21  ;;  %3781 = vperm.xlu1 %5331, %v3580_v28  }
 0x320   : > { %v2818_v63 = vadd.f32 %v7090_v60, %v2671_v4  ;;  %v4016_v23 = vrot.slane %v4015_v46, 4  ;;  %v4027_v50 = vrot.slane %v4026_v8, 4  ;;  %v2418_v11 = vadd.f32 %v7240_v20, %v2289_v61  ;;  %v3572_v4 = vld [vmem:[%s6954_s16 + $0xe8] sm:$0xff] }
 0x321   : > { %v3435_v27 = vunpack.c.l.bf16 %v3327_v22  ;;  %v3056_v47 = vunpack.c.l.bf16 %v2946_v37  ;;  %v3434_v13 = vunpack.c.l.bf16 %v3326_v51  ;;  %v3436_v54 = vunpack.c.h.bf16 %v3327_v22  ;;  %3741 = vperm.xlu2 %5332, %v3572_v4  }
 0x322   : > { %v2947_v33 = vpack.c.bf16 %v2818_v63, %v2817_v0  ;;  %v4017_v3 = vadd.f32 %v4016_v23, %v4015_v46  ;;  %v4028_v15 = vadd.f32 %v4027_v50, %v4026_v8  ;;  %v2531_v19 = vpack.c.bf16 %v2418_v11, %v2418_v11  ;;  %3826 = vperm.xlu0 %5330, %v3589_v62  }
 0x323   : > { %v7273_v35 = vmul.f32 %v3657_v57, %v3435_v27  ;;  %v5410_v30 = vpop.eup %5409  ;;  %v3869_v6 = vmul.f32 %v3652_v36, %v3434_v13  ;;  %v7275_v20 = vmul.f32 %v3657_v57, %v3436_v54  ;;  %v2033_v36 = vadd.f32 %v2032_v52, %v6730_v42  ;;  %v8124_v27 = vld [vmem:[#allocation26_spill] sm:$0xff] }
 0x324   : > { %v3057_v43 = vunpack.c.l.bf16 %v2947_v33  ;;  %v3058_v55 = vunpack.c.h.bf16 %v2947_v33  ;;  %v5412_v7 = vpop.eup %5411  ;;  %v4018_v14 = vrot.slane %v4017_v3, 2  ;;  %v4029_v39 = vrot.slane %v4028_v15, 2  ;;  %v2161_v16 = vpop.f32.mrf.mxu2  ;;  %v4309_v13 = vld [vmem:[%s372_s10] sm:$0xff] }
 0x325   : > { %v2672_v1 = vunpack.c.l.bf16 %v2531_v19  ;;  %v3328_v18 = vpack.c.bf16 %v5410_v30, %v5410_v30  ;;  %v2290_v44 = vpop.f32.mrf.mxu3  ;;  %v5414_v32 = vpop.eup %5413  ;;  %v4037_v56 = vadd.f32 %v7250_v48, %v3869_v6  ;;  %v2532_v48 = vpack.c.bf16 %v2033_v36, %v6728_v24  ;;  %v3581_v6 = vld [vmem:[%s6954_s16 + $0x130] sm:$0xff]  ;;  %v8126_v36 = vld [vmem:[#allocation90_spill] sm:$0xff] }
 0x326   : > { %5415 = vtanh.f32 %v3057_v43  ;;  %v2291_v31 = vadd.f32 %v2290_v44, %v2161_v16  ;;  %v2035_v9 = vpop.f32.mrf.mxu1  ;;  %v7282_v61 = vpop.f32.mrf.mxu0  ;;  %v4019_v22 = vadd.f32 %v4018_v14, %v4017_v3  ;;  %v4030_v21 = vadd.f32 %v4029_v39, %v4028_v15 }
 0x327   : > { %5417 = vtanh.f32 %v3058_v55  ;;  %v2819_v46 = vadd.f32 %v7101_v25, %v2672_v1  ;;  %v4038_v8 = vrot.slane %v4037_v56, 4  ;;  %v3437_v0 = vunpack.c.l.bf16 %v3328_v18  ;;  %v3662_v19 = vpop.permute.xlu1 %3661  ;;  %3786 = vperm.xlu1 %5331, %v3581_v6   ;;  %v3575_v1 = vld [vmem:[%s6954_s16 + $0x100] sm:$0xff] }
 0x328   : > { %v2420_v37 = vadd.f32 %v2419_v26, %v2291_v31  ;;  %v4020_v42 = vrot.slane %v4019_v22, 1  ;;  %v4031_v52 = vrot.slane %v4030_v21, 1  ;;  %5419 = vtanh.f32 %v3056_v47  ;;  %2074 = vmatmul.bf16.gmra.mxu1 %v6732_v5  ;;  %v8125_v26 = vld [vmem:[#allocation88_spill] sm:$0xff] }
 0x329   : > { %v2948_v51 = vpack.c.bf16 %v2819_v46, %v2819_v46  ;;  %v4039_v63 = vadd.f32 %v4038_v8, %v4037_v56  ;;  %v7290_v23 = vmul.f32 %v3657_v57, %v3437_v0  ;;  %v2673_v50 = vunpack.c.l.bf16 %v2532_v48  ;;  %2203 = vmatmul.bf16.gmra.mxu2 %v8124_v27  ;;  %2332 = vmatmul.bf16.gmra.mxu3 %v8125_v26 }
 0x32a   : > { %v2674_v11 = vunpack.c.h.bf16 %v2532_v48  ;;  %v4021_v33 = vadd.f32 %v4020_v42, %v4019_v22  ;;  %v4032_v54 = vadd.f32 %v4031_v52, %v4030_v21  ;;  %v2533_v24 = vpack.c.bf16 %v2420_v37, %v2420_v37  ;;  %2461 = vmatmul.bf16.gmra.mxu0 %v6732_v5  ;;  %4312 = vperm.xlu0 %5330, %v4309_v13   ;;  %v8127_v52 = vld [vmem:[#allocation89_spill] sm:$0xff] }
 0x32b   : > { %v3059_v62 = vunpack.c.l.bf16 %v2948_v51  ;;  %v4040_v3 = vrot.slane %v4039_v63, 2  ;;  %v2820_v57 = vadd.f32 %v7088_v29, %v2673_v50  ;;  %v3329_v30 = vpack.c.bf16 %v5414_v32, %v5412_v7  ;;  %3756 = vperm.xlu2 %5332, %v3575_v1  }
 0x32c   : > { %v5416_v47 = vpop.eup %5415  ;;  %v2821_v15 = vadd.f32 %v7090_v60, %v2674_v11  ;;  %v7300_v55 = vsel %vm4266_vm0, %v4021_v33, %v7233_v58  ;;  %v7304_v28 = vsel %vm4266_vm0, %v4032_v54, %v7246_v17  ;;  %v2675_v5 = vunpack.c.l.bf16 %v2533_v24  ;;  %v2164_v14 = vpop.f32.mrf.mxu2 }
 0x32d   : > { %v5418_v43 = vpop.eup %5417  ;;  %5421 = vtanh.f32 %v3059_v62  ;;  %v2293_v39 = vpop.f32.mrf.mxu3  ;;  %v4041_v18 = vadd.f32 %v4040_v3, %v4039_v63  ;;  %v3438_v7 = vunpack.c.l.bf16 %v3329_v30  ;;  %v3439_v44 = vunpack.c.h.bf16 %v3329_v30  ;;  %v3588_v3 = vld [vmem:[%s6954_s16 + $0x168] sm:$0xff] }
 0x32e   : > { %v2949_v16 = vpack.c.bf16 %v2821_v15, %v2820_v57  ;;  %v2037_v4 = vpop.f32.mrf.mxu1  ;;  %v7307_v32 = vpop.f32.mrf.mxu0  ;;  %v2822_v56 = vadd.f32 %v7101_v25, %v2675_v5  ;;  %v2036_v17 = vadd.f32 %v2035_v9, %v8126_v36  ;;  %v2294_v31 = vadd.f32 %v2293_v39, %v2164_v14  ;;  %v3578_v5 = vld [vmem:[%s6954_s16 + $0x118] sm:$0xff] }
 0x32f   : > { %v5420_v58 = vpop.eup %5419  ;;  %v3331_v22 = vpack.c.bf16 %v5418_v43, %v5416_v47  ;;  %v4042_v21 = vrot.slane %v4041_v18, 1  ;;  %v3873_v37 = vmul.f32 %v3662_v19, %v3438_v7  ;;  %v3874_v42 = vmul.f32 %v3662_v19, %v3439_v44  ;;  %v3667_v47 = vpop.permute.xlu2 %3666  ;;  %3821 = vperm.xlu1 %5331, %v3588_v3   ;;  %v3585_v3 = vld [vmem:[%s6954_s16 + $0x150] sm:$0xff] }
 0x330   : > { %v3060_v46 = vunpack.c.l.bf16 %v2949_v16  ;;  %v3061_v8 = vunpack.c.h.bf16 %v2949_v16  ;;  %v3330_v0 = vpack.c.bf16 %v5420_v58, %v5420_v58  ;;  %v2950_v48 = vpack.c.bf16 %v2822_v56, %v2822_v56  ;;  %v8128_v56 = vld [vmem:[#allocation92_spill] sm:$0xff] }
 0x331   : > { %v2534_v51 = vpack.c.bf16 %v2036_v17, %v8127_v52  ;;  %v4043_v63 = vadd.f32 %v4042_v21, %v4041_v18  ;;  %v2423_v11 = vadd.f32 %v7282_v61, %v2294_v31  ;;  %v4044_v13 = vadd.f32 %v3873_v37, %v7273_v35  ;;  %v8130_v37 = vld [vmem:[#allocation30_spill] sm:$0xff] }
 0x332   : > { %5423 = vtanh.f32 %v3060_v46  ;;  %v3440_v50 = vunpack.c.l.bf16 %v3330_v0  ;;  %v3062_v9 = vunpack.c.l.bf16 %v2950_v48  ;;  %v4055_v33 = vadd.f32 %v3874_v42, %v7275_v20 }
 0x333   : > { %v5422_v27 = vpop.eup %5421  ;;  %5425 = vtanh.f32 %v3061_v8  ;;  %v7317_v54 = vsel %vm4266_vm0, %v4043_v63, %v7255_v34  ;;  %v2676_v24 = vunpack.c.l.bf16 %v2534_v51  ;;  %v2677_v26 = vunpack.c.h.bf16 %v2534_v51  ;;  %3771 = vperm.xlu2 %5332, %v3578_v5  }
 0x334   : > { %v3875_v62 = vmul.f32 %v3662_v19, %v3440_v50  ;;  %v2535_v57 = vpack.c.bf16 %v2423_v11, %v2423_v11  ;;  %v3332_v15 = vpack.c.bf16 %v5422_v27, %v5422_v27  ;;  %v3441_v61 = vunpack.c.l.bf16 %v3331_v22  ;;  %v2166_v6 = vpop.f32.mrf.mxu2  ;;  %v8131_v50 = vld [vmem:[#allocation91_spill] sm:$0xff] }
 0x335   : > { %v3442_v30 = vunpack.c.h.bf16 %v3331_v22  ;;  %v2295_v43 = vpop.f32.mrf.mxu3  ;;  %v2823_v20 = vadd.f32 %v7088_v29, %v2676_v24  ;;  %v2824_v34 = vadd.f32 %v7090_v60, %v2677_v26  ;;  %v2038_v19 = vadd.f32 %v2037_v4, %v6776_v12  ;;  %v8129_v4 = vld [vmem:[#allocation93_spill] sm:$0xff] }
 0x336   : > { %v4066_v35 = vadd.f32 %v3875_v62, %v7290_v23  ;;  %v2040_v14 = vpop.f32.mrf.mxu1  ;;  %v7325_v39 = vpop.f32.mrf.mxu0  ;;  %v2678_v1 = vunpack.c.l.bf16 %v2535_v57  ;;  %v3443_v18 = vunpack.c.l.bf16 %v3332_v15  ;;  %v3876_v16 = vmul.f32 %v3667_v47, %v3441_v61 }
 0x337   : > { %v3877_v7 = vmul.f32 %v3667_v47, %v3442_v30  ;;  %v2951_v58 = vpack.c.bf16 %v2824_v34, %v2823_v20  ;;  %v2536_v36 = vpack.c.bf16 %v2038_v19, %v8128_v56  ;;  %v2296_v17 = vadd.f32 %v2295_v43, %v2166_v6 }
 0x338   : > { %v5424_v44 = vpop.eup %5423  ;;  %5427 = vtanh.f32 %v3062_v9  ;;  %v2825_v31 = vadd.f32 %v7101_v25, %v2678_v1  ;;  %v3878_v22 = vmul.f32 %v3667_v47, %v3443_v18  ;;  %v4045_v21 = vadd.f32 %v4044_v13, %v3876_v16  ;;  %2079 = vmatmul.bf16.gmra.mxu1 %v8129_v4  ;;  %v3672_v9 = vpop.permute.xlu0 %3671 }
 0x339   : > { %v5426_v23 = vpop.eup %5425  ;;  %v4056_v12 = vadd.f32 %v4055_v33, %v3877_v7  ;;  %v3063_v46 = vunpack.c.l.bf16 %v2951_v58  ;;  %v3064_v8 = vunpack.c.h.bf16 %v2951_v58  ;;  %v2679_v0 = vunpack.c.l.bf16 %v2536_v36  ;;  %2208 = vmatmul.bf16.gmra.mxu2 %v8130_v37  ;;  %2337 = vmatmul.bf16.gmra.mxu3 %v8131_v50  ;;  %v3584_v33 = vld [vmem:[%s6954_s16 + $0x148] sm:$0xff] }
 0x33a   : > { %v2680_v48 = vunpack.c.h.bf16 %v2536_v36  ;;  %v2952_v42 = vpack.c.bf16 %v2825_v31, %v2825_v31  ;;  %v4067_v52 = vadd.f32 %v4066_v35, %v3878_v22  ;;  %v2425_v51 = vadd.f32 %v7307_v32, %v2296_v17  ;;  %2466 = vmatmul.bf16.gmra.mxu0 %v8129_v4  ;;  %3801 = vperm.xlu1 %5331, %v3584_v33  }
 0x33b   : > { %v3333_v63 = vpack.c.bf16 %v5426_v23, %v5424_v44  ;;  %5429 = vtanh.f32 %v3063_v46  ;;  %v2826_v11 = vadd.f32 %v7088_v29, %v2679_v0  ;;  %v2041_v13 = vadd.f32 %v2040_v14, %v6787_v53  ;;  %3806 = vperm.xlu2 %5332, %v3585_v3   ;;  %v3677_v46 = vpop.permute.xlu1 %3676 }
 0x33c   : > { %v2827_v27 = vadd.f32 %v7090_v60, %v2680_v48  ;;  %5431 = vtanh.f32 %v3064_v8  ;;  %v3065_v62 = vunpack.c.l.bf16 %v2952_v42  ;;  %v2537_v24 = vpack.c.bf16 %v2425_v51, %v2425_v51  ;;  %v2169_v32 = vpop.f32.mrf.mxu2 }
 0x33d   : > { %v3444_v26 = vunpack.c.l.bf16 %v3333_v63  ;;  %v2298_v47 = vpop.f32.mrf.mxu3  ;;  %v3445_v61 = vunpack.c.h.bf16 %v3333_v63  ;;  %v2538_v30 = vpack.c.bf16 %v2041_v13, %v6785_v45 }
 0x33e   : > { %v5428_v57 = vpop.eup %5427  ;;  %v2953_v15 = vpack.c.bf16 %v2827_v27, %v2826_v11  ;;  %v2299_v6 = vadd.f32 %v2298_v47, %v2169_v32  ;;  %v2042_v43 = vpop.f32.mrf.mxu1  ;;  %5433 = vtanh.f32 %v3065_v62  ;;  %v2681_v53 = vunpack.c.l.bf16 %v2537_v24  ;;  %v8132_v62 = vld [vmem:[#allocation95_spill] sm:$0xff]  ;;  %v3587_v32 = vld [vmem:[%s6954_s16 + $0x160] sm:$0xff] }
 0x33f   : > { %v2429_v5 = vpop.f32.mrf.mxu0  ;;  %v3334_v35 = vpack.c.bf16 %v5428_v57, %v5428_v57  ;;  %v3879_v20 = vmul.f32 %v3672_v9, %v3444_v26  ;;  %v3880_v14 = vmul.f32 %v3672_v9, %v3445_v61  ;;  %v2682_v1 = vunpack.c.l.bf16 %v2538_v30 }
 0x340   : > { %v3066_v34 = vunpack.c.l.bf16 %v2953_v15  ;;  %v3067_v19 = vunpack.c.h.bf16 %v2953_v15  ;;  %v2828_v18 = vadd.f32 %v7101_v25, %v2681_v53  ;;  %v2683_v44 = vunpack.c.h.bf16 %v2538_v30 }
 0x341   : > { %v3446_v16 = vunpack.c.l.bf16 %v3334_v35  ;;  %v4046_v7 = vadd.f32 %v4045_v21, %v3879_v20  ;;  %v5430_v58 = vpop.eup %5429  ;;  %v4057_v45 = vadd.f32 %v4056_v12, %v3880_v14  ;;  %v2829_v56 = vadd.f32 %v7088_v29, %v2682_v1 }
 0x342   : > { %5435 = vtanh.f32 %v3066_v34  ;;  %v2428_v36 = vadd.f32 %v7325_v39, %v2299_v6  ;;  %v5432_v17 = vpop.eup %5431  ;;  %v2954_v23 = vpack.c.bf16 %v2828_v18, %v2828_v18  ;;  %v2830_v22 = vadd.f32 %v7090_v60, %v2683_v44  ;;  %v8134_v34 = vld [vmem:[#allocation11_spill] sm:$0xff] }
 0x343   : > { %5437 = vtanh.f32 %v3067_v19  ;;  %v3881_v31 = vmul.f32 %v3672_v9, %v3446_v16  ;;  %v3335_v8 = vpack.c.bf16 %v5432_v17, %v5430_v58  ;;  %v2043_v0 = vadd.f32 %v2042_v43, %v6798_v59  ;;  %3816 = vperm.xlu2 %5332, %v3587_v32   ;;  %v8133_v43 = vld [vmem:[#allocation96_spill] sm:$0xff]  ;;  %v8135_v16 = vld [vmem:[#allocation94_spill] sm:$0xff] }
 0x344   : > { %v2539_v4 = vpack.c.bf16 %v2428_v36, %v2428_v36  ;;  %v5434_v21 = vpop.eup %5433  ;;  %v3068_v48 = vunpack.c.l.bf16 %v2954_v23  ;;  %v2955_v12 = vpack.c.bf16 %v2830_v22, %v2829_v56  ;;  %v2171_v42 = vpop.f32.mrf.mxu2 }
 0x345   : > { %v4068_v37 = vadd.f32 %v4067_v52, %v3881_v31  ;;  %v2300_v51 = vpop.f32.mrf.mxu3  ;;  %v3336_v39 = vpack.c.bf16 %v5434_v21, %v5434_v21  ;;  %v3447_v50 = vunpack.c.l.bf16 %v3335_v8  ;;  %v3448_v11 = vunpack.c.h.bf16 %v3335_v8 }
 0x346   : > { %v2684_v63 = vunpack.c.l.bf16 %v2539_v4  ;;  %v2045_v27 = vpop.f32.mrf.mxu1  ;;  %v3069_v13 = vunpack.c.l.bf16 %v2955_v12  ;;  %v3070_v33 = vunpack.c.h.bf16 %v2955_v12  ;;  %v2540_v24 = vpack.c.bf16 %v2043_v0, %v8132_v62 }
 0x347   : > { %v2432_v9 = vpop.f32.mrf.mxu0  ;;  %v2301_v26 = vadd.f32 %v2300_v51, %v2171_v42  ;;  %v3449_v3 = vunpack.c.l.bf16 %v3336_v39  ;;  %v3882_v52 = vmul.f32 %v3677_v46, %v3447_v50  ;;  %v3883_v57 = vmul.f32 %v3677_v46, %v3448_v11  ;;  %v3583_v42 = vld [vmem:[%s6954_s16 + $0x140] sm:$0xff] }
 0x348   : > { %v5436_v59 = vpop.eup %5435  ;;  %v2831_v47 = vadd.f32 %v7101_v25, %v2684_v63  ;;  %5439 = vtanh.f32 %v3069_v13  ;;  %v2685_v61 = vunpack.c.l.bf16 %v2540_v24  ;;  %v2686_v30 = vunpack.c.h.bf16 %v2540_v24  ;;  %2084 = vmatmul.bf16.gmra.mxu1 %v8133_v43 }
 0x349   : > { %v5438_v15 = vpop.eup %5437  ;;  %v2430_v6 = vadd.f32 %v2429_v5, %v2301_v26  ;;  %5441 = vtanh.f32 %v3070_v33  ;;  %v3884_v35 = vmul.f32 %v3677_v46, %v3449_v3  ;;  %v4047_v20 = vadd.f32 %v4046_v7, %v3882_v52  ;;  %2213 = vmatmul.bf16.gmra.mxu2 %v8134_v34  ;;  %2342 = vmatmul.bf16.gmra.mxu3 %v8135_v16  ;;  %v3682_v5 = vpop.permute.xlu2 %3681 }
 0x34a   : > { %v2956_v53 = vpack.c.bf16 %v2831_v47, %v2831_v47  ;;  %v4058_v19 = vadd.f32 %v4057_v45, %v3883_v57  ;;  %v2832_v14 = vadd.f32 %v7088_v29, %v2685_v61  ;;  %v2833_v1 = vadd.f32 %v7090_v60, %v2686_v30  ;;  %2471 = vmatmul.bf16.gmra.mxu0 %v8133_v43  ;;  %v3687_v57 = vpop.permute.xlu0 %3686 }
 0x34b   : > { %v2541_v18 = vpack.c.bf16 %v2430_v6, %v2430_v6  ;;  %v7353_v58 = vadd.f32 %v4068_v37, %v3884_v35  ;;  %5443 = vtanh.f32 %v3068_v48  ;;  %v3337_v56 = vpack.c.bf16 %v5438_v15, %v5436_v59  ;;  %3796 = vperm.xlu2 %5332, %v3583_v42  }
 0x34c   : > { %v3071_v44 = vunpack.c.l.bf16 %v2956_v53  ;;  %v2957_v36 = vpack.c.bf16 %v2833_v1, %v2832_v14  ;;  %v2046_v45 = vadd.f32 %v2045_v27, %v6809_v40  ;;  %v2174_v17 = vpop.f32.mrf.mxu2 }
 0x34d   : > { %v2687_v7 = vunpack.c.l.bf16 %v2541_v18  ;;  %v2303_v23 = vpop.f32.mrf.mxu3  ;;  %v3450_v31 = vunpack.c.l.bf16 %v3337_v56  ;;  %v3451_v22 = vunpack.c.h.bf16 %v3337_v56 }
 0x34e   : > { %5445 = vtanh.f32 %v3071_v44  ;;  %v2304_v4 = vadd.f32 %v2303_v23, %v2174_v17  ;;  %v2047_v46 = vpop.f32.mrf.mxu1  ;;  %v5440_v0 = vpop.eup %5439  ;;  %v3072_v21 = vunpack.c.l.bf16 %v2957_v36  ;;  %v3073_v48 = vunpack.c.h.bf16 %v2957_v36 }
 0x34f   : > { %v7357_v8 = vpop.f32.mrf.mxu0  ;;  %v2834_v37 = vadd.f32 %v7101_v25, %v2687_v7  ;;  %v2542_v12 = vpack.c.bf16 %v2046_v45, %v6807_v41  ;;  %v5442_v51 = vpop.eup %5441  ;;  %v3885_v63 = vmul.f32 %v3682_v5, %v3450_v31  ;;  %v3886_v40 = vmul.f32 %v3682_v5, %v3451_v22  ;;  %v3590_v45 = vld [vmem:[%s6954_s16 + $0x178] sm:$0xff]  ;;  %s4353_s16 = sshll.u32 %s4349_s14, 4  ;;  %s4354_s16 = int_to_ptr.hbm [resolvable:$true] %s4353_s16 }
 0x350   : > { %v2433_v39 = vadd.f32 %v2432_v9, %v2304_v4  ;;  %v2048_v50 = vadd.f32 %v2047_v46, %v6820_v10  ;;  %5447 = vtanh.f32 %v3072_v21  ;;  %v3339_v15 = vpack.c.bf16 %v5442_v51, %v5440_v0  ;;  %s5667_s24 = sshra.s32 %s4354_s16, 4  ;;  %s5668_s24 = int_to_ptr.hbm [resolvable:$true] %s5667_s24 }
 0x351   : > { %v2958_v11 = vpack.c.bf16 %v2834_v37, %v2834_v37  ;;  %v2688_v27 = vunpack.c.l.bf16 %v2542_v12  ;;  %v2689_v13 = vunpack.c.h.bf16 %v2542_v12  ;;  %v5444_v33 = vpop.eup %5443  ;;  %5449 = vtanh.f32 %v3073_v48  ;;  %v8136_v37 = vld [vmem:[#allocation15_spill] sm:$0xff]  ;;  %s5669_s30 = scalar_lea.hbm %s5668_s24, 24  ;;  %p5674_p10 = scmp.lt.s32.totalorder %s5668_s24, %s7806_s5 }
 0x352   : > { %v4048_v62 = vadd.f32 %v4047_v20, %v3885_v63  ;;  %v4059_v24 = vadd.f32 %v4058_v19, %v3886_v40  ;;  %v2543_v26 = vpack.c.bf16 %v2433_v39, %v2433_v39  ;;  %v3338_v59 = vpack.c.bf16 %v5444_v33, %v5444_v33  ;;  %v8137_v40 = vld [vmem:[#allocation97_spill] sm:$0xff]  ;;  %p5670_p6 = scmp.ne.s32.totalorder %s5668_s24, %s5669_s30  ;;  %p5675_p13 = scmp.lt.s32.totalorder %s5673_s29, %s5669_s30 }
 0x353   : > { %v3074_v32 = vunpack.c.l.bf16 %v2958_v11  ;;  %v2835_v41 = vadd.f32 %v7088_v29, %v2688_v27  ;;  %v2836_v47 = vadd.f32 %v7090_v60, %v2689_v13  ;;  %v2544_v43 = vpack.c.bf16 %v2048_v50, %v6818_v49  ;;  %3831 = vperm.xlu2 %5332, %v3590_v45  }
 0x354   : > { %v5446_v3 = vpop.eup %5445  ;;  %v4049_v9 = vrot.slane %v4048_v62, 4  ;;  %v4060_v52 = vrot.slane %v4059_v24, 4  ;;  %v2690_v10 = vunpack.c.l.bf16 %v2543_v26  ;;  %v3452_v61 = vunpack.c.l.bf16 %v3338_v59  ;;  %v2176_v53 = vpop.f32.mrf.mxu2  ;;  %p5671_p7 = pnand %p5670_p6, %p5821_p9  ;;  %p5676_p0 = por %p5675_p13, %p5674_p10 }
 0x355   : > { %v2959_v30 = vpack.c.bf16 %v2836_v47, %v2835_v41  ;;  %v3340_v6 = vpack.c.bf16 %v5446_v3, %v5446_v3  ;;  %v2305_v35 = vpop.f32.mrf.mxu3  ;;  %v3453_v14 = vunpack.c.l.bf16 %v3339_v15  ;;  %v3454_v7 = vunpack.c.h.bf16 %v3339_v15 }
 0x356   : > { %v4050_v20 = vadd.f32 %v4049_v9, %v4048_v62  ;;  %v4061_v34 = vadd.f32 %v4060_v52, %v4059_v24  ;;  %v2837_v19 = vadd.f32 %v7101_v25, %v2690_v10  ;;  %v2050_v1 = vpop.f32.mrf.mxu1  ;;  %v5448_v16 = vpop.eup %5447  ;;  %v3887_v44 = vmul.f32 %v3682_v5, %v3452_v61  ;;  %p5672_p8 = pneg %p5671_p7 }
 0x357   : > { %v7367_v18 = vpop.f32.mrf.mxu0  ;;  %v3075_v56 = vunpack.c.l.bf16 %v2959_v30  ;;  %v3076_v36 = vunpack.c.h.bf16 %v2959_v30  ;;  %v5450_v17 = vpop.eup %5449  ;;  %v3455_v22 = vunpack.c.l.bf16 %v3340_v6  ;;  %v3888_v46 = vmul.f32 %v3687_v57, %v3453_v14 }
 0x358   : > { %v4051_v23 = vrot.slane %v4050_v20, 2  ;;  %v4062_v31 = vrot.slane %v4061_v34, 2  ;;  %v2960_v49 = vpack.c.bf16 %v2837_v19, %v2837_v19  ;;  %v4070_v4 = vadd.f32 %v7353_v58, %v3887_v44  ;;  %2089 = vmatmul.bf16.gmra.mxu1 %v6822_v38  ;;  %p5677_p1 = pnand %p5676_p0, %p5672_p8 }
 0x359   : > { %5451 = vtanh.f32 %v3075_v56  ;;  %v3889_v0 = vmul.f32 %v3687_v57, %v3454_v7  ;;  %2218 = vmatmul.bf16.gmra.mxu2 %v8136_v37  ;;  %v7373_v42 = vmul.f32 %v3687_v57, %v3455_v22  ;;  %v2691_v51 = vunpack.c.l.bf16 %v2544_v43  ;;  %2347 = vmatmul.bf16.gmra.mxu3 %v8137_v40  ;;  %v8138_v57 = vld [vmem:[#allocation99_spill] sm:$0xff] }
 0x35a   : > { %v4052_v21 = vadd.f32 %v4051_v23, %v4050_v20  ;;  %v4063_v48 = vadd.f32 %v4062_v31, %v4061_v34  ;;  %5453 = vtanh.f32 %v3076_v36  ;;  %v3077_v5 = vunpack.c.l.bf16 %v2960_v49  ;;  %2476 = vmatmul.bf16.gmra.mxu0 %v6822_v38  ;;  %v3692_v38 = vpop.permute.xlu1 %3691  ;;  %v3697_v31 = vpop.permute.xlu2 %3696 }
 0x35b   : > { %v4071_v12 = vrot.slane %v4070_v4, 4  ;;  %v2692_v63 = vunpack.c.h.bf16 %v2544_v43  ;;  %v2306_v50 = vadd.f32 %v2305_v35, %v2176_v53  ;;  %v2838_v27 = vadd.f32 %v7088_v29, %v2691_v51 }
 0x35c   : > { %v4053_v39 = vrot.slane %v4052_v21, 1  ;;  %v4064_v58 = vrot.slane %v4063_v48, 1  ;;  %5455 = vtanh.f32 %v3077_v5  ;;  %v2179_v33 = vpop.f32.mrf.mxu2  ;;  %v3341_v41 = vpack.c.bf16 %v5450_v17, %v5448_v16 }
 0x35d   : > { %v4072_v11 = vadd.f32 %v4071_v12, %v4070_v4  ;;  %v2839_v13 = vadd.f32 %v7090_v60, %v2692_v63  ;;  %5457 = vtanh.f32 %v3074_v32  ;;  %v2308_v62 = vpop.f32.mrf.mxu3  ;;  %v2435_v59 = vadd.f32 %v7357_v8, %v2306_v50 }
 0x35e   : > { %v4054_v24 = vadd.f32 %v4053_v39, %v4052_v21  ;;  %v4065_v26 = vadd.f32 %v4064_v58, %v4063_v48  ;;  %v2052_v47 = vpop.f32.mrf.mxu1  ;;  %v2051_v15 = vadd.f32 %v2050_v1, %v8138_v57  ;;  %v2309_v61 = vadd.f32 %v2308_v62, %v2179_v33  ;;  %v8139_v1 = vld [vmem:[#allocation98_spill] sm:$0xff] }
 0x35f   : > { %v7380_v3 = vpop.f32.mrf.mxu0  ;;  %v5452_v9 = vpop.eup %5451  ;;  %v4073_v52 = vrot.slane %v4072_v11, 2  ;;  %v2961_v10 = vpack.c.bf16 %v2839_v13, %v2838_v27  ;;  %v2545_v8 = vpack.c.bf16 %v2435_v59, %v2435_v59  ;;  %v3456_v43 = vunpack.c.l.bf16 %v3341_v41 }
 0x360   : > { %v5454_v30 = vpop.eup %5453  ;;  %v7385_v32 = vsel %vm4268_vm1, %v4054_v24, %v7300_v55  ;;  %v7389_v6 = vsel %vm4268_vm1, %v4065_v26, %v7304_v28  ;;  %v3457_v34 = vunpack.c.h.bf16 %v3341_v41  ;;  %v2546_v44 = vpack.c.bf16 %v2051_v15, %v8139_v1  ;;  %v8140_v41 = vld [vmem:[#allocation102_spill] sm:$0xff]  ;;  %v8141_v15 = vld [vmem:[#allocation19_spill] sm:$0xff] }
 0x361   : > { %v4074_v53 = vadd.f32 %v4073_v52, %v4072_v11  ;;  %v3078_v35 = vunpack.c.l.bf16 %v2961_v10  ;;  %v3079_v20 = vunpack.c.h.bf16 %v2961_v10  ;;  %v2693_v14 = vunpack.c.l.bf16 %v2545_v8 }
 0x362   : > { %v5456_v19 = vpop.eup %5455  ;;  %v3891_v16 = vmul.f32 %v3692_v38, %v3456_v43  ;;  %v2438_v56 = vadd.f32 %v7367_v18, %v2309_v61  ;;  %v3892_v7 = vmul.f32 %v3692_v38, %v3457_v34  ;;  %v3343_v45 = vpack.c.bf16 %v5454_v30, %v5452_v9  ;;  %v8142_v43 = vld [vmem:[#allocation100_spill] sm:$0xff]  ;;  %v7410_v34 = vpop.permute.xlu0 %3701 }
 0x363   : > { %v5458_v36 = vpop.eup %5457  ;;  %v4075_v55 = vrot.slane %v4074_v53, 1  ;;  %5459 = vtanh.f32 %v3078_v35  ;;  %v2840_v28 = vadd.f32 %v7101_v25, %v2693_v14  ;;  %v2694_v4 = vunpack.c.l.bf16 %v2546_v44  ;;  %v8144_v14 = vld [vmem:[#allocation104_spill] sm:$0xff] }
 0x364   : > { %5461 = vtanh.f32 %v3079_v20  ;;  %v3342_v17 = vpack.c.bf16 %v5458_v36, %v5458_v36  ;;  %v4077_v23 = vadd.f32 %v3891_v16, %v3888_v46  ;;  %v4088_v22 = vadd.f32 %v3892_v7, %v3889_v0  ;;  %v2181_v48 = vpop.f32.mrf.mxu2 }
 0x365   : > { %v4076_v49 = vadd.f32 %v4075_v55, %v4074_v53  ;;  %v2695_v21 = vunpack.c.h.bf16 %v2546_v44  ;;  %v2310_v5 = vpop.f32.mrf.mxu3  ;;  %v2962_v37 = vpack.c.bf16 %v2840_v28, %v2840_v28  ;;  %v2547_v18 = vpack.c.bf16 %v2438_v56, %v2438_v56 }
 0x366   : > { %v3458_v12 = vunpack.c.l.bf16 %v3342_v17  ;;  %v3344_v51 = vpack.c.bf16 %v5456_v19, %v5456_v19  ;;  %v2055_v63 = vpop.f32.mrf.mxu1  ;;  %v2841_v46 = vadd.f32 %v7088_v29, %v2694_v4  ;;  %v3459_v0 = vunpack.c.l.bf16 %v3343_v45 }
 0x367   : > { %v7394_v40 = vpop.f32.mrf.mxu0  ;;  %v7398_v39 = vsel %vm4268_vm1, %v4076_v49, %v7317_v54  ;;  %v2842_v58 = vadd.f32 %v7090_v60, %v2695_v21  ;;  %v3080_v50 = vunpack.c.l.bf16 %v2962_v37  ;;  %v2696_v27 = vunpack.c.l.bf16 %v2547_v18  ;;  %v8145_v49 = vld [vmem:[#allocation103_spill] sm:$0xff] }
 0x368   : > { %v3893_v11 = vmul.f32 %v3692_v38, %v3458_v12  ;;  %v3460_v13 = vunpack.c.h.bf16 %v3343_v45  ;;  %v3461_v24 = vunpack.c.l.bf16 %v3344_v51  ;;  %v3894_v26 = vmul.f32 %v3697_v31, %v3459_v0  ;;  %2094 = vmatmul.bf16.gmra.mxu1 %v8140_v41  ;;  %v8146_v51 = vld [vmem:[#allocation107_spill] sm:$0xff] }
 0x369   : > { %v5460_v33 = vpop.eup %5459  ;;  %v2963_v62 = vpack.c.bf16 %v2842_v58, %v2841_v46  ;;  %v2053_v59 = vadd.f32 %v2052_v47, %v6866_v2  ;;  %v2843_v52 = vadd.f32 %v7101_v25, %v2696_v27  ;;  %v2311_v57 = vadd.f32 %v2310_v5, %v2181_v48  ;;  %2223 = vmatmul.bf16.gmra.mxu2 %v8141_v15  ;;  %v8143_v2 = vld [vmem:[#allocation101_spill] sm:$0xff] }
 0x36a   : > { %v5462_v9 = vpop.eup %5461  ;;  %v4099_v54 = vadd.f32 %v3893_v11, %v7373_v42  ;;  %v3895_v10 = vmul.f32 %v3697_v31, %v3460_v13  ;;  %v3896_v30 = vmul.f32 %v3697_v31, %v3461_v24  ;;  %v4078_v8 = vadd.f32 %v4077_v23, %v3894_v26  ;;  %2352 = vmatmul.bf16.gmra.mxu3 %v8142_v43 }
 0x36b   : > { %v3081_v38 = vunpack.c.l.bf16 %v2963_v62  ;;  %v3082_v61 = vunpack.c.h.bf16 %v2963_v62  ;;  %v2964_v53 = vpack.c.bf16 %v2843_v52, %v2843_v52  ;;  %v2548_v47 = vpack.c.bf16 %v2053_v59, %v8143_v2  ;;  %2481 = vmatmul.bf16.gmra.mxu0 %v8140_v41 }
 0x36c   : > { %v4089_v35 = vadd.f32 %v4088_v22, %v3895_v10  ;;  %v2440_v20 = vadd.f32 %v7380_v3, %v2311_v57  ;;  %v7413_v42 = vadd.f32 %v4099_v54, %v3896_v30  ;;  %v3345_v19 = vpack.c.bf16 %v5462_v9, %v5460_v33  ;;  %v2184_v1 = vpop.f32.mrf.mxu2  ;;  %v8147_v54 = vld [vmem:[#allocation106_spill] sm:$0xff] }
 0x36d   : > { %5463 = vtanh.f32 %v3081_v38  ;;  %v2056_v16 = vadd.f32 %v2055_v63, %v8144_v14  ;;  %v2313_v44 = vpop.f32.mrf.mxu3  ;;  %v3083_v56 = vunpack.c.l.bf16 %v2964_v53  ;;  %v2697_v36 = vunpack.c.l.bf16 %v2548_v47 }
 0x36e   : > { %5465 = vtanh.f32 %v3082_v61  ;;  %v2698_v55 = vunpack.c.h.bf16 %v2548_v47  ;;  %v2057_v7 = vpop.f32.mrf.mxu1  ;;  %v2549_v3 = vpack.c.bf16 %v2440_v20, %v2440_v20  ;;  %v3462_v28 = vunpack.c.l.bf16 %v3345_v19 }
 0x36f   : > { %v7416_v45 = vpop.f32.mrf.mxu0  ;;  %5467 = vtanh.f32 %v3080_v50  ;;  %v3463_v17 = vunpack.c.h.bf16 %v3345_v19  ;;  %v2844_v23 = vadd.f32 %v7088_v29, %v2697_v36  ;;  %v2550_v22 = vpack.c.bf16 %v2056_v16, %v8145_v49  ;;  %v8148_v36 = vld [vmem:[#allocation108_spill] sm:$0xff]  ;;  %v8150_v49 = vld [vmem:[#allocation105_spill] sm:$0xff] }
 0x370   : > { %5469 = vtanh.f32 %v3083_v56  ;;  %v2845_v31 = vadd.f32 %v7090_v60, %v2698_v55  ;;  %v2699_v4 = vunpack.c.l.bf16 %v2549_v3  ;;  %v3897_v21 = vmul.f32 %v7410_v34, %v3462_v28  ;;  %v8149_v28 = vld [vmem:[#allocation23_spill] sm:$0xff] }
 0x371   : > { %v3898_v48 = vmul.f32 %v7410_v34, %v3463_v17  ;;  %v2314_v5 = vadd.f32 %v2313_v44, %v2184_v1  ;;  %v2700_v12 = vunpack.c.l.bf16 %v2550_v22  ;;  %v2701_v18 = vunpack.c.h.bf16 %v2550_v22 }
 0x372   : > { %v2965_v37 = vpack.c.bf16 %v2845_v31, %v2844_v23  ;;  %v2058_v63 = vadd.f32 %v2057_v7, %v8146_v51  ;;  %v2846_v58 = vadd.f32 %v7101_v25, %v2699_v4  ;;  %v4079_v0 = vadd.f32 %v4078_v8, %v3897_v21 }
 0x373   : > { %v5464_v46 = vpop.eup %5463  ;;  %v4090_v50 = vadd.f32 %v4089_v35, %v3898_v48  ;;  %v2443_v11 = vadd.f32 %v7394_v40, %v2314_v5  ;;  %v2847_v62 = vadd.f32 %v7088_v29, %v2700_v12  ;;  %v2848_v24 = vadd.f32 %v7090_v60, %v2701_v18  ;;  %v3707_v35 = vpop.permute.xlu1 %3706 }
 0x374   : > { %v5466_v27 = vpop.eup %5465  ;;  %v3084_v13 = vunpack.c.l.bf16 %v2965_v37  ;;  %v3085_v33 = vunpack.c.h.bf16 %v2965_v37  ;;  %v2966_v59 = vpack.c.bf16 %v2846_v58, %v2846_v58  ;;  %v2552_v52 = vpack.c.bf16 %v2058_v63, %v8147_v54  ;;  %v2186_v10 = vpop.f32.mrf.mxu2 }
 0x375   : > { %v5468_v26 = vpop.eup %5467  ;;  %v2551_v41 = vpack.c.bf16 %v2443_v11, %v2443_v11  ;;  %v3347_v9 = vpack.c.bf16 %v5466_v27, %v5464_v46  ;;  %v2315_v57 = vpop.f32.mrf.mxu3  ;;  %v2967_v61 = vpack.c.bf16 %v2848_v24, %v2847_v62 }
 0x376   : > { %v5470_v15 = vpop.eup %5469  ;;  %5471 = vtanh.f32 %v3084_v13  ;;  %v3346_v38 = vpack.c.bf16 %v5468_v26, %v5468_v26  ;;  %v2316_v40 = vadd.f32 %v2315_v57, %v2186_v10  ;;  %v2060_v30 = vpop.f32.mrf.mxu1  ;;  %v3086_v43 = vunpack.c.l.bf16 %v2966_v59 }
 0x377   : > { %v2447_v8 = vpop.f32.mrf.mxu0  ;;  %5473 = vtanh.f32 %v3085_v33  ;;  %v2702_v53 = vunpack.c.l.bf16 %v2551_v41  ;;  %v3348_v2 = vpack.c.bf16 %v5470_v15, %v5470_v15  ;;  %v3087_v20 = vunpack.c.l.bf16 %v2967_v61  ;;  %v3712_v13 = vpop.permute.xlu2 %3711  ;;  %v8151_v33 = vld [vmem:[#allocation110_spill] sm:$0xff]  ;;  %v8153_v15 = vld [vmem:[#allocation113_spill] sm:$0xff] }
 0x378   : > { %v3464_v47 = vunpack.c.l.bf16 %v3346_v38  ;;  %v3088_v19 = vunpack.c.h.bf16 %v2967_v61  ;;  %v3465_v14 = vunpack.c.l.bf16 %v3347_v9  ;;  %v3466_v1 = vunpack.c.h.bf16 %v3347_v9  ;;  %2099 = vmatmul.bf16.gmra.mxu1 %v8148_v36 }
 0x379   : > { %v2849_v16 = vadd.f32 %v7101_v25, %v2702_v53  ;;  %v3467_v44 = vunpack.c.l.bf16 %v3348_v2  ;;  %v2703_v56 = vunpack.c.l.bf16 %v2552_v52  ;;  %5475 = vtanh.f32 %v3087_v20  ;;  %2228 = vmatmul.bf16.gmra.mxu2 %v8149_v28 }
 0x37a   : > { %v3899_v55 = vmul.f32 %v7410_v34, %v3464_v47  ;;  %v3900_v7 = vmul.f32 %v3707_v35, %v3465_v14  ;;  %v2704_v3 = vunpack.c.h.bf16 %v2552_v52  ;;  %5477 = vtanh.f32 %v3088_v19  ;;  %2357 = vmatmul.bf16.gmra.mxu3 %v8150_v49  ;;  %v8152_v52 = vld [vmem:[#allocation109_spill] sm:$0xff]  ;;  %v3717_v19 = vpop.permute.xlu0 %3716 }
 0x37b   : > { %v2968_v17 = vpack.c.bf16 %v2849_v16, %v2849_v16  ;;  %v3901_v23 = vmul.f32 %v3707_v35, %v3466_v1  ;;  %v3902_v31 = vmul.f32 %v3707_v35, %v3467_v44  ;;  %v2850_v48 = vadd.f32 %v7088_v29, %v2703_v56  ;;  %2486 = vmatmul.bf16.gmra.mxu0 %v8148_v36 }
 0x37c   : > { %v5472_v22 = vpop.eup %5471  ;;  %v4101_v4 = vadd.f32 %v7413_v42, %v3899_v55  ;;  %v4080_v21 = vadd.f32 %v4079_v0, %v3900_v7  ;;  %v2851_v5 = vadd.f32 %v7090_v60, %v2704_v3  ;;  %v2445_v18 = vadd.f32 %v7416_v45, %v2316_v40  ;;  %v2189_v51 = vpop.f32.mrf.mxu2 }
 0x37d   : > { %v5474_v34 = vpop.eup %5473  ;;  %v3089_v37 = vunpack.c.l.bf16 %v2968_v17  ;;  %v4091_v12 = vadd.f32 %v4090_v50, %v3901_v23  ;;  %v2318_v63 = vpop.f32.mrf.mxu3  ;;  %5479 = vtanh.f32 %v3086_v43  ;;  %v2061_v62 = vadd.f32 %v2060_v30, %v8151_v33 }
 0x37e   : > { %v7439_v46 = vadd.f32 %v4101_v4, %v3902_v31  ;;  %v2969_v58 = vpack.c.bf16 %v2851_v5, %v2850_v48  ;;  %v3349_v11 = vpack.c.bf16 %v5474_v34, %v5472_v22  ;;  %v2062_v42 = vpop.f32.mrf.mxu1  ;;  %v2553_v27 = vpack.c.bf16 %v2445_v18, %v2445_v18 }
 0x37f   : > { %v7441_v0 = vpop.f32.mrf.mxu0  ;;  %5481 = vtanh.f32 %v3089_v37  ;;  %v2319_v24 = vadd.f32 %v2318_v63, %v2189_v51  ;;  %v5476_v26 = vpop.eup %5475  ;;  %v2554_v10 = vpack.c.bf16 %v2061_v62, %v8152_v52  ;;  %v2063_v38 = vadd.f32 %v2062_v42, %v8153_v15  ;;  %v8154_v42 = vld [vmem:[#allocation114_spill] sm:$0xff] }
 0x380   : > { %v3090_v50 = vunpack.c.l.bf16 %v2969_v58  ;;  %v3091_v59 = vunpack.c.h.bf16 %v2969_v58  ;;  %v3468_v45 = vunpack.c.l.bf16 %v3349_v11  ;;  %v3469_v41 = vunpack.c.h.bf16 %v3349_v11  ;;  %v5478_v9 = vpop.eup %5477 }
 0x381   : > { %v2705_v54 = vunpack.c.l.bf16 %v2553_v27  ;;  %v2448_v57 = vadd.f32 %v2447_v8, %v2319_v24  ;;  %v3351_v43 = vpack.c.bf16 %v5478_v9, %v5476_v26  ;;  %v2706_v53 = vunpack.c.l.bf16 %v2554_v10  ;;  %v8155_v26 = vld [vmem:[#allocation27_spill] sm:$0xff] }
 0x382   : > { %5483 = vtanh.f32 %v3090_v50  ;;  %v3903_v61 = vmul.f32 %v3712_v13, %v3468_v45  ;;  %v3904_v40 = vmul.f32 %v3712_v13, %v3469_v41  ;;  %v2707_v35 = vunpack.c.h.bf16 %v2554_v10  ;;  %v8157_v9 = vld [vmem:[#allocation111_spill] sm:$0xff] }
 0x383   : > { %5485 = vtanh.f32 %v3091_v59  ;;  %v2852_v30 = vadd.f32 %v7101_v25, %v2705_v54  ;;  %v5480_v2 = vpop.eup %5479  ;;  %v3471_v14 = vunpack.c.l.bf16 %v3351_v43  ;;  %v3472_v16 = vunpack.c.h.bf16 %v3351_v43  ;;  %v8156_v59 = vld [vmem:[#allocation112_spill] sm:$0xff] }
 0x384   : > { %v4081_v47 = vadd.f32 %v4080_v21, %v3903_v61  ;;  %v4092_v20 = vadd.f32 %v4091_v12, %v3904_v40  ;;  %v3350_v8 = vpack.c.bf16 %v5480_v2, %v5480_v2  ;;  %v2853_v56 = vadd.f32 %v7088_v29, %v2706_v53  ;;  %v2191_v55 = vpop.f32.mrf.mxu2 }
 0x385   : > { %v5482_v1 = vpop.eup %5481  ;;  %v2970_v44 = vpack.c.bf16 %v2852_v30, %v2852_v30  ;;  %v2854_v36 = vadd.f32 %v7090_v60, %v2707_v35  ;;  %v2320_v7 = vpop.f32.mrf.mxu3  ;;  %v7449_v23 = vmul.f32 %v3717_v19, %v3471_v14  ;;  %v7453_v4 = vmul.f32 %v3717_v19, %v3472_v16 }
 0x386   : > { %v4082_v3 = vrot.slane %v4081_v47, 4  ;;  %v4093_v28 = vrot.slane %v4092_v20, 4  ;;  %v3352_v17 = vpack.c.bf16 %v5482_v1, %v5482_v1  ;;  %v7451_v31 = vpop.f32.mrf.mxu1  ;;  %v3470_v22 = vunpack.c.l.bf16 %v3350_v8 }
 0x387   : > { %v3092_v49 = vunpack.c.l.bf16 %v2970_v44  ;;  %v2971_v21 = vpack.c.bf16 %v2854_v36, %v2853_v56  ;;  %v2555_v12 = vpack.c.bf16 %v2448_v57, %v2448_v57  ;;  %v7455_v18 = vpop.f32.mrf.mxu0  ;;  %v2556_v45 = vpack.c.bf16 %v2063_v38, %v8156_v59 }
 0x388   : > { %v5484_v48 = vpop.eup %5483  ;;  %v4083_v5 = vadd.f32 %v4082_v3, %v4081_v47  ;;  %v4094_v34 = vadd.f32 %v4093_v28, %v4092_v20  ;;  %v3473_v37 = vunpack.c.l.bf16 %v3352_v17  ;;  %v3905_v63 = vmul.f32 %v3712_v13, %v3470_v22  ;;  %2104 = vmatmul.bf16.gmra.mxu1 %v8154_v42  ;;  %v3722_v3 = vpop.permute.xlu1 %3721 }
 0x389   : > { %v5486_v51 = vpop.eup %5485  ;;  %5487 = vtanh.f32 %v3092_v49  ;;  %v3093_v58 = vunpack.c.l.bf16 %v2971_v21  ;;  %v3094_v11 = vunpack.c.h.bf16 %v2971_v21  ;;  %v2708_v24 = vunpack.c.l.bf16 %v2555_v12  ;;  %2233 = vmatmul.bf16.gmra.mxu2 %v8155_v26 }
 0x38a   : > { %v4084_v27 = vrot.slane %v4083_v5, 2  ;;  %v4095_v33 = vrot.slane %v4094_v34, 2  ;;  %v7458_v62 = vmul.f32 %v3717_v19, %v3473_v37  ;;  %v4103_v50 = vadd.f32 %v7439_v46, %v3905_v63  ;;  %2362 = vmatmul.bf16.gmra.mxu3 %v8157_v9  ;;  %v8159_v9 = vld [vmem:[#allocation115_spill] sm:$0xff] }
 0x38b   : > { %5489 = vtanh.f32 %v3093_v58  ;;  %v2321_v41 = vadd.f32 %v2320_v7, %v2191_v55  ;;  %v2855_v52 = vadd.f32 %v7101_v25, %v2708_v24  ;;  %2491 = vmatmul.bf16.gmra.mxu0 %v8154_v42  ;;  %v2709_v57 = vunpack.c.l.bf16 %v2556_v45  ;;  %v8158_v58 = vld [vmem:[#allocation116_spill] sm:$0xff] }
 0x38c   : > { %v4085_v13 = vadd.f32 %v4084_v27, %v4083_v5  ;;  %v4096_v54 = vadd.f32 %v4095_v33, %v4094_v34  ;;  %5491 = vtanh.f32 %v3094_v11  ;;  %v4104_v10 = vrot.slane %v4103_v50, 4  ;;  %v2194_v40 = vpop.f32.mrf.mxu2 }
 0x38d   : > { %v2710_v15 = vunpack.c.h.bf16 %v2556_v45  ;;  %v2450_v61 = vadd.f32 %v7441_v0, %v2321_v41  ;;  %v2323_v46 = vpop.f32.mrf.mxu3  ;;  %v2972_v38 = vpack.c.bf16 %v2855_v52, %v2855_v52  ;;  %v3353_v53 = vpack.c.bf16 %v5486_v51, %v5484_v48 }
 0x38e   : > { %v4086_v43 = vrot.slane %v4085_v13, 1  ;;  %v4097_v30 = vrot.slane %v4096_v54, 1  ;;  %v2067_v35 = vpop.f32.mrf.mxu1  ;;  %v4105_v47 = vadd.f32 %v4104_v10, %v4103_v50  ;;  %v2856_v20 = vadd.f32 %v7088_v29, %v2709_v57  ;;  %v8160_v57 = vld [vmem:[#allocation119_spill] sm:$0xff] }
 0x38f   : > { %v5488_v2 = vpop.eup %5487  ;;  %v2857_v19 = vadd.f32 %v7090_v60, %v2710_v15  ;;  %v2557_v14 = vpack.c.bf16 %v2450_v61, %v2450_v61  ;;  %v3095_v44 = vunpack.c.l.bf16 %v2972_v38  ;;  %v2454_v56 = vpop.f32.mrf.mxu0  ;;  %v3474_v28 = vunpack.c.l.bf16 %v3353_v53 }
 0x390   : > { %v4087_v16 = vadd.f32 %v4086_v43, %v4085_v13  ;;  %v4098_v1 = vadd.f32 %v4097_v30, %v4096_v54  ;;  %v3354_v8 = vpack.c.bf16 %v5488_v2, %v5488_v2  ;;  %v4106_v36 = vrot.slane %v4105_v47, 2  ;;  %v3727_v43 = vpop.permute.xlu2 %3726  ;;  %v8161_v30 = vld [vmem:[#allocation120_spill] sm:$0xff]  ;;  %v8162_v2 = vld [vmem:[#allocation31_spill] sm:$0xff] }
 0x391   : > { %v5490_v0 = vpop.eup %5489  ;;  %v2973_v55 = vpack.c.bf16 %v2857_v19, %v2856_v20  ;;  %v2711_v7 = vunpack.c.l.bf16 %v2557_v14  ;;  %5493 = vtanh.f32 %v3095_v44  ;;  %v3475_v21 = vunpack.c.h.bf16 %v3353_v53  ;;  %v8163_v19 = vld [vmem:[#allocation118_spill] sm:$0xff] }
 0x392   : > { %v5492_v17 = vpop.eup %5491  ;;  %v7471_v49 = vsel %vm4270_vm2, %v4087_v16, %v7385_v32  ;;  %v7475_v22 = vsel %vm4270_vm2, %v4098_v1, %v7389_v6  ;;  %v4107_v48 = vadd.f32 %v4106_v36, %v4105_v47  ;;  %v3476_v12 = vunpack.c.l.bf16 %v3354_v8  ;;  %v8164_v16 = vld [vmem:[#allocation117_spill] sm:$0xff] }
 0x393   : > { %v3096_v5 = vunpack.c.l.bf16 %v2973_v55  ;;  %v3097_v34 = vunpack.c.h.bf16 %v2973_v55  ;;  %v2858_v37 = vadd.f32 %v7101_v25, %v2711_v7  ;;  %v3909_v51 = vmul.f32 %v3722_v3, %v3474_v28 }
 0x394   : > { %v3910_v63 = vmul.f32 %v3722_v3, %v3475_v21  ;;  %v2066_v11 = vadd.f32 %v7451_v31, %v8158_v58  ;;  %v4108_v42 = vrot.slane %v4107_v48, 1  ;;  %v2324_v27 = vadd.f32 %v2323_v46, %v2194_v40  ;;  %v2196_v33 = vpop.f32.mrf.mxu2 }
 0x395   : > { %5495 = vtanh.f32 %v3096_v5  ;;  %v2974_v32 = vpack.c.bf16 %v2858_v37, %v2858_v37  ;;  %v2325_v6 = vpop.f32.mrf.mxu3  ;;  %v3911_v24 = vmul.f32 %v3722_v3, %v3476_v12  ;;  %v4110_v26 = vadd.f32 %v3909_v51, %v7449_v23 }
 0x396   : > { %5497 = vtanh.f32 %v3097_v34  ;;  %v4121_v50 = vadd.f32 %v3910_v63, %v7453_v4  ;;  %v7482_v59 = vpop.f32.mrf.mxu1  ;;  %v4109_v45 = vadd.f32 %v4108_v42, %v4107_v48  ;;  %v2558_v13 = vpack.c.bf16 %v2066_v11, %v8159_v9 }
 0x397   : > { %v3098_v41 = vunpack.c.l.bf16 %v2974_v32  ;;  %v2453_v31 = vadd.f32 %v7455_v18, %v2324_v27  ;;  %v5494_v54 = vpop.eup %5493  ;;  %v4132_v52 = vadd.f32 %v3911_v24, %v7458_v62  ;;  %v3355_v10 = vpack.c.bf16 %v5492_v17, %v5490_v0  ;;  %v7488_v40 = vpop.f32.mrf.mxu0 }
 0x398   : > { %v2068_v15 = vadd.f32 %v2067_v35, %v8160_v57  ;;  %v2326_v61 = vadd.f32 %v2325_v6, %v2196_v33  ;;  %v7492_v23 = vsel %vm4270_vm2, %v4109_v45, %v7398_v39  ;;  %v2712_v4 = vunpack.c.l.bf16 %v2558_v13  ;;  %2109 = vmatmul.bf16.gmra.mxu1 %v8161_v30  ;;  %v3732_v24 = vpop.permute.xlu0 %3731 }
 0x399   : > { %5499 = vtanh.f32 %v3098_v41  ;;  %v2713_v46 = vunpack.c.h.bf16 %v2558_v13  ;;  %v2559_v18 = vpack.c.bf16 %v2453_v31, %v2453_v31  ;;  %v3356_v38 = vpack.c.bf16 %v5494_v54, %v5494_v54  ;;  %2238 = vmatmul.bf16.gmra.mxu2 %v8162_v2 }
 0x39a   : > { %v3477_v53 = vunpack.c.l.bf16 %v3355_v10  ;;  %v3478_v62 = vunpack.c.h.bf16 %v3355_v10  ;;  %v2859_v47 = vadd.f32 %v7088_v29, %v2712_v4  ;;  %v2560_v39 = vpack.c.bf16 %v2068_v15, %v8163_v19  ;;  %2367 = vmatmul.bf16.gmra.mxu3 %v8164_v16  ;;  %v8167_v19 = vld [vmem:[#allocation121_spill] sm:$0xff]  ;;  %v8168_v16 = vld [vmem:[#allocation8_spill] sm:$0xff] }
 0x39b   : > { %v5496_v35 = vpop.eup %5495  ;;  %v2860_v20 = vadd.f32 %v7090_v60, %v2713_v46  ;;  %v2455_v14 = vadd.f32 %v2454_v56, %v2326_v61  ;;  %v2714_v44 = vunpack.c.l.bf16 %v2559_v18  ;;  %v3479_v8 = vunpack.c.l.bf16 %v3356_v38  ;;  %2496 = vmatmul.bf16.gmra.mxu0 %v8161_v30  ;;  %v8165_v46 = vld [vmem:[#allocation122_spill] sm:$0xff] }
 0x39c   : > { %v5498_v1 = vpop.eup %5497  ;;  %v3912_v0 = vmul.f32 %v3727_v43, %v3477_v53  ;;  %v3913_v36 = vmul.f32 %v3727_v43, %v3478_v62  ;;  %v2715_v7 = vunpack.c.l.bf16 %v2560_v39  ;;  %v2716_v3 = vunpack.c.h.bf16 %v2560_v39  ;;  %v2199_v17 = vpop.f32.mrf.mxu2  ;;  %v8166_v53 = vld [vmem:[#allocation123_spill] sm:$0xff] }
 0x39d   : > { %v2975_v55 = vpack.c.bf16 %v2860_v20, %v2859_v47  ;;  %v3357_v28 = vpack.c.bf16 %v5498_v1, %v5496_v35  ;;  %v2861_v21 = vadd.f32 %v7101_v25, %v2714_v44  ;;  %v3914_v48 = vmul.f32 %v3727_v43, %v3479_v8  ;;  %v2328_v56 = vpop.f32.mrf.mxu3 }
 0x39e   : > { %v4111_v5 = vadd.f32 %v4110_v26, %v3912_v0  ;;  %v4122_v34 = vadd.f32 %v4121_v50, %v3913_v36  ;;  %v2072_v37 = vpop.f32.mrf.mxu1  ;;  %v2862_v58 = vadd.f32 %v7088_v29, %v2715_v7  ;;  %v2863_v11 = vadd.f32 %v7090_v60, %v2716_v3 }
 0x39f   : > { %v5500_v12 = vpop.eup %5499  ;;  %v3099_v51 = vunpack.c.l.bf16 %v2975_v55  ;;  %v3100_v63 = vunpack.c.h.bf16 %v2975_v55  ;;  %v2976_v32 = vpack.c.bf16 %v2861_v21, %v2861_v21  ;;  %v4133_v27 = vadd.f32 %v4132_v52, %v3914_v48  ;;  %v2459_v6 = vpop.f32.mrf.mxu0 }
 0x3a0   : > { %v3358_v42 = vpack.c.bf16 %v5500_v12, %v5500_v12  ;;  %v3480_v33 = vunpack.c.l.bf16 %v3357_v28  ;;  %v2977_v45 = vpack.c.bf16 %v2863_v11, %v2862_v58  ;;  %v3481_v41 = vunpack.c.h.bf16 %v3357_v28 }
 0x3a1   : > { %5501 = vtanh.f32 %v3099_v51  ;;  %v2561_v26 = vpack.c.bf16 %v2455_v14, %v2455_v14  ;;  %v3101_v9 = vunpack.c.l.bf16 %v2976_v32  ;;  %v2071_v43 = vadd.f32 %v7482_v59, %v8165_v46  ;;  %v8169_v59 = vld [vmem:[#allocation51_spill] sm:$0xff] }
 0x3a2   : > { %v3482_v50 = vunpack.c.l.bf16 %v3358_v42  ;;  %5503 = vtanh.f32 %v3100_v63  ;;  %v3915_v13 = vmul.f32 %v3732_v24, %v3480_v33  ;;  %v3102_v31 = vunpack.c.l.bf16 %v2977_v45 }
 0x3a3   : > { %v3103_v54 = vunpack.c.h.bf16 %v2977_v45  ;;  %v3916_v10 = vmul.f32 %v3732_v24, %v3481_v41  ;;  %v2717_v57 = vunpack.c.l.bf16 %v2561_v26  ;;  %5505 = vtanh.f32 %v3101_v9 }
 0x3a4   : > { %v3917_v15 = vmul.f32 %v3732_v24, %v3482_v50  ;;  %v4112_v61 = vadd.f32 %v4111_v5, %v3915_v13  ;;  %5507 = vtanh.f32 %v3102_v31  ;;  %v2201_v30 = vpop.f32.mrf.mxu2  ;;  %v2329_v38 = vadd.f32 %v2328_v56, %v2199_v17 }
 0x3a5   : > { %v4123_v52 = vadd.f32 %v4122_v34, %v3916_v10  ;;  %v2864_v4 = vadd.f32 %v7101_v25, %v2717_v57  ;;  %5509 = vtanh.f32 %v3103_v54  ;;  %v2073_v62 = vadd.f32 %v2072_v37, %v8166_v53  ;;  %v2330_v2 = vpop.f32.mrf.mxu3 }
 0x3a6   : > { %v4134_v18 = vadd.f32 %v4133_v27, %v3917_v15  ;;  %v2075_v35 = vpop.f32.mrf.mxu1  ;;  %v2562_v39 = vpack.c.bf16 %v2071_v43, %v8167_v19  ;;  %v2331_v14 = vadd.f32 %v2330_v2, %v2201_v30  ;;  %v2458_v8 = vadd.f32 %v7488_v40, %v2329_v38  ;;  %v3737_v40 = vpop.permute.xlu1 %3736 }
 0x3a7   : > { %v5502_v47 = vpop.eup %5501  ;;  %v2978_v20 = vpack.c.bf16 %v2864_v4, %v2864_v4  ;;  %v7510_v1 = vadd.f32 %v2075_v35, %v8168_v16  ;;  %v2564_v0 = vpack.c.bf16 %v2073_v62, %v8169_v59  ;;  %v7514_v36 = vpop.f32.mrf.mxu0 }
 0x3a8   : > { %v5504_v44 = vpop.eup %5503  ;;  %v2718_v3 = vunpack.c.l.bf16 %v2562_v39  ;;  %v2719_v28 = vunpack.c.h.bf16 %v2562_v39  ;;  %v2563_v21 = vpack.c.bf16 %v2458_v8, %v2458_v8  ;;  %v2460_v34 = vadd.f32 %v2459_v6, %v2331_v14  ;;  %v3742_v4 = vpop.permute.xlu2 %3741 }
 0x3a9   : > { %v3359_v55 = vpack.c.bf16 %v5504_v44, %v5502_v47  ;;  %v3104_v7 = vunpack.c.l.bf16 %v2978_v20  ;;  %v5506_v17 = vpop.eup %5505  ;;  %v2721_v48 = vunpack.c.l.bf16 %v2564_v0  ;;  %v2722_v5 = vunpack.c.h.bf16 %v2564_v0 }
 0x3aa   : > { %v5508_v56 = vpop.eup %5507  ;;  %v3360_v37 = vpack.c.bf16 %v5506_v17, %v5506_v17  ;;  %v2865_v58 = vadd.f32 %v7088_v29, %v2718_v3  ;;  %v2866_v11 = vadd.f32 %v7090_v60, %v2719_v28  ;;  %v2720_v42 = vunpack.c.l.bf16 %v2563_v21 }
 0x3ab   : > { %v3483_v12 = vunpack.c.l.bf16 %v3359_v55  ;;  %v3484_v51 = vunpack.c.h.bf16 %v3359_v55  ;;  %5511 = vtanh.f32 %v3104_v7  ;;  %v5510_v63 = vpop.eup %5509  ;;  %v2868_v32 = vadd.f32 %v7088_v29, %v2721_v48  ;;  %v8170_v55 = vld [vmem:[#allocation33_spill] sm:$0xff] }
 0x3ac   : > { %v3485_v27 = vunpack.c.l.bf16 %v3360_v37  ;;  %v3361_v45 = vpack.c.bf16 %v5510_v63, %v5508_v56  ;;  %v2204_v41 = vpop.f32.mrf.mxu2  ;;  %v2979_v6 = vpack.c.bf16 %v2866_v11, %v2865_v58  ;;  %v2867_v26 = vadd.f32 %v7101_v25, %v2720_v42  ;;  %v8171_v58 = vld [vmem:[#allocation55_spill] sm:$0xff] }
 0x3ad   : > { %v3918_v33 = vmul.f32 %v3737_v40, %v3483_v12  ;;  %v3919_v24 = vmul.f32 %v3737_v40, %v3484_v51  ;;  %v2869_v50 = vadd.f32 %v7090_v60, %v2722_v5  ;;  %v2565_v9 = vpack.c.bf16 %v2460_v34, %v2460_v34  ;;  %v2333_v13 = vpop.f32.mrf.mxu3 }
 0x3ae   : > { %v2077_v31 = vpop.f32.mrf.mxu1  ;;  %v3920_v54 = vmul.f32 %v3737_v40, %v3485_v27  ;;  %v3486_v15 = vunpack.c.l.bf16 %v3361_v45  ;;  %v3487_v46 = vunpack.c.h.bf16 %v3361_v45  ;;  %v3105_v43 = vunpack.c.l.bf16 %v2979_v6 }
 0x3af   : > { %v4113_v10 = vadd.f32 %v4112_v61, %v3918_v33  ;;  %v4124_v57 = vadd.f32 %v4123_v52, %v3919_v24  ;;  %v3106_v30 = vunpack.c.h.bf16 %v2979_v6  ;;  %v2980_v38 = vpack.c.bf16 %v2867_v26, %v2867_v26  ;;  %v7521_v53 = vpop.f32.mrf.mxu0 }
 0x3b0   : > { %v4135_v2 = vadd.f32 %v4134_v18, %v3920_v54  ;;  %v3921_v35 = vmul.f32 %v3742_v4, %v3486_v15  ;;  %v2981_v47 = vpack.c.bf16 %v2869_v50, %v2868_v32  ;;  %v2723_v20 = vunpack.c.l.bf16 %v2565_v9 }
 0x3b1   : > { %v5512_v62 = vpop.eup %5511  ;;  %v3922_v39 = vmul.f32 %v3742_v4, %v3487_v46  ;;  %5513 = vtanh.f32 %v3105_v43  ;;  %v3107_v14 = vunpack.c.l.bf16 %v2980_v38  ;;  %v2566_v18 = vpack.c.bf16 %v7510_v1, %v8170_v55  ;;  %v3747_v46 = vpop.permute.xlu0 %3746 }
 0x3b2   : > { %v3362_v19 = vpack.c.bf16 %v5512_v62, %v5512_v62  ;;  %v4114_v16 = vadd.f32 %v4113_v10, %v3921_v35  ;;  %5515 = vtanh.f32 %v3106_v30  ;;  %v3108_v61 = vunpack.c.l.bf16 %v2981_v47  ;;  %v3752_v55 = vpop.permute.xlu1 %3751 }
 0x3b3   : > { %v3109_v52 = vunpack.c.h.bf16 %v2981_v47  ;;  %v4125_v8 = vadd.f32 %v4124_v57, %v3922_v39  ;;  %5517 = vtanh.f32 %v3107_v14  ;;  %v2870_v59 = vadd.f32 %v7101_v25, %v2723_v20 }
 0x3b4   : > { %v3488_v44 = vunpack.c.l.bf16 %v3362_v19  ;;  %v4115_v0 = vrot.slane %v4114_v16, 4  ;;  %5519 = vtanh.f32 %v3108_v61  ;;  %v2334_v7 = vadd.f32 %v2333_v13, %v2204_v41  ;;  %v7526_v3 = vpop.f32.mrf.mxu2 }
 0x3b5   : > { %v4126_v17 = vrot.slane %v4125_v8, 4  ;;  %5521 = vtanh.f32 %v3109_v52  ;;  %v2982_v21 = vpack.c.bf16 %v2870_v59, %v2870_v59  ;;  %v7528_v48 = vpop.f32.mrf.mxu3  ;;  %v2724_v56 = vunpack.c.l.bf16 %v2566_v18 }
 0x3b6   : > { %v3923_v28 = vmul.f32 %v3742_v4, %v3488_v44  ;;  %v7530_v5 = vpop.f32.mrf.mxu1  ;;  %v4116_v34 = vadd.f32 %v4115_v0, %v4114_v16  ;;  %v2725_v37 = vunpack.c.h.bf16 %v2566_v18  ;;  %v2463_v12 = vadd.f32 %v7514_v36, %v2334_v7 }
 0x3b7   : > { %v5514_v51 = vpop.eup %5513  ;;  %v4127_v63 = vadd.f32 %v4126_v17, %v4125_v8  ;;  %v3110_v1 = vunpack.c.l.bf16 %v2982_v21  ;;  %v2078_v11 = vadd.f32 %v2077_v31, %v8171_v58  ;;  %v2871_v27 = vadd.f32 %v7088_v29, %v2724_v56  ;;  %v7536_v45 = vpop.f32.mrf.mxu0 }
 0x3b8   : > { %v4136_v40 = vadd.f32 %v4135_v2, %v3923_v28  ;;  %v5516_v42 = vpop.eup %5515  ;;  %v4117_v32 = vrot.slane %v4116_v34, 2  ;;  %v2872_v33 = vadd.f32 %v7090_v60, %v2725_v37  ;;  %v2567_v24 = vpack.c.bf16 %v2463_v12, %v2463_v12 }
 0x3b9   : > { %v5518_v41 = vpop.eup %5517  ;;  %v4128_v6 = vrot.slane %v4127_v63, 2  ;;  %v3363_v50 = vpack.c.bf16 %v5516_v42, %v5514_v51  ;;  %5523 = vtanh.f32 %v3110_v1  ;;  %v8172_v1 = vld [vmem:[#allocation32_spill] sm:$0xff] }
 0x3ba   : > { %v4137_v26 = vrot.slane %v4136_v40, 4  ;;  %v5520_v36 = vpop.eup %5519  ;;  %v4118_v9 = vadd.f32 %v4117_v32, %v4116_v34  ;;  %v3364_v13 = vpack.c.bf16 %v5518_v41, %v5518_v41  ;;  %v2983_v54 = vpack.c.bf16 %v2872_v33, %v2871_v27 }
 0x3bb   : > { %v5522_v31 = vpop.eup %5521  ;;  %v4129_v10 = vadd.f32 %v4128_v6, %v4127_v63  ;;  %v3489_v15 = vunpack.c.l.bf16 %v3363_v50  ;;  %v3490_v4 = vunpack.c.h.bf16 %v3363_v50  ;;  %v2726_v62 = vunpack.c.l.bf16 %v2567_v24 }
 0x3bc   : > { %v4138_v57 = vadd.f32 %v4137_v26, %v4136_v40  ;;  %v4119_v43 = vrot.slane %v4118_v9, 1  ;;  %v3365_v30 = vpack.c.bf16 %v5522_v31, %v5520_v36  ;;  %v3111_v38 = vunpack.c.l.bf16 %v2983_v54  ;;  %v2209_v2 = vpop.f32.mrf.mxu2 }
 0x3bd   : > { %v4130_v35 = vrot.slane %v4129_v10, 1  ;;  %v3924_v20 = vmul.f32 %v3747_v46, %v3489_v15  ;;  %v3491_v19 = vunpack.c.l.bf16 %v3364_v13  ;;  %v2338_v39 = vpop.f32.mrf.mxu3  ;;  %v3925_v61 = vmul.f32 %v3747_v46, %v3490_v4  ;;  %v8173_v15 = vld [vmem:[#allocation35_spill] sm:$0xff] }
 0x3be   : > { %v4139_v47 = vrot.slane %v4138_v57, 2  ;;  %v7538_v14 = vpop.f32.mrf.mxu1  ;;  %v4120_v16 = vadd.f32 %v4119_v43, %v4118_v9  ;;  %v3492_v52 = vunpack.c.l.bf16 %v3365_v30  ;;  %v3493_v44 = vunpack.c.h.bf16 %v3365_v30 }
 0x3bf   : > { %v5524_v8 = vpop.eup %5523  ;;  %v4131_v59 = vadd.f32 %v4130_v35, %v4129_v10  ;;  %v3112_v18 = vunpack.c.h.bf16 %v2983_v54  ;;  %5525 = vtanh.f32 %v3111_v38  ;;  %v7544_v34 = vpop.f32.mrf.mxu0  ;;  %v2873_v12 = vadd.f32 %v7101_v25, %v2726_v62 }
 0x3c0   : > { %v4140_v0 = vadd.f32 %v4139_v47, %v4138_v57  ;;  %v7542_v7 = vsel %vm4272_vm3, %v4120_v16, %v7471_v49  ;;  %v3927_v28 = vmul.f32 %v3752_v55, %v3492_v52  ;;  %v3928_v17 = vmul.f32 %v3752_v55, %v3493_v44  ;;  %v3757_v35 = vpop.permute.xlu2 %3756 }
 0x3c1   : > { %v3366_v21 = vpack.c.bf16 %v5524_v8, %v5524_v8  ;;  %v7548_v37 = vsel %vm4272_vm3, %v4131_v59, %v7475_v22  ;;  %5527 = vtanh.f32 %v3112_v18  ;;  %v2568_v58 = vpack.c.bf16 %v2078_v11, %v8172_v1 }
 0x3c2   : > { %v4141_v56 = vrot.slane %v4140_v0, 1  ;;  %v4143_v51 = vadd.f32 %v3927_v28, %v3924_v20  ;;  %v4154_v63 = vadd.f32 %v3928_v17, %v3925_v61  ;;  %v2984_v42 = vpack.c.bf16 %v2873_v12, %v2873_v12  ;;  %v8174_v20 = vld [vmem:[#allocation57_spill] sm:$0xff]  ;;  %v8175_v12 = vld [vmem:[#allocation34_spill] sm:$0xff] }
 0x3c3   : > { %v3494_v40 = vunpack.c.l.bf16 %v3366_v21  ;;  %v2336_v32 = vadd.f32 %v7528_v48, %v7526_v3  ;;  %v3926_v27 = vmul.f32 %v3747_v46, %v3491_v19  ;;  %v2727_v24 = vunpack.c.l.bf16 %v2568_v58 }
 0x3c4   : > { %v4142_v49 = vadd.f32 %v4141_v56, %v4140_v0  ;;  %v2728_v41 = vunpack.c.h.bf16 %v2568_v58  ;;  %v2211_v6 = vpop.f32.mrf.mxu2  ;;  %v3113_v50 = vunpack.c.l.bf16 %v2984_v42  ;;  %v2081_v4 = vadd.f32 %v7530_v5, %v8173_v15 }
 0x3c5   : > { %v3929_v33 = vmul.f32 %v3752_v55, %v3494_v40  ;;  %v5526_v22 = vpop.eup %5525  ;;  %v2465_v36 = vadd.f32 %v7521_v53, %v2336_v32  ;;  %v2340_v9 = vpop.f32.mrf.mxu3  ;;  %v2874_v54 = vadd.f32 %v7088_v29, %v2727_v24  ;;  %v2339_v43 = vadd.f32 %v2338_v39, %v2209_v2 }
 0x3c6   : > { %v7556_v26 = vsel %vm4272_vm3, %v4142_v49, %v7492_v23  ;;  %v2085_v11 = vpop.f32.mrf.mxu1  ;;  %v2875_v3 = vadd.f32 %v7090_v60, %v2728_v41  ;;  %5529 = vtanh.f32 %v3113_v50  ;;  %v2570_v19 = vpack.c.bf16 %v2081_v4, %v8174_v20  ;;  %v8176_v49 = vld [vmem:[#allocation63_spill] sm:$0xff]  ;;  %v8178_v50 = vld [vmem:[#allocation61_spill] sm:$0xff]  ;;  %v3762_v20 = vpop.permute.xlu0 %3761 }
 0x3c7   : > { %v4165_v13 = vadd.f32 %v3929_v33, %v3926_v27  ;;  %v5528_v48 = vpop.eup %5527  ;;  %v2569_v31 = vpack.c.bf16 %v2465_v36, %v2465_v36  ;;  %v2472_v23 = vpop.f32.mrf.mxu0  ;;  %v2468_v52 = vadd.f32 %v7536_v45, %v2339_v43  ;;  %v2083_v40 = vadd.f32 %v7538_v14, %v8175_v12  ;;  %v8177_v27 = vld [vmem:[#allocation12_spill] sm:$0xff] }
 0x3c8   : > { %v3367_v10 = vpack.c.bf16 %v5528_v48, %v5526_v22  ;;  %v2985_v57 = vpack.c.bf16 %v2875_v3, %v2874_v54  ;;  %v2730_v59 = vunpack.c.l.bf16 %v2570_v19  ;;  %v2731_v28 = vunpack.c.h.bf16 %v2570_v19 }
 0x3c9   : > { %v2729_v46 = vunpack.c.l.bf16 %v2569_v31  ;;  %v2571_v56 = vpack.c.bf16 %v2468_v52, %v2468_v52  ;;  %v2341_v58 = vadd.f32 %v2340_v9, %v2211_v6  ;;  %v2086_v42 = vadd.f32 %v2085_v11, %v8176_v49 }
 0x3ca   : > { %v3495_v30 = vunpack.c.l.bf16 %v3367_v10  ;;  %v3496_v53 = vunpack.c.h.bf16 %v3367_v10  ;;  %v3114_v38 = vunpack.c.l.bf16 %v2985_v57  ;;  %v3115_v62 = vunpack.c.h.bf16 %v2985_v57 }
 0x3cb   : > { %v2876_v47 = vadd.f32 %v7101_v25, %v2729_v46  ;;  %v2877_v21 = vadd.f32 %v7088_v29, %v2730_v59  ;;  %v2878_v1 = vadd.f32 %v7090_v60, %v2731_v28  ;;  %v2732_v32 = vunpack.c.l.bf16 %v2571_v56 }
 0x3cc   : > { %v3930_v16 = vmul.f32 %v3757_v35, %v3495_v30  ;;  %v3931_v61 = vmul.f32 %v3757_v35, %v3496_v53  ;;  %5531 = vtanh.f32 %v3114_v38  ;;  %v2214_v44 = vpop.f32.mrf.mxu2  ;;  %v5530_v8 = vpop.eup %5529  ;;  %v2470_v22 = vadd.f32 %v7544_v34, %v2341_v58 }
 0x3cd   : > { %5533 = vtanh.f32 %v3115_v62  ;;  %v2986_v5 = vpack.c.bf16 %v2876_v47, %v2876_v47  ;;  %v2343_v2 = vpop.f32.mrf.mxu3  ;;  %v3368_v18 = vpack.c.bf16 %v5530_v8, %v5530_v8  ;;  %v2987_v41 = vpack.c.bf16 %v2878_v1, %v2877_v21  ;;  %v8179_v1 = vld [vmem:[#allocation16_spill] sm:$0xff] }
 0x3ce   : > { %v7566_v39 = vpop.f32.mrf.mxu1  ;;  %v4144_v0 = vadd.f32 %v4143_v51, %v3930_v16  ;;  %v4155_v55 = vadd.f32 %v4154_v63, %v3931_v61  ;;  %v2572_v51 = vpack.c.bf16 %v2083_v40, %v8177_v27  ;;  %v2344_v63 = vadd.f32 %v2343_v2, %v2214_v44 }
 0x3cf   : > { %v3116_v17 = vunpack.c.l.bf16 %v2986_v5  ;;  %v3497_v45 = vunpack.c.l.bf16 %v3368_v18  ;;  %v2574_v36 = vpack.c.bf16 %v2086_v42, %v8178_v50  ;;  %v7576_v54 = vpop.f32.mrf.mxu0  ;;  %v2879_v3 = vadd.f32 %v7101_v25, %v2732_v32 }
 0x3d0   : > { %v2733_v6 = vunpack.c.l.bf16 %v2572_v51  ;;  %v2734_v9 = vunpack.c.h.bf16 %v2572_v51  ;;  %v2473_v11 = vadd.f32 %v2472_v23, %v2344_v63  ;;  %v3117_v10 = vunpack.c.l.bf16 %v2987_v41  ;;  %v8180_v51 = vld [vmem:[#allocation38_spill] sm:$0xff] }
 0x3d1   : > { %5535 = vtanh.f32 %v3116_v17  ;;  %v3932_v24 = vmul.f32 %v3757_v35, %v3497_v45  ;;  %v3118_v57 = vunpack.c.h.bf16 %v2987_v41  ;;  %v2988_v4 = vpack.c.bf16 %v2879_v3, %v2879_v3 }
 0x3d2   : > { %v5532_v33 = vpop.eup %5531  ;;  %v2880_v46 = vadd.f32 %v7088_v29, %v2733_v6  ;;  %v2881_v34 = vadd.f32 %v7090_v60, %v2734_v9  ;;  %v2573_v43 = vpack.c.bf16 %v2470_v22, %v2470_v22  ;;  %5537 = vtanh.f32 %v3117_v10  ;;  %v8182_v9 = vld [vmem:[#allocation36_spill] sm:$0xff] }
 0x3d3   : > { %v5534_v14 = vpop.eup %5533  ;;  %v4166_v48 = vadd.f32 %v4165_v13, %v3932_v24  ;;  %v2736_v35 = vunpack.c.l.bf16 %v2574_v36  ;;  %5539 = vtanh.f32 %v3118_v57  ;;  %v3119_v13 = vunpack.c.l.bf16 %v2988_v4 }
 0x3d4   : > { %v3369_v31 = vpack.c.bf16 %v5534_v14, %v5532_v33  ;;  %v2216_v15 = vpop.f32.mrf.mxu2  ;;  %v2989_v23 = vpack.c.bf16 %v2881_v34, %v2880_v46  ;;  %v2735_v19 = vunpack.c.l.bf16 %v2573_v43  ;;  %v2737_v28 = vunpack.c.h.bf16 %v2574_v36  ;;  %v8181_v36 = vld [vmem:[#allocation37_spill] sm:$0xff]  ;;  %v3767_v46 = vpop.permute.xlu1 %3766 }
 0x3d5   : > { %v2345_v30 = vpop.f32.mrf.mxu3  ;;  %5541 = vtanh.f32 %v3119_v13  ;;  %v2883_v21 = vadd.f32 %v7088_v29, %v2736_v35  ;;  %v2575_v56 = vpack.c.bf16 %v2473_v11, %v2473_v11  ;;  %v2088_v58 = vadd.f32 %v7566_v39, %v8179_v1 }
 0x3d6   : > { %v2090_v53 = vpop.f32.mrf.mxu1  ;;  %v3498_v38 = vunpack.c.l.bf16 %v3369_v31  ;;  %v3499_v62 = vunpack.c.h.bf16 %v3369_v31  ;;  %v3120_v44 = vunpack.c.l.bf16 %v2989_v23  ;;  %v3121_v8 = vunpack.c.h.bf16 %v2989_v23 }
 0x3d7   : > { %v5536_v47 = vpop.eup %5535  ;;  %v2882_v5 = vadd.f32 %v7101_v25, %v2735_v19  ;;  %v2884_v45 = vadd.f32 %v7090_v60, %v2737_v28  ;;  %v7586_v49 = vpop.f32.mrf.mxu0  ;;  %v2738_v32 = vunpack.c.l.bf16 %v2575_v56  ;;  %v2346_v27 = vadd.f32 %v2345_v30, %v2216_v15 }
 0x3d8   : > { %v3933_v16 = vmul.f32 %v3762_v20, %v3498_v38  ;;  %v3934_v61 = vmul.f32 %v3762_v20, %v3499_v62  ;;  %v3370_v52 = vpack.c.bf16 %v5536_v47, %v5536_v47  ;;  %5543 = vtanh.f32 %v3120_v44  ;;  %v5538_v12 = vpop.eup %5537 }
 0x3d9   : > { %v2990_v17 = vpack.c.bf16 %v2882_v5, %v2882_v5  ;;  %5545 = vtanh.f32 %v3121_v8  ;;  %v2091_v63 = vadd.f32 %v2090_v53, %v8180_v51  ;;  %v2991_v50 = vpack.c.bf16 %v2884_v45, %v2883_v21 }
 0x3da   : > { %v4145_v59 = vadd.f32 %v4144_v0, %v3933_v16  ;;  %v4156_v2 = vadd.f32 %v4155_v55, %v3934_v61  ;;  %v3500_v18 = vunpack.c.l.bf16 %v3370_v52  ;;  %v5540_v0 = vpop.eup %5539  ;;  %v2576_v14 = vpack.c.bf16 %v2088_v58, %v8181_v36 }
 0x3db   : > { %v3122_v55 = vunpack.c.l.bf16 %v2990_v17  ;;  %v3371_v22 = vpack.c.bf16 %v5540_v0, %v5538_v12  ;;  %v5542_v39 = vpop.eup %5541  ;;  %v2885_v3 = vadd.f32 %v7101_v25, %v2738_v32  ;;  %v2475_v6 = vadd.f32 %v7576_v54, %v2346_v27  ;;  %v3772_v17 = vpop.permute.xlu2 %3771 }
 0x3dc   : > { %v3935_v40 = vmul.f32 %v3762_v20, %v3500_v18  ;;  %v7588_v42 = vpop.f32.mrf.mxu2  ;;  %v2578_v11 = vpack.c.bf16 %v2091_v63, %v8182_v9  ;;  %v3372_v57 = vpack.c.bf16 %v5542_v39, %v5542_v39  ;;  %v3123_v15 = vunpack.c.l.bf16 %v2991_v50 }
 0x3dd   : > { %v7591_v33 = vpop.f32.mrf.mxu3  ;;  %5547 = vtanh.f32 %v3122_v55  ;;  %v3501_v31 = vunpack.c.l.bf16 %v3371_v22  ;;  %v3502_v10 = vunpack.c.h.bf16 %v3371_v22  ;;  %v3124_v34 = vunpack.c.h.bf16 %v2991_v50 }
 0x3de   : > { %v7593_v24 = vpop.f32.mrf.mxu1  ;;  %v4167_v41 = vadd.f32 %v4166_v48, %v3935_v40  ;;  %v5544_v4 = vpop.eup %5543  ;;  %v2992_v48 = vpack.c.bf16 %v2885_v3, %v2885_v3  ;;  %v2739_v43 = vunpack.c.l.bf16 %v2576_v14  ;;  %v2740_v30 = vunpack.c.h.bf16 %v2576_v14 }
 0x3df   : > { %v5546_v53 = vpop.eup %5545  ;;  %v3936_v38 = vmul.f32 %v3767_v46, %v3501_v31  ;;  %v3937_v62 = vmul.f32 %v3767_v46, %v3502_v10  ;;  %v3503_v35 = vunpack.c.l.bf16 %v3372_v57  ;;  %5549 = vtanh.f32 %v3123_v15  ;;  %v3777_v10 = vpop.permute.xlu0 %3776 }
 0x3e0   : > { %v3373_v47 = vpack.c.bf16 %v5546_v53, %v5544_v4  ;;  %5551 = vtanh.f32 %v3124_v34  ;;  %v3125_v54 = vunpack.c.l.bf16 %v2992_v48  ;;  %v2886_v20 = vadd.f32 %v7088_v29, %v2739_v43 }
 0x3e1   : > { %v4146_v13 = vadd.f32 %v4145_v59, %v3936_v38  ;;  %v4157_v23 = vadd.f32 %v4156_v2, %v3937_v62  ;;  %v3938_v19 = vmul.f32 %v3767_v46, %v3503_v35  ;;  %v2887_v16 = vadd.f32 %v7090_v60, %v2740_v30  ;;  %v7607_v2 = vpop.f32.mrf.mxu0 }
 0x3e2   : > { %v3504_v44 = vunpack.c.l.bf16 %v3373_v47  ;;  %v3505_v8 = vunpack.c.h.bf16 %v3373_v47  ;;  %5553 = vtanh.f32 %v3125_v54  ;;  %v2577_v5 = vpack.c.bf16 %v2475_v6, %v2475_v6 }
 0x3e3   : > { %v5548_v52 = vpop.eup %5547  ;;  %v4168_v21 = vadd.f32 %v4167_v41, %v3938_v19  ;;  %v2993_v12 = vpack.c.bf16 %v2887_v16, %v2886_v20  ;;  %v2742_v59 = vunpack.c.l.bf16 %v2578_v11  ;;  %v2743_v58 = vunpack.c.h.bf16 %v2578_v11 }
 0x3e4   : > { %v7601_v61 = vpop.f32.mrf.mxu2  ;;  %v3374_v56 = vpack.c.bf16 %v5548_v52, %v5548_v52  ;;  %v3939_v40 = vmul.f32 %v3772_v17, %v3504_v44  ;;  %v3940_v45 = vmul.f32 %v3772_v17, %v3505_v8  ;;  %v2741_v1 = vunpack.c.l.bf16 %v2577_v5 }
 0x3e5   : > { %v7603_v18 = vpop.f32.mrf.mxu3  ;;  %v5550_v0 = vpop.eup %5549  ;;  %v3126_v32 = vunpack.c.l.bf16 %v2993_v12  ;;  %v3127_v27 = vunpack.c.h.bf16 %v2993_v12  ;;  %v2889_v51 = vadd.f32 %v7088_v29, %v2742_v59  ;;  %v2890_v36 = vadd.f32 %v7090_v60, %v2743_v58 }
 0x3e6   : > { %v7605_v28 = vpop.f32.mrf.mxu1  ;;  %v3506_v55 = vunpack.c.l.bf16 %v3374_v56  ;;  %v5552_v63 = vpop.eup %5551  ;;  %v4147_v22 = vadd.f32 %v4146_v13, %v3939_v40  ;;  %v4158_v50 = vadd.f32 %v4157_v23, %v3940_v45  ;;  %v2888_v41 = vadd.f32 %v7101_v25, %v2741_v1  ;;  %v8183_v56 = vld [vmem:[#allocation41_spill] sm:$0xff] }
 0x3e7   : > { %v3375_v39 = vpack.c.bf16 %v5552_v63, %v5550_v0  ;;  %5555 = vtanh.f32 %v3126_v32  ;;  %v2349_v3 = vadd.f32 %v7591_v33, %v7588_v42  ;;  %v2995_v53 = vpack.c.bf16 %v2890_v36, %v2889_v51  ;;  %v3782_v59 = vpop.permute.xlu1 %3781 }
 0x3e8   : > { %v3941_v14 = vmul.f32 %v3772_v17, %v3506_v55  ;;  %v5554_v6 = vpop.eup %5553  ;;  %v4148_v9 = vrot.slane %v4147_v22, 4  ;;  %v4159_v11 = vrot.slane %v4158_v50, 4  ;;  %5557 = vtanh.f32 %v3127_v27  ;;  %v8184_v55 = vld [vmem:[#allocation39_spill] sm:$0xff] }
 0x3e9   : > { %v2994_v31 = vpack.c.bf16 %v2888_v41, %v2888_v41  ;;  %v3507_v15 = vunpack.c.l.bf16 %v3375_v39  ;;  %v3508_v4 = vunpack.c.h.bf16 %v3375_v39  ;;  %v3376_v46 = vpack.c.bf16 %v5554_v6, %v5554_v6  ;;  %v2482_v8 = vpop.f32.mrf.mxu0 }
 0x3ea   : > { %v4169_v57 = vadd.f32 %v4168_v21, %v3941_v14  ;;  %v4149_v48 = vadd.f32 %v4148_v9, %v4147_v22  ;;  %v4160_v43 = vadd.f32 %v4159_v11, %v4158_v50  ;;  %v3129_v13 = vunpack.c.l.bf16 %v2995_v53 }
 0x3eb   : > { %v3128_v30 = vunpack.c.l.bf16 %v2994_v31  ;;  %v3942_v62 = vmul.f32 %v3777_v10, %v3507_v15  ;;  %v3943_v35 = vmul.f32 %v3777_v10, %v3508_v4  ;;  %v3509_v47 = vunpack.c.l.bf16 %v3376_v46 }
 0x3ec   : > { %v7614_v34 = vpop.f32.mrf.mxu2  ;;  %v4170_v33 = vrot.slane %v4169_v57, 4  ;;  %v4150_v54 = vrot.slane %v4149_v48, 2  ;;  %v4161_v20 = vrot.slane %v4160_v43, 2  ;;  %v3130_v52 = vunpack.c.h.bf16 %v2995_v53 }
 0x3ed   : > { %v7616_v38 = vpop.f32.mrf.mxu3  ;;  %5559 = vtanh.f32 %v3128_v30  ;;  %v5556_v23 = vpop.eup %5555  ;;  %v3944_v16 = vmul.f32 %v3777_v10, %v3509_v47  ;;  %v2478_v44 = vadd.f32 %v7586_v49, %v2349_v3  ;;  %v2093_v12 = vadd.f32 %v7593_v24, %v8183_v56  ;;  %v8186_v56 = vld [vmem:[#allocation20_spill] sm:$0xff] }
 0x3ee   : > { %v7618_v42 = vpop.f32.mrf.mxu1  ;;  %v4171_v19 = vadd.f32 %v4170_v33, %v4169_v57  ;;  %v5558_v5 = vpop.eup %5557  ;;  %v4151_v17 = vadd.f32 %v4150_v54, %v4149_v48  ;;  %v4162_v21 = vadd.f32 %v4161_v20, %v4160_v43  ;;  %5561 = vtanh.f32 %v3129_v13  ;;  %v8185_v13 = vld [vmem:[#allocation40_spill] sm:$0xff] }
 0x3ef   : > { %v3377_v45 = vpack.c.bf16 %v5558_v5, %v5556_v23  ;;  %5563 = vtanh.f32 %v3130_v52  ;;  %v2579_v1 = vpack.c.bf16 %v2478_v44, %v2478_v44  ;;  %v2580_v32 = vpack.c.bf16 %v2093_v12, %v8184_v55 }
 0x3f0   : > { %v4172_v40 = vrot.slane %v4171_v19, 2  ;;  %v4152_v58 = vrot.slane %v4151_v17, 1  ;;  %v4163_v0 = vrot.slane %v4162_v21, 1  ;;  %v2351_v49 = vadd.f32 %v7603_v18, %v7601_v61 }
 0x3f1   : > { %v3510_v51 = vunpack.c.l.bf16 %v3377_v45  ;;  %v3511_v63 = vunpack.c.h.bf16 %v3377_v45  ;;  %v2744_v22 = vunpack.c.l.bf16 %v2579_v1  ;;  %v2745_v14 = vunpack.c.l.bf16 %v2580_v32 }
 0x3f2   : > { %v4173_v27 = vadd.f32 %v4172_v40, %v4171_v19  ;;  %v4153_v24 = vadd.f32 %v4152_v58, %v4151_v17  ;;  %v4164_v36 = vadd.f32 %v4163_v0, %v4162_v21  ;;  %v2746_v39 = vunpack.c.h.bf16 %v2580_v32  ;;  %v3787_v17 = vpop.permute.xlu1 %3786 }
 0x3f3   : > { %v5560_v41 = vpop.eup %5559  ;;  %v3945_v11 = vmul.f32 %v3782_v59, %v3510_v51  ;;  %v3946_v31 = vmul.f32 %v3782_v59, %v3511_v63  ;;  %v2891_v15 = vadd.f32 %v7101_v25, %v2744_v22  ;;  %v2892_v4 = vadd.f32 %v7088_v29, %v2745_v14 }
 0x3f4   : > { %v7626_v50 = vpop.f32.mrf.mxu2  ;;  %v4174_v9 = vrot.slane %v4173_v27, 1  ;;  %v3378_v10 = vpack.c.bf16 %v5560_v41, %v5560_v41  ;;  %v5562_v57 = vpop.eup %5561  ;;  %v7630_v61 = vsel %vm4274_vm4, %v4153_v24, %v7542_v7  ;;  %v7634_v18 = vsel %vm4274_vm4, %v4164_v36, %v7548_v37  ;;  %v8187_v24 = vld [vmem:[#allocation43_spill] sm:$0xff] }
 0x3f5   : > { %v2355_v3 = vpop.f32.mrf.mxu3  ;;  %v5564_v46 = vpop.eup %5563  ;;  %v4176_v43 = vadd.f32 %v3945_v11, %v3942_v62  ;;  %v4187_v30 = vadd.f32 %v3946_v31, %v3943_v35  ;;  %v2996_v47 = vpack.c.bf16 %v2891_v15, %v2891_v15  ;;  %v2893_v54 = vadd.f32 %v7090_v60, %v2746_v39  ;;  %v8188_v39 = vld [vmem:[#allocation24_spill] sm:$0xff] }
 0x3f6   : > { %v2100_v6 = vpop.f32.mrf.mxu1  ;;  %v4175_v48 = vadd.f32 %v4174_v9, %v4173_v27  ;;  %v3512_v53 = vunpack.c.l.bf16 %v3378_v10  ;;  %v3379_v33 = vpack.c.bf16 %v5564_v46, %v5562_v57  ;;  %v2480_v7 = vadd.f32 %v7607_v2, %v2351_v49  ;;  %v2484_v62 = vpop.f32.mrf.mxu0  ;;  %v8189_v57 = vld [vmem:[#allocation46_spill] sm:$0xff] }
 0x3f7   : > { %v2096_v23 = vadd.f32 %v7605_v28, %v8185_v13  ;;  %v2354_v19 = vadd.f32 %v7616_v38, %v7614_v34  ;;  %v3131_v44 = vunpack.c.l.bf16 %v2996_v47  ;;  %v2997_v5 = vpack.c.bf16 %v2893_v54, %v2892_v4  ;;  %v7651_v28 = vpop.permute.xlu2 %3806 }
 0x3f8   : > { %v7642_v20 = vsel %vm4274_vm4, %v4175_v48, %v7556_v26  ;;  %v3947_v37 = vmul.f32 %v3782_v59, %v3512_v53  ;;  %v3513_v35 = vunpack.c.l.bf16 %v3379_v33  ;;  %v3514_v52 = vunpack.c.h.bf16 %v3379_v33  ;;  %v8190_v48 = vld [vmem:[#allocation42_spill] sm:$0xff]  ;;  %v8191_v53 = vld [vmem:[#allocation45_spill] sm:$0xff] }
 0x3f9   : > { %v2581_v2 = vpack.c.bf16 %v2480_v7, %v2480_v7  ;;  %v2582_v12 = vpack.c.bf16 %v2096_v23, %v8186_v56  ;;  %v2483_v26 = vadd.f32 %v2482_v8, %v2354_v19  ;;  %5565 = vtanh.f32 %v3131_v44  ;;  %v7657_v8 = vpop.permute.xlu0 %3811 }
 0x3fa   : > { %v7648_v21 = vadd.f32 %v3947_v37, %v3944_v16  ;;  %v3948_v40 = vmul.f32 %v3787_v17, %v3513_v35  ;;  %v3949_v59 = vmul.f32 %v3787_v17, %v3514_v52  ;;  %v3132_v45 = vunpack.c.l.bf16 %v2997_v5 }
 0x3fb   : > { %v3133_v1 = vunpack.c.h.bf16 %v2997_v5  ;;  %v2747_v34 = vunpack.c.l.bf16 %v2581_v2  ;;  %v2748_v38 = vunpack.c.l.bf16 %v2582_v12  ;;  %v2749_v58 = vunpack.c.h.bf16 %v2582_v12 }
 0x3fc   : > { %v2229_v0 = vpop.f32.mrf.mxu2  ;;  %v7653_v55 = vadd.f32 %v4176_v43, %v3948_v40  ;;  %v7655_v32 = vadd.f32 %v4187_v30, %v3949_v59  ;;  %5567 = vtanh.f32 %v3132_v45  ;;  %v2583_v16 = vpack.c.bf16 %v2483_v26, %v2483_v26 }
 0x3fd   : > { %v2358_v49 = vpop.f32.mrf.mxu3  ;;  %5569 = vtanh.f32 %v3133_v1  ;;  %v2894_v51 = vadd.f32 %v7101_v25, %v2747_v34  ;;  %v2895_v63 = vadd.f32 %v7088_v29, %v2748_v38  ;;  %v2896_v22 = vadd.f32 %v7090_v60, %v2749_v58 }
 0x3fe   : > { %v2102_v27 = vpop.f32.mrf.mxu1  ;;  %v2750_v41 = vunpack.c.l.bf16 %v2583_v16  ;;  %v2098_v36 = vadd.f32 %v7618_v42, %v8187_v24  ;;  %v2356_v14 = vadd.f32 %v2355_v3, %v7626_v50  ;;  %v2101_v9 = vadd.f32 %v2100_v6, %v8188_v39  ;;  %v2487_v50 = vpop.f32.mrf.mxu0  ;;  %v8192_v39 = vld [vmem:[#allocation44_spill] sm:$0xff] }
 0x3ff   : > { %v2998_v11 = vpack.c.bf16 %v2894_v51, %v2894_v51  ;;  %v2999_v31 = vpack.c.bf16 %v2896_v22, %v2895_v63  ;;  %v2359_v10 = vadd.f32 %v2358_v49, %v2229_v0  ;;  %v2103_v15 = vadd.f32 %v2102_v27, %v8189_v57  ;;  %v5566_v4 = vpop.eup %5565  ;;  %v7671_v56 = vpop.permute.xlu2 %3816 }
 0x400   : > { %v2897_v46 = vadd.f32 %v7101_v25, %v2750_v41  ;;  %v2584_v43 = vpack.c.bf16 %v2098_v36, %v8190_v48  ;;  %v2485_v30 = vadd.f32 %v2484_v62, %v2356_v14  ;;  %v2586_v33 = vpack.c.bf16 %v2101_v9, %v8191_v53  ;;  %v7683_v53 = vpop.permute.xlu1 %3821 }
 0x401   : > { %v3380_v47 = vpack.c.bf16 %v5566_v4, %v5566_v4  ;;  %v3134_v54 = vunpack.c.l.bf16 %v2998_v11  ;;  %v3135_v42 = vunpack.c.l.bf16 %v2999_v31  ;;  %v3136_v7 = vunpack.c.h.bf16 %v2999_v31  ;;  %v3792_v38 = vpop.permute.xlu0 %3791 }
 0x402   : > { %v5568_v3 = vpop.eup %5567  ;;  %v3000_v6 = vpack.c.bf16 %v2897_v46, %v2897_v46  ;;  %v2751_v37 = vunpack.c.l.bf16 %v2584_v43  ;;  %v2752_v13 = vunpack.c.h.bf16 %v2584_v43  ;;  %v2585_v23 = vpack.c.bf16 %v2485_v30, %v2485_v30 }
 0x403   : > { %v5570_v19 = vpop.eup %5569  ;;  %v3515_v35 = vunpack.c.l.bf16 %v3380_v47  ;;  %5571 = vtanh.f32 %v3134_v54  ;;  %v2754_v52 = vunpack.c.l.bf16 %v2586_v33  ;;  %v2755_v44 = vunpack.c.h.bf16 %v2586_v33 }
 0x404   : > { %v3381_v5 = vpack.c.bf16 %v5570_v19, %v5568_v3  ;;  %5573 = vtanh.f32 %v3135_v42  ;;  %v3137_v62 = vunpack.c.l.bf16 %v3000_v6  ;;  %v2898_v2 = vadd.f32 %v7088_v29, %v2751_v37  ;;  %v2231_v1 = vpop.f32.mrf.mxu2 }
 0x405   : > { %v3950_v12 = vmul.f32 %v3787_v17, %v3515_v35  ;;  %5575 = vtanh.f32 %v3136_v7  ;;  %v2899_v26 = vadd.f32 %v7090_v60, %v2752_v13  ;;  %v2753_v40 = vunpack.c.l.bf16 %v2585_v23  ;;  %v2360_v34 = vpop.f32.mrf.mxu3 }
 0x406   : > { %v3516_v59 = vunpack.c.l.bf16 %v3381_v5  ;;  %v3517_v45 = vunpack.c.h.bf16 %v3381_v5  ;;  %5577 = vtanh.f32 %v3137_v62  ;;  %v2901_v49 = vadd.f32 %v7088_v29, %v2754_v52  ;;  %v2105_v22 = vpop.f32.mrf.mxu1  ;;  %v2489_v30 = vpop.f32.mrf.mxu0 }
 0x407   : > { %v7675_v58 = vadd.f32 %v7648_v21, %v3950_v12  ;;  %v3001_v0 = vpack.c.bf16 %v2899_v26, %v2898_v2  ;;  %v2900_v16 = vadd.f32 %v7101_v25, %v2753_v40  ;;  %v2902_v51 = vadd.f32 %v7090_v60, %v2755_v44 }
 0x408   : > { %v3951_v27 = vmul.f32 %v3792_v38, %v3516_v59  ;;  %v3952_v17 = vmul.f32 %v3792_v38, %v3517_v45  ;;  %v2488_v63 = vadd.f32 %v2487_v50, %v2359_v10  ;;  %v2588_v9 = vpack.c.bf16 %v2103_v15, %v8192_v39  ;;  %v3797_v50 = vpop.permute.xlu2 %3796  ;;  %v8193_v59 = vld [vmem:[#allocation49_spill] sm:$0xff] }
 0x409   : > { %v5572_v41 = vpop.eup %5571  ;;  %v3138_v24 = vunpack.c.l.bf16 %v3001_v0  ;;  %v3139_v36 = vunpack.c.h.bf16 %v3001_v0  ;;  %v3002_v14 = vpack.c.bf16 %v2900_v16, %v2900_v16  ;;  %v3003_v4 = vpack.c.bf16 %v2902_v51, %v2901_v49 }
 0x40a   : > { %v5574_v11 = vpop.eup %5573  ;;  %v4178_v21 = vadd.f32 %v7653_v55, %v3951_v27  ;;  %v4189_v31 = vadd.f32 %v7655_v32, %v3952_v17  ;;  %v3382_v57 = vpack.c.bf16 %v5572_v41, %v5572_v41  ;;  %v2587_v43 = vpack.c.bf16 %v2488_v63, %v2488_v63 }
 0x40b   : > { %v5576_v46 = vpop.eup %5575  ;;  %5579 = vtanh.f32 %v3138_v24  ;;  %v3140_v48 = vunpack.c.l.bf16 %v3002_v14  ;;  %v3141_v47 = vunpack.c.l.bf16 %v3003_v4  ;;  %v2757_v54 = vunpack.c.l.bf16 %v2588_v9 }
 0x40c   : > { %v5578_v10 = vpop.eup %5577  ;;  %v3383_v33 = vpack.c.bf16 %v5576_v46, %v5574_v11  ;;  %5581 = vtanh.f32 %v3139_v36  ;;  %v3518_v15 = vunpack.c.l.bf16 %v3382_v57  ;;  %v3142_v55 = vunpack.c.h.bf16 %v3003_v4  ;;  %v2234_v35 = vpop.f32.mrf.mxu2  ;;  %v8194_v36 = vld [vmem:[#allocation47_spill] sm:$0xff] }
 0x40d   : > { %v3384_v42 = vpack.c.bf16 %v5578_v10, %v5578_v10  ;;  %5583 = vtanh.f32 %v3140_v48  ;;  %v2756_v6 = vunpack.c.l.bf16 %v2587_v43  ;;  %v2758_v37 = vunpack.c.h.bf16 %v2588_v9  ;;  %v2363_v52 = vpop.f32.mrf.mxu3 }
 0x40e   : > { %v3519_v7 = vunpack.c.l.bf16 %v3383_v33  ;;  %v3520_v32 = vunpack.c.h.bf16 %v3383_v33  ;;  %5585 = vtanh.f32 %v3141_v47  ;;  %v2904_v19 = vadd.f32 %v7088_v29, %v2757_v54  ;;  %v2107_v0 = vpop.f32.mrf.mxu1 }
 0x40f   : > { %v3521_v3 = vunpack.c.l.bf16 %v3384_v42  ;;  %5587 = vtanh.f32 %v3142_v55  ;;  %v3953_v5 = vmul.f32 %v3792_v38, %v3518_v15  ;;  %v2905_v62 = vadd.f32 %v7090_v60, %v2758_v37 }
 0x410   : > { %v3954_v13 = vmul.f32 %v3797_v50, %v3519_v7  ;;  %v3955_v23 = vmul.f32 %v3797_v50, %v3520_v32  ;;  %v2361_v2 = vadd.f32 %v2360_v34, %v2231_v1  ;;  %v2106_v45 = vadd.f32 %v2105_v22, %v8193_v59  ;;  %v2492_v22 = vpop.f32.mrf.mxu0 }
 0x411   : > { %v5580_v44 = vpop.eup %5579  ;;  %v3956_v49 = vmul.f32 %v3797_v50, %v3521_v3  ;;  %v2903_v17 = vadd.f32 %v7101_v25, %v2756_v6  ;;  %v3005_v51 = vpack.c.bf16 %v2905_v62, %v2904_v19  ;;  %v2364_v14 = vadd.f32 %v2363_v52, %v2234_v35 }
 0x412   : > { %v5582_v12 = vpop.eup %5581  ;;  %v4179_v26 = vadd.f32 %v4178_v21, %v3954_v13  ;;  %v4190_v40 = vadd.f32 %v4189_v31, %v3955_v23  ;;  %v2490_v24 = vadd.f32 %v2489_v30, %v2361_v2  ;;  %v2590_v38 = vpack.c.bf16 %v2106_v45, %v8194_v36  ;;  %v3802_v21 = vpop.permute.xlu1 %3801 }
 0x413   : > { %v5584_v16 = vpop.eup %5583  ;;  %v3385_v27 = vpack.c.bf16 %v5582_v12, %v5580_v44  ;;  %v4200_v1 = vadd.f32 %v7675_v58, %v3953_v5  ;;  %v3144_v11 = vunpack.c.l.bf16 %v3005_v51  ;;  %v3145_v4 = vunpack.c.h.bf16 %v3005_v51  ;;  %v8195_v5 = vld [vmem:[#allocation48_spill] sm:$0xff] }
 0x414   : > { %v5586_v63 = vpop.eup %5585  ;;  %v3386_v41 = vpack.c.bf16 %v5584_v16, %v5584_v16  ;;  %v2589_v46 = vpack.c.bf16 %v2490_v24, %v2490_v24  ;;  %v2760_v10 = vunpack.c.l.bf16 %v2590_v38  ;;  %v2493_v47 = vadd.f32 %v2492_v22, %v2364_v14  ;;  %v2236_v3 = vpop.f32.mrf.mxu2 }
 0x415   : > { %v5588_v39 = vpop.eup %5587  ;;  %v3522_v34 = vunpack.c.l.bf16 %v3385_v27  ;;  %v3523_v9 = vunpack.c.h.bf16 %v3385_v27  ;;  %5589 = vtanh.f32 %v3144_v11  ;;  %v4201_v30 = vadd.f32 %v4200_v1, %v3956_v49  ;;  %v2365_v6 = vpop.f32.mrf.mxu3 }
 0x416   : > { %v3524_v31 = vunpack.c.l.bf16 %v3386_v41  ;;  %v3387_v57 = vpack.c.bf16 %v5588_v39, %v5586_v63  ;;  %5591 = vtanh.f32 %v3145_v4  ;;  %v2759_v58 = vunpack.c.l.bf16 %v2589_v46  ;;  %v2110_v2 = vpop.f32.mrf.mxu1 }
 0x417   : > { %v3957_v48 = vmul.f32 %v3802_v21, %v3522_v34  ;;  %v3958_v43 = vmul.f32 %v3802_v21, %v3523_v9  ;;  %v2761_v42 = vunpack.c.h.bf16 %v2590_v38  ;;  %v3004_v32 = vpack.c.bf16 %v2903_v17, %v2903_v17  ;;  %v8196_v17 = vld [vmem:[#allocation28_spill] sm:$0xff] }
 0x418   : > { %v3959_v33 = vmul.f32 %v3802_v21, %v3524_v31  ;;  %v3525_v7 = vunpack.c.l.bf16 %v3387_v57  ;;  %v2907_v50 = vadd.f32 %v7088_v29, %v2760_v10  ;;  %v3526_v23 = vunpack.c.h.bf16 %v3387_v57  ;;  %v2494_v38 = vpop.f32.mrf.mxu0 }
 0x419   : > { %v4180_v54 = vadd.f32 %v4179_v26, %v3957_v48  ;;  %v4191_v15 = vadd.f32 %v4190_v40, %v3958_v43  ;;  %v2908_v19 = vadd.f32 %v7090_v60, %v2761_v42  ;;  %v2906_v52 = vadd.f32 %v7101_v25, %v2759_v58 }
 0x41a   : > { %v4202_v55 = vadd.f32 %v4201_v30, %v3959_v33  ;;  %v2591_v44 = vpack.c.bf16 %v2493_v47, %v2493_v47  ;;  %v2108_v62 = vadd.f32 %v2107_v0, %v8195_v5  ;;  %v3143_v49 = vunpack.c.l.bf16 %v3004_v32  ;;  %v8197_v5 = vld [vmem:[#allocation52_spill] sm:$0xff] }
 0x41b   : > { %v4181_v37 = vrot.slane %v4180_v54, 4  ;;  %v4192_v13 = vrot.slane %v4191_v15, 4  ;;  %v5590_v12 = vpop.eup %5589  ;;  %v3007_v59 = vpack.c.bf16 %v2908_v19, %v2907_v50  ;;  %v3960_v24 = vmul.f32 %v7651_v28, %v3525_v7 }
 0x41c   : > { %v4203_v35 = vrot.slane %v4202_v55, 4  ;;  %v5592_v45 = vpop.eup %5591  ;;  %v2762_v27 = vunpack.c.l.bf16 %v2591_v44  ;;  %v2592_v51 = vpack.c.bf16 %v2108_v62, %v8196_v17  ;;  %v3961_v0 = vmul.f32 %v7651_v28, %v3526_v23 }
 0x41d   : > { %v4182_v26 = vadd.f32 %v4181_v37, %v4180_v54  ;;  %v4193_v40 = vadd.f32 %v4192_v13, %v4191_v15  ;;  %v3389_v36 = vpack.c.bf16 %v5592_v45, %v5590_v12  ;;  %v3006_v39 = vpack.c.bf16 %v2906_v52, %v2906_v52  ;;  %v2239_v54 = vpop.f32.mrf.mxu2  ;;  %v2368_v15 = vpop.f32.mrf.mxu3 }
 0x41e   : > { %v4204_v16 = vadd.f32 %v4203_v35, %v4202_v55  ;;  %v3147_v1 = vunpack.c.l.bf16 %v3007_v59  ;;  %v3148_v31 = vunpack.c.h.bf16 %v3007_v59  ;;  %v2909_v57 = vadd.f32 %v7101_v25, %v2762_v27  ;;  %v2112_v13 = vpop.f32.mrf.mxu1 }
 0x41f   : > { %v4183_v63 = vrot.slane %v4182_v26, 2  ;;  %v4194_v41 = vrot.slane %v4193_v40, 2  ;;  %v3528_v11 = vunpack.c.l.bf16 %v3389_v36  ;;  %v3529_v22 = vunpack.c.h.bf16 %v3389_v36  ;;  %v8200_v36 = vld [vmem:[#allocation54_spill] sm:$0xff] }
 0x420   : > { %v4205_v14 = vrot.slane %v4204_v16, 2  ;;  %v2763_v4 = vunpack.c.l.bf16 %v2592_v51  ;;  %v3146_v33 = vunpack.c.l.bf16 %v3006_v39  ;;  %5593 = vtanh.f32 %v3147_v1  ;;  %v2497_v59 = vpop.f32.mrf.mxu0 }
 0x421   : > { %v4184_v34 = vadd.f32 %v4183_v63, %v4182_v26  ;;  %v4195_v9 = vadd.f32 %v4194_v41, %v4193_v40  ;;  %v3963_v43 = vmul.f32 %v7657_v8, %v3528_v11  ;;  %v3964_v10 = vmul.f32 %v7657_v8, %v3529_v22  ;;  %v7723_v22 = vpop.permute.xlu0 %3826 }
 0x422   : > { %v4206_v21 = vadd.f32 %v4205_v14, %v4204_v16  ;;  %v2764_v47 = vunpack.c.h.bf16 %v2592_v51  ;;  %5595 = vtanh.f32 %v3148_v31  ;;  %v3008_v50 = vpack.c.bf16 %v2909_v57, %v2909_v57 }
 0x423   : > { %v4185_v46 = vrot.slane %v4184_v34, 1  ;;  %v4196_v48 = vrot.slane %v4195_v9, 1  ;;  %v4209_v55 = vadd.f32 %v3963_v43, %v3960_v24  ;;  %v4220_v7 = vadd.f32 %v3964_v10, %v3961_v0 }
 0x424   : > { %v4207_v30 = vrot.slane %v4206_v21, 1  ;;  %v2910_v37 = vadd.f32 %v7088_v29, %v2763_v4  ;;  %v2911_v35 = vadd.f32 %v7090_v60, %v2764_v47  ;;  %v2366_v52 = vadd.f32 %v2365_v6, %v2236_v3 }
 0x425   : > { %v4186_v58 = vadd.f32 %v4185_v46, %v4184_v34  ;;  %v4197_v42 = vadd.f32 %v4196_v48, %v4195_v9  ;;  %v2111_v62 = vadd.f32 %v2110_v2, %v8197_v5  ;;  %v2369_v12 = vadd.f32 %v2368_v15, %v2239_v54  ;;  %v2241_v34 = vpop.f32.mrf.mxu2  ;;  %v2370_v9 = vpop.f32.mrf.mxu3 }
 0x426   : > { %v4208_v32 = vadd.f32 %v4207_v30, %v4206_v21  ;;  %5597 = vtanh.f32 %v3143_v49  ;;  %v3009_v26 = vpack.c.bf16 %v2911_v35, %v2910_v37  ;;  %v2495_v40 = vadd.f32 %v2494_v38, %v2366_v52  ;;  %v5594_v16 = vpop.eup %5593 }
 0x427   : > { %v7704_v23 = vsel %vm4276_vm5, %v4186_v58, %v7630_v61  ;;  %v7708_v19 = vsel %vm4276_vm5, %v4197_v42, %v7634_v18  ;;  %v8198_v61 = vld [vmem:[#allocation9_spill] sm:$0xff]  ;;  %5599 = vtanh.f32 %v3146_v33  ;;  %v8199_v18 = vld [vmem:[#allocation50_spill] sm:$0xff]  ;;  %v2498_v17 = vadd.f32 %v2497_v59, %v2369_v12 }
 0x428   : > { %v7713_v44 = vsel %vm4276_vm5, %v4208_v32, %v7642_v20  ;;  %v2113_v45 = vadd.f32 %v2112_v13, %v8198_v61  ;;  %v2594_v27 = vpack.c.bf16 %v2111_v62, %v8199_v18  ;;  %v3149_v51 = vunpack.c.l.bf16 %v3008_v50  ;;  %v5596_v20 = vpop.eup %5595  ;;  %v2499_v12 = vpop.f32.mrf.mxu0 }
 0x429   : > { %v3150_v3 = vunpack.c.l.bf16 %v3009_v26  ;;  %v3151_v6 = vunpack.c.h.bf16 %v3009_v26  ;;  %v2593_v63 = vpack.c.bf16 %v2495_v40, %v2495_v40  ;;  %v2595_v2 = vpack.c.bf16 %v2498_v17, %v2498_v17 }
 0x42a   : > { %v2766_v41 = vunpack.c.l.bf16 %v2594_v27  ;;  %v2767_v24 = vunpack.c.h.bf16 %v2594_v27  ;;  %v2596_v49 = vpack.c.bf16 %v2113_v45, %v8200_v36  ;;  %v3391_v14 = vpack.c.bf16 %v5596_v20, %v5594_v16 }
 0x42b   : > { %5601 = vtanh.f32 %v3150_v3  ;;  %v2765_v38 = vunpack.c.l.bf16 %v2593_v63  ;;  %v2768_v1 = vunpack.c.l.bf16 %v2595_v2  ;;  %v2371_v47 = vadd.f32 %v2370_v9, %v2241_v34 }
 0x42c   : > { %5603 = vtanh.f32 %v3151_v6  ;;  %v2913_v0 = vadd.f32 %v7088_v29, %v2766_v41  ;;  %v2914_v39 = vadd.f32 %v7090_v60, %v2767_v24  ;;  %v7721_v11 = vpop.eup %5597  ;;  %v3531_v21 = vunpack.c.l.bf16 %v3391_v14 }
 0x42d   : > { %v3532_v31 = vunpack.c.h.bf16 %v3391_v14  ;;  %5605 = vtanh.f32 %v3149_v51  ;;  %v5600_v57 = vpop.eup %5599  ;;  %v2912_v4 = vadd.f32 %v7101_v25, %v2765_v38  ;;  %v2915_v48 = vadd.f32 %v7101_v25, %v2768_v1 }
 0x42e   : > { %v3011_v46 = vpack.c.bf16 %v2914_v39, %v2913_v0  ;;  %v2769_v43 = vunpack.c.l.bf16 %v2596_v49  ;;  %v3966_v10 = vmul.f32 %v7671_v56, %v3531_v21  ;;  %v2770_v33 = vunpack.c.h.bf16 %v2596_v49 }
 0x42f   : > { %v3967_v30 = vmul.f32 %v7671_v56, %v3532_v31  ;;  %v3010_v54 = vpack.c.bf16 %v2912_v4, %v2912_v4  ;;  %v3012_v42 = vpack.c.bf16 %v2915_v48, %v2915_v48  ;;  %v2500_v59 = vadd.f32 %v2499_v12, %v2371_v47 }
 0x430   : > { %v3153_v15 = vunpack.c.l.bf16 %v3011_v46  ;;  %v3154_v58 = vunpack.c.h.bf16 %v3011_v46  ;;  %v4210_v50 = vadd.f32 %v4209_v55, %v3966_v10  ;;  %v2916_v13 = vadd.f32 %v7088_v29, %v2769_v43  ;;  %v7731_v29 = vpop.permute.xlu0 %4312 }
 0x431   : > { %v5602_v32 = vpop.eup %5601  ;;  %v4221_v37 = vadd.f32 %v4220_v7, %v3967_v30  ;;  %v3152_v52 = vunpack.c.l.bf16 %v3010_v54  ;;  %v3155_v5 = vunpack.c.l.bf16 %v3012_v42  ;;  %v2917_v62 = vadd.f32 %v7090_v60, %v2770_v33 }
 0x432   : > { %v5604_v35 = vpop.eup %5603  ;;  %5607 = vtanh.f32 %v3153_v15  ;;  %v2597_v55 = vpack.c.bf16 %v2500_v59, %v2500_v59  ;;  %v3390_v27 = vpack.c.bf16 %v5600_v57, %v5600_v57  ;;  %v3388_v6 = vpack.c.bf16 %v7721_v11, %v7721_v11 }
 0x433   : > { %v5606_v26 = vpop.eup %5605  ;;  %v3393_v40 = vpack.c.bf16 %v5604_v35, %v5602_v32  ;;  %5609 = vtanh.f32 %v3154_v58  ;;  %v3013_v61 = vpack.c.bf16 %v2917_v62, %v2916_v13  ;;  %vm4320_vm6 = vweird.f32 %v7731_v29 }
 0x434   : > { %5611 = vtanh.f32 %v3152_v52  ;;  %v2771_v51 = vunpack.c.l.bf16 %v2597_v55  ;;  %v3392_v63 = vpack.c.bf16 %v5606_v26, %v5606_v26  ;;  %v3530_v38 = vunpack.c.l.bf16 %v3390_v27 }
 0x435   : > { %v3534_v45 = vunpack.c.l.bf16 %v3393_v40  ;;  %v3535_v16 = vunpack.c.h.bf16 %v3393_v40  ;;  %5613 = vtanh.f32 %v3155_v5  ;;  %v3156_v7 = vunpack.c.l.bf16 %v3013_v61 }
 0x436   : > { %v3157_v18 = vunpack.c.h.bf16 %v3013_v61  ;;  %v2918_v2 = vadd.f32 %v7101_v25, %v2771_v51  ;;  %v3527_v9 = vunpack.c.l.bf16 %v3388_v6  ;;  %v3533_v11 = vunpack.c.l.bf16 %v3392_v63 }
 0x437   : > { %v3969_v17 = vmul.f32 %v7683_v53, %v3534_v45  ;;  %v3970_v60 = vmul.f32 %v7683_v53, %v3535_v16  ;;  %5615 = vtanh.f32 %v3156_v7  ;;  %v3965_v48 = vmul.f32 %v7657_v8, %v3530_v38 }
 0x438   : > { %v5608_v3 = vpop.eup %5607  ;;  %5617 = vtanh.f32 %v3157_v18  ;;  %v3014_v0 = vpack.c.bf16 %v2918_v2, %v2918_v2  ;;  %v3962_v54 = vmul.f32 %v7651_v28, %v3527_v9  ;;  %v3968_v15 = vmul.f32 %v7671_v56, %v3533_v11 }
 0x439   : > { %v5610_v20 = vpop.eup %5609  ;;  %v4211_v41 = vadd.f32 %v4210_v50, %v3969_v17  ;;  %v4222_v24 = vadd.f32 %v4221_v37, %v3970_v60  ;;  %5619 = vrcp.f32 %v7731_v29  ;;  %v3832_v37 = vpop.permute.xlu2 %3831 }
 0x43a   : > { %v5612_v36 = vpop.eup %5611  ;;  %v3395_v49 = vpack.c.bf16 %v5610_v20, %v5608_v3  ;;  %v3158_v21 = vunpack.c.l.bf16 %v3014_v0  ;;  %v4231_v13 = vadd.f32 %v3965_v48, %v3962_v54 }
 0x43b   : > { %v5614_v14 = vpop.eup %5613  ;;  %v3394_v39 = vpack.c.bf16 %v5612_v36, %v5612_v36 }
 0x43c   : > { %v3537_v1 = vunpack.c.l.bf16 %v3395_v49  ;;  %v3538_v34 = vunpack.c.h.bf16 %v3395_v49  ;;  %v3396_v46 = vpack.c.bf16 %v5614_v14, %v5614_v14  ;;  %5621 = vtanh.f32 %v3158_v21 }
 0x43d   : > { %v5616_v31 = vpop.eup %5615  ;;  %v3536_v10 = vunpack.c.l.bf16 %v3394_v39  ;;  %v4232_v62 = vadd.f32 %v4231_v13, %v3968_v15 }
 0x43e   : > { %v3972_v57 = vmul.f32 %v7723_v22, %v3537_v1  ;;  %v3973_v4 = vmul.f32 %v7723_v22, %v3538_v34  ;;  %v5618_v25 = vpop.eup %5617  ;;  %v3539_v58 = vunpack.c.l.bf16 %v3396_v46 }
 0x43f   : > { %v5620_v43 = vpop.eup %5619  ;;  %v3397_v47 = vpack.c.bf16 %v5618_v25, %v5616_v31  ;;  %v3971_v35 = vmul.f32 %v7683_v53, %v3536_v10 }
 0x440   : > { %v4212_v30 = vadd.f32 %v4211_v41, %v3972_v57  ;;  %v4223_v33 = vadd.f32 %v4222_v24, %v3973_v4  ;;  %v4316_v50 = vmul.f32 %v5620_v43, %v7731_v29  ;;  %v3974_v12 = vmul.f32 %v7723_v22, %v3539_v58 }
 0x441   : > { %v3540_v42 = vunpack.c.l.bf16 %v3397_v47  ;;  %v3541_v32 = vunpack.c.h.bf16 %v3397_v47  ;;  %v4233_v56 = vadd.f32 %v4232_v62, %v3971_v35  ;;  %vm4321_vm7 = vweird.f32 %v5620_v43 }
 0x442   : > { %v5622_v5 = vpop.eup %5621  ;;  %v4317_v59 = vsub.f32 1.0, %v4316_v50  ;;  %v4326_v22 = vand.u32 2147483648, %v7731_v29  ;;  %v4324_v41 = vand.u32 2147483647, %v7731_v29  ;;  %vm7750_vm8 = vmor %vm4320_vm6, %vm4321_vm7 }
 0x443   : > { %v3975_v8 = vmul.f32 %v3832_v37, %v3540_v42  ;;  %v3976_v52 = vmul.f32 %v3832_v37, %v3541_v32  ;;  %v3398_v28 = vpack.c.bf16 %v5622_v5, %v5622_v5  ;;  %v4234_v55 = vadd.f32 %v4233_v56, %v3974_v12 }
 0x444   : > { %v4318_v17 = vmul.f32 %v5620_v43, %v4317_v59  ;;  %v4327_v14 = vor.u32 1.1754944e-38, %v4326_v22  ;;  %vm4325_vm10 = vcmp.eq.f32.partialorder %v4324_v41, 8.507059e+37 }
 0x445   : > { %v4213_v26 = vadd.f32 %v4212_v30, %v3975_v8  ;;  %v4224_v40 = vadd.f32 %v4223_v33, %v3976_v52  ;;  %v3542_v16 = vunpack.c.l.bf16 %v3398_v28 }
 0x446   : > { %v4319_v20 = vadd.f32 %v5620_v43, %v4318_v17 }
 0x447   : > { %v4214_v61 = vrot.slane %v4213_v26, 4  ;;  %v4225_v45 = vrot.slane %v4224_v40, 4  ;;  %v3977_v27 = vmul.f32 %v3832_v37, %v3542_v16 }
 0x448   : > { %v4323_v1 = vsel %vm7750_vm8, %v5620_v43, %v4319_v20 }
 0x449   : > { %v4215_v7 = vadd.f32 %v4214_v61, %v4213_v26  ;;  %v4226_v18 = vadd.f32 %v4225_v45, %v4224_v40  ;;  %v4235_v51 = vadd.f32 %v4234_v55, %v3977_v27  ;;  %v4328_v11 = vsel %vm4325_vm10, %v4327_v14, %v4323_v1 }
 0x44b   : > { %v4216_v53 = vrot.slane %v4215_v7, 2  ;;  %v4227_v60 = vrot.slane %v4226_v18, 2  ;;  %v4236_v63 = vrot.slane %v4235_v51, 4 }
 0x44d   : > { %v4217_v3 = vadd.f32 %v4216_v53, %v4215_v7  ;;  %v4228_v6 = vadd.f32 %v4227_v60, %v4226_v18  ;;  %v4237_v49 = vadd.f32 %v4236_v63, %v4235_v51 }
 0x44f   : > { %v4218_v2 = vrot.slane %v4217_v3, 1  ;;  %v4229_v36 = vrot.slane %v4228_v6, 1  ;;  %v4238_v39 = vrot.slane %v4237_v49, 2 }
 0x451   : > { %v4219_v38 = vadd.f32 %v4218_v2, %v4217_v3  ;;  %v4230_v0 = vadd.f32 %v4229_v36, %v4228_v6  ;;  %v4239_v34 = vadd.f32 %v4238_v39, %v4237_v49 }
 0x453   : > { %v4279_v29 = vsel %vm4278_vm9, %v4219_v38, %v7704_v23  ;;  %v4286_v9 = vsel %vm4278_vm9, %v4230_v0, %v7708_v19  ;;  %v4240_v21 = vrot.slane %v4239_v34, 1 }
 0x454   : > { %v4329_v31 = vmul.f32 %v4328_v11, %v4279_v29  ;;  %v4330_v57 = vmul.f32 %v4328_v11, %v4286_v9 }
 0x455   : > { %v4241_v4 = vadd.f32 %v4240_v21, %v4239_v34 }
 0x456   : > { %4332 = vst [vmem:[%s343_s15] sm:$0xff] %v4329_v31 }
 0x457   : > { %v4293_v46 = vsel %vm4278_vm9, %v4241_v4, %v7713_v44  ;;  %4333 = vst [vmem:[%s343_s15 + $0x8] sm:$0xff] %v4330_v57 }
 0x458   : > { %v4331_v23 = vmul.f32 %v4328_v11, %v4293_v46 }
 0x45a   : > { %4334 = vst [vmem:[%s343_s15 + $0x10] sm:$0xff] %v4331_v23 }
 0x45b   : > { %5680 = shalt.err (!%p5677_p1)
}
 0x45c   : > { %5266 = dma.vmem_to_hbm [thread:$0]  (%p5821_p9), %s4352_s21, 384, %s4354_s16, %s4336_s17  }
 0x45d PF: > { %s4365_s28 = sand.u32 1, %s5715_s18   ;;  %p5273_p2 = pnand %p4503_p12, %p5828_p11 }
 0x45e   : > { %s4366_s12 = scalar_lea.sflag [#allocation4], %s4365_s28 }
 0x45f   : > { %p5274_p3 = pneg %p5273_p2 }
 0x461   : > { %5710 = dma.done.wait (%p5274_p3), %s4366_s12, 384  }
 0x462   : > { %5712 = vsyncadd (%p5274_p3), %s4366_s12, 4294966912  ;;  %s21_s23 = sadd.s32 1, %s5735_s23   ;;  %s8203_s18 = smov %s5719_s19 }
 0x463   : > { %p18_p4 = scmp.ge.s32.totalorder %s21_s23, 4   ;;  %s8204_s19 = smov %s5723_s20 }
 0x464   : > { %s8205_s20 = smov %s5826_s7  ;;  %s8206_s21 = smov %s5731_s22 }
 0x465   : > { %s8207_s22 = smov %s8209_s26  ;;  %20 = sbr.rel (!%p18_p4) target bundleno = 6 (0x6), region = 105 }
 0x46a   :  { %4372 = vsyncpa [#allocation3], 1 }
 0x46b   :  { %4374 = vsyncpa [#allocation3 + $0x1], 1 }
 0x46c   :  { %4375 = vsyncpa [#allocation4], 1 }
 0x46d   :  { %4377 = vsyncpa [#allocation4 + $0x1], 1 }

</bundles_post_ra>
